<compile_context>
chip_gen: v6e
topology: v6e:2x2x1
jax: 0.10.0
libtpu: 0.0.40
codegen_flags: <defaults>
</compile_context>

<pallas_src>
import jax
import jax.numpy as jnp
from jax.experimental import pallas as pl
from jax.experimental.pallas import tpu as pltpu

IMAGE_SIZE = 28
IMG_SHAPE = (1, IMAGE_SIZE, IMAGE_SIZE)
LATENT_DIM = 100
N_CLASSES = 10
DEPTH = 128
BN_EPS = 0.8            # nn.BatchNorm1d(output, 0.8) -> eps = 0.8
LRELU_SLOPE = 0.2

IN_DIM = LATENT_DIM + N_CLASSES          # 110
IN_PAD = 128                             # lane-aligned first contraction dim
OUT_DIM = IMAGE_SIZE * IMAGE_SIZE        # 784
OUT_PAD = 896                            # 7 * 128, lane-dense output slab

LAYER_DIMS = [
    (IN_DIM, DEPTH),                     # 110 -> 128
    (DEPTH, DEPTH * 2),                  # 128 -> 256
    (DEPTH * 2, DEPTH * 4),              # 256 -> 512
    (DEPTH * 4, DEPTH * 8),              # 512 -> 1024
    (DEPTH * 8, OUT_DIM),                # 1024 -> 784
]

# --- packed small-vector layout (all offsets / widths are multiples of 128) --
_VEC_ORDER = [
    ("g1", DEPTH), ("be1", DEPTH),
    ("g2", DEPTH * 2), ("be2", DEPTH * 2),
    ("g3", DEPTH * 4), ("be3", DEPTH * 4),
    ("g4", DEPTH * 8), ("be4", DEPTH * 8),
    ("b5", OUT_PAD),
]
VEC_OFF = {}
_off = 0
for _name, _width in _VEC_ORDER:
    VEC_OFF[_name] = (_off, _width)
    _off += _width
VEC_LEN = _off                            # 4736 = 37 * 128


def _generator_kernel(x_ref, w1_ref, w2_ref, w3_ref, w4_hbm, w5_hbm, vec_ref,
                      out_ref, w4_vmem, w5_vmem, dma_sem):
    """Fused MLP: 5 bf16 matmuls (f32 acc) + 4 folded-BN/LeakyReLU + tanh.

    w4/w5 are prefetched HBM->VMEM manually so their DMA overlaps the
    layer-1..3 compute instead of being serialized before the body.
    """
    cp_w4 = pltpu.make_async_copy(w4_hbm, w4_vmem, dma_sem.at[0])
    cp_w5 = pltpu.make_async_copy(w5_hbm, w5_vmem, dma_sem.at[1])
    cp_w4.start()
    cp_w5.start()

    def sl(name):
        off, width = VEC_OFF[name]
        return vec_ref[:, off:off + width]                     # (1, width) f32

    def mm(h_bf16, w):
        # bf16 x bf16 -> f32 accumulation on the MXU (no bias: BN cancels it).
        return jnp.dot(h_bf16, w, preferred_element_type=jnp.float32)

    def bn_lrelu(h, g, be):
        # Single-pass batch stats (biased variance), folded into one FMA.
        inv_b = 1.0 / h.shape[0]
        mean = jnp.sum(h, axis=0, keepdims=True) * inv_b
        mean_sq = jnp.sum(h * h, axis=0, keepdims=True) * inv_b
        var = jnp.maximum(mean_sq - mean * mean, 0.0)           # guard f32 cancellation
        scale = g * jax.lax.rsqrt(var + BN_EPS)                 # EUP rsqrt (free slot)
        shift = be - mean * scale
        hn = h * scale + shift                                  # one full-width FMA
        # LeakyReLU(0.2) as mul + max (no compare/select predicate vreg).
        y = jnp.maximum(hn, LRELU_SLOPE * hn)
        return y.astype(jnp.bfloat16)                           # bf16 feed for next MXU

    h = bn_lrelu(mm(x_ref[...], w1_ref[...]), sl("g1"), sl("be1"))
    h = bn_lrelu(mm(h, w2_ref[...]), sl("g2"), sl("be2"))
    h = bn_lrelu(mm(h, w3_ref[...]), sl("g3"), sl("be3"))
    cp_w4.wait()                                                # w4 hidden behind layers 1-3
    h = bn_lrelu(mm(h, w4_vmem[...]), sl("g4"), sl("be4"))
    cp_w5.wait()                                                # w5 hidden behind layers 1-4
    out_ref[...] = jnp.tanh(mm(h, w5_vmem[...]) + sl("b5"))     # (B, 896) f32


def init_params(key):
    """Deterministic f32 parameter init (synthetic; shapes match the nn.Module)."""
    params = {}
    keys = jax.random.split(key, 2 + 2 * len(LAYER_DIMS))
    k_iter = iter(keys)

    # Embedding(10, 10): N(0, 1) like PyTorch default.
    params["embed"] = jax.random.normal(next(k_iter), (N_CLASSES, N_CLASSES),
                                        dtype=jnp.float32)

    for li, (din, dout) in enumerate(LAYER_DIMS):
        bound = 1.0 / jnp.sqrt(float(din))
        params[f"w{li+1}"] = jax.random.uniform(next(k_iter), (din, dout),
                                                jnp.float32, -bound, bound)
        params[f"b{li+1}"] = jax.random.uniform(next(k_iter), (1, dout),
                                                jnp.float32, -bound, bound)
        if li < len(LAYER_DIMS) - 1:
            # Non-trivial gamma/beta so the BN affine path is exercised.
            col = jnp.arange(dout, dtype=jnp.float32)
            params[f"g{li+1}"] = (1.0 + 0.01 * jnp.cos(col)).reshape(1, dout)
            params[f"be{li+1}"] = (0.02 * jnp.sin(col)).reshape(1, dout)
    return params


def prepare_params(params):
    """One-time prep: lane-pad w1/w5, cast matmul weights to bf16, pack the
    small per-layer vectors (gamma/beta/b5) into one lane-aligned array.

    b1..b4 are intentionally NOT packed: a bias before training-mode BatchNorm
    cancels exactly, so the kernel never needs them.
    TODO(synk): optionally quantize w2..w5 to int8 (v5e/v6e) / fp8 (v7x) with
    per-column scales folded into the BN scale / layer-5 epilogue to halve
    weight HBM bytes; kept bf16 here for a single portable script.
    """
    p = {"embed": params["embed"]}

    # Layer 1: pad contraction dim 110 -> 128 with zero rows (exact result).
    w1 = jnp.zeros((IN_PAD, DEPTH), jnp.float32).at[:IN_DIM, :].set(params["w1"])
    p["w1"] = w1.astype(jnp.bfloat16)
    for li in (2, 3, 4):
        p[f"w{li}"] = params[f"w{li}"].astype(jnp.bfloat16)

    # Layer 5: pad output dim 784 -> 896 with zero columns (lane-dense stores).
    w5 = jnp.zeros((DEPTH * 8, OUT_PAD), jnp.float32).at[:, :OUT_DIM].set(params["w5"])
    p["w5"] = w5.astype(jnp.bfloat16)

    # Packed (1, 4736) f32 vector: g1,be1,...,g4,be4,b5(padded to 896).
    vec = jnp.zeros((1, VEC_LEN), jnp.float32)
    for name, _width in _VEC_ORDER:
        off, width = VEC_OFF[name]
        if name == "b5":
            vec = vec.at[:, off:off + OUT_DIM].set(params["b5"])
        else:
            vec = vec.at[:, off:off + width].set(params[name])
    p["vec"] = vec
    return p


@jax.jit
def generator_forward(noise, labels, prepared):
    """noise: (B, 100) f32, labels: (B,) int32 -> (B, 1, 28, 28) f32."""
    batch = noise.shape[0]

    # Glue: embedding lookup + concat + zero-pad to 128 lanes + bf16 cast.
    embedded = jnp.take(prepared["embed"], labels, axis=0)            # (B, 10)
    gen_input = jnp.concatenate(
        [embedded, noise, jnp.zeros((batch, IN_PAD - IN_DIM), jnp.float32)],
        axis=-1).astype(jnp.bfloat16)                                 # (B, 128) bf16

    kernel_args = [gen_input, prepared["w1"], prepared["w2"], prepared["w3"],
                   prepared["w4"], prepared["w5"], prepared["vec"]]

    vmem = pl.BlockSpec(memory_space=pltpu.MemorySpace.VMEM)
    hbm = pl.BlockSpec(memory_space=pl.ANY)     # w4 / w5: manual overlapped DMA

    # TODO(synk): for large batches (B >> 256), tile B with a grid — weights on
    # a constant index_map so they stay VMEM-resident, batch axis "parallel"
    # for v7x's 2 TensorCores, and a two-phase BN-stat scheme (accumulate then
    # apply), capping any single block at ~2048 rows for v7x's 64 MiB VMEM.
    # Single-block is kept here because BN statistics couple across batch tiles.
    img_pad = pl.pallas_call(
        _generator_kernel,
        out_shape=jax.ShapeDtypeStruct((batch, OUT_PAD), jnp.float32),
        in_specs=[vmem, vmem, vmem, vmem, hbm, hbm, vmem],
        out_specs=vmem,
        scratch_shapes=[
            pltpu.VMEM((DEPTH * 4, DEPTH * 8), jnp.bfloat16),   # w4 landing buffer
            pltpu.VMEM((DEPTH * 8, OUT_PAD), jnp.bfloat16),     # w5 landing buffer
            pltpu.SemaphoreType.DMA((2,)),
        ],
        compiler_params=pltpu.CompilerParams(vmem_limit_bytes=32 << 20),
    )(*kernel_args)

    # TODO(synk): at large batch, let the consumer read the valid 784 columns
    # of the (B, 896) slab directly to avoid this extra full-output pass.
    return img_pad[:, :OUT_DIM].reshape(batch, *IMG_SHAPE)


def generator_forward_ref_matched(noise, labels, prepared):
    """Pure-JAX reference with math identical to the kernel (bf16, no b1..b4)."""
    batch = noise.shape[0]
    vec = prepared["vec"]

    def sl(name):
        off, width = VEC_OFF[name]
        return vec[:, off:off + width]

    embedded = jnp.take(prepared["embed"], labels, axis=0)
    h = jnp.concatenate(
        [embedded, noise, jnp.zeros((batch, IN_PAD - IN_DIM), jnp.float32)],
        axis=-1).astype(jnp.bfloat16)
    for li in range(1, 5):
        h = jnp.dot(h, prepared[f"w{li}"], preferred_element_type=jnp.float32)
        inv_b = 1.0 / batch
        mean = jnp.sum(h, axis=0, keepdims=True) * inv_b
        mean_sq = jnp.sum(h * h, axis=0, keepdims=True) * inv_b
        var = jnp.maximum(mean_sq - mean * mean, 0.0)
        scale = sl(f"g{li}") * jax.lax.rsqrt(var + BN_EPS)
        shift = sl(f"be{li}") - mean * scale
        h = h * scale + shift
        h = jnp.maximum(h, LRELU_SLOPE * h).astype(jnp.bfloat16)
    h = jnp.tanh(jnp.dot(h, prepared["w5"], preferred_element_type=jnp.float32)
                 + sl("b5"))
    return h[:, :OUT_DIM].reshape(batch, *IMG_SHAPE)


def generator_forward_ref_f32(noise, labels, params):
    """Full-precision reference matching the original PyTorch module math
    (including the b1..b4 biases that BatchNorm cancels)."""
    embedded = jnp.take(params["embed"], labels, axis=0)
    h = jnp.concatenate([embedded, noise], axis=-1)
    for li in range(1, 6):
        h = h @ params[f"w{li}"] + params[f"b{li}"]
        if li < 5:
            mean = jnp.mean(h, axis=0, keepdims=True)
            var = jnp.mean((h - mean) ** 2, axis=0, keepdims=True)
            h = (h - mean) * jax.lax.rsqrt(var + BN_EPS)
            h = h * params[f"g{li}"] + params[f"be{li}"]
            h = jnp.where(h > 0, h, LRELU_SLOPE * h)
        else:
            h = jnp.tanh(h)
    return h.reshape(h.shape[0], *IMG_SHAPE)


if __name__ == "__main__":
    key = jax.random.PRNGKey(0)
    k_params, k_noise, k_labels = jax.random.split(key, 3)

    batch = 8
    params = init_params(k_params)
    prepared = prepare_params(params)
    noise = jax.random.normal(k_noise, (batch, LATENT_DIM), dtype=jnp.float32)
    labels = jax.random.randint(k_labels, (batch,), 0, N_CLASSES, dtype=jnp.int32)

    img = generator_forward(noise, labels, prepared)
    img = jax.block_until_ready(img)

    assert img.shape == (batch, 1, IMAGE_SIZE, IMAGE_SIZE), img.shape
    assert img.dtype == jnp.float32

    # Tight check vs identical-math (bf16, bias-dropped) reference.
    ref_m = generator_forward_ref_matched(noise, labels, prepared)
    assert jnp.allclose(img, ref_m, atol=2e-2, rtol=2e-2), (
        float(jnp.max(jnp.abs(img - ref_m))))

    # Loose check vs the original full-f32 module semantics (bf16 rounding plus
    # the exactly-cancelling b1..b4 only).
    ref_f = generator_forward_ref_f32(noise, labels, params)
    assert jnp.allclose(img, ref_f, atol=1e-1, rtol=1e-1), (
        float(jnp.max(jnp.abs(img - ref_f))))

    print("KERNEL_OK")
</pallas_src>

<mosaic_0001>
module attributes {stable_mosaic.version = 11 : i64} {
  func.func @_generator_kernel(%arg0: memref<8x128xbf16, #tpu.memory_space<vmem>>, %arg1: memref<128x128xbf16, #tpu.memory_space<vmem>>, %arg2: memref<128x256xbf16, #tpu.memory_space<vmem>>, %arg3: memref<256x512xbf16, #tpu.memory_space<vmem>>, %arg4: memref<512x1024xbf16, #tpu.memory_space<any>>, %arg5: memref<1024x896xbf16, #tpu.memory_space<any>>, %arg6: memref<1x4736xf32, #tpu.memory_space<vmem>>, %arg7: memref<8x896xf32, #tpu.memory_space<vmem>>, %arg8: memref<512x1024xbf16, #tpu.memory_space<vmem>>, %arg9: memref<1024x896xbf16, #tpu.memory_space<vmem>>, %arg10: memref<2x!tpu.dma_semaphore, #tpu.memory_space<semaphore_mem>>) attributes {dimension_semantics = [], scalar_prefetch = 0 : i64, scratch_operands = 3 : i64, tpu.core_type = #tpu.core_type<tc>} {
    %c0_i32 = arith.constant 0 : i32
    %0 = tpu.memref_slice %arg10[%c0_i32] : memref<2x!tpu.dma_semaphore, #tpu.memory_space<semaphore_mem>> -> memref<1x!tpu.dma_semaphore, #tpu.memory_space<semaphore_mem>>
    %1 = tpu.memref_squeeze %0 : memref<1x!tpu.dma_semaphore, #tpu.memory_space<semaphore_mem>> -> memref<!tpu.dma_semaphore, #tpu.memory_space<semaphore_mem>>
    tpu.enqueue_dma source(%arg4 : memref<512x1024xbf16, #tpu.memory_space<any>>) target(%arg8 : memref<512x1024xbf16, #tpu.memory_space<vmem>>) target_semaphore(%1 : memref<!tpu.dma_semaphore, #tpu.memory_space<semaphore_mem>>)
    %c1_i32 = arith.constant 1 : i32
    %2 = tpu.memref_slice %arg10[%c1_i32] : memref<2x!tpu.dma_semaphore, #tpu.memory_space<semaphore_mem>> -> memref<1x!tpu.dma_semaphore, #tpu.memory_space<semaphore_mem>>
    %3 = tpu.memref_squeeze %2 : memref<1x!tpu.dma_semaphore, #tpu.memory_space<semaphore_mem>> -> memref<!tpu.dma_semaphore, #tpu.memory_space<semaphore_mem>>
    tpu.enqueue_dma source(%arg5 : memref<1024x896xbf16, #tpu.memory_space<any>>) target(%arg9 : memref<1024x896xbf16, #tpu.memory_space<vmem>>) target_semaphore(%3 : memref<!tpu.dma_semaphore, #tpu.memory_space<semaphore_mem>>)
    %c0 = arith.constant 0 : index
    %c0_0 = arith.constant 0 : index
    %4 = vector.load %arg0[%c0, %c0_0] : memref<8x128xbf16, #tpu.memory_space<vmem>>, vector<8x128xbf16>
    %c0_1 = arith.constant 0 : index
    %c0_2 = arith.constant 0 : index
    %5 = vector.load %arg1[%c0_1, %c0_2] : memref<128x128xbf16, #tpu.memory_space<vmem>>, vector<128x128xbf16>
    %cst = arith.constant dense<0.000000e+00> : vector<8x128xf32>
    %6 = tpu.matmul %4, %5, %cst {dimension_numbers = #tpu.dot_dimension_numbers<[1], [0], [0], [1], [0, 0, 1, 1], [], []>} : vector<8x128xbf16>, vector<128x128xbf16>, vector<8x128xf32> -> vector<8x128xf32>
    %c0_3 = arith.constant 0 : index
    %c0_4 = arith.constant 0 : index
    %7 = vector.load %arg6[%c0_3, %c0_4] : memref<1x4736xf32, #tpu.memory_space<vmem>>, vector<1x128xf32>
    %c0_5 = arith.constant 0 : index
    %c128 = arith.constant 128 : index
    %8 = vector.load %arg6[%c0_5, %c128] : memref<1x4736xf32, #tpu.memory_space<vmem>>, vector<1x128xf32>
    %cst_6 = arith.constant dense<0.000000e+00> : vector<128xf32>
    %9 = vector.multi_reduction <add>, %6, %cst_6 [0] : vector<8x128xf32> to vector<128xf32>
    %10 = vector.shape_cast %9 : vector<128xf32> to vector<1x128xf32>
    %cst_7 = arith.constant 1.250000e-01 : f32
    %11 = vector.broadcast %cst_7 : f32 to vector<1x128xf32>
    %12 = arith.mulf %10, %11 : vector<1x128xf32>
    %13 = arith.mulf %6, %6 : vector<8x128xf32>
    %cst_8 = arith.constant dense<0.000000e+00> : vector<128xf32>
    %14 = vector.multi_reduction <add>, %13, %cst_8 [0] : vector<8x128xf32> to vector<128xf32>
    %15 = vector.shape_cast %14 : vector<128xf32> to vector<1x128xf32>
    %cst_9 = arith.constant 1.250000e-01 : f32
    %16 = vector.broadcast %cst_9 : f32 to vector<1x128xf32>
    %17 = arith.mulf %15, %16 : vector<1x128xf32>
    %18 = arith.mulf %12, %12 : vector<1x128xf32>
    %19 = arith.subf %17, %18 : vector<1x128xf32>
    %cst_10 = arith.constant 0.000000e+00 : f32
    %20 = vector.broadcast %cst_10 : f32 to vector<1x128xf32>
    %21 = arith.maximumf %19, %20 : vector<1x128xf32>
    %cst_11 = arith.constant 8.000000e-01 : f32
    %22 = vector.broadcast %cst_11 : f32 to vector<1x128xf32>
    %23 = arith.addf %21, %22 : vector<1x128xf32>
    %24 = math.rsqrt %23 : vector<1x128xf32>
    %25 = arith.mulf %7, %24 : vector<1x128xf32>
    %26 = arith.mulf %12, %25 : vector<1x128xf32>
    %27 = arith.subf %8, %26 : vector<1x128xf32>
    %28 = vector.broadcast %25 : vector<1x128xf32> to vector<8x128xf32>
    %29 = arith.mulf %6, %28 : vector<8x128xf32>
    %30 = vector.broadcast %27 : vector<1x128xf32> to vector<8x128xf32>
    %31 = arith.addf %29, %30 : vector<8x128xf32>
    %cst_12 = arith.constant 2.000000e-01 : f32
    %32 = vector.broadcast %cst_12 : f32 to vector<8x128xf32>
    %33 = arith.mulf %32, %31 : vector<8x128xf32>
    %34 = arith.maximumf %31, %33 : vector<8x128xf32>
    %35 = arith.truncf %34 : vector<8x128xf32> to vector<8x128xbf16>
    %c0_13 = arith.constant 0 : index
    %c0_14 = arith.constant 0 : index
    %36 = vector.load %arg2[%c0_13, %c0_14] : memref<128x256xbf16, #tpu.memory_space<vmem>>, vector<128x256xbf16>
    %cst_15 = arith.constant dense<0.000000e+00> : vector<8x256xf32>
    %37 = tpu.matmul %35, %36, %cst_15 {dimension_numbers = #tpu.dot_dimension_numbers<[1], [0], [0], [1], [0, 0, 1, 1], [], []>} : vector<8x128xbf16>, vector<128x256xbf16>, vector<8x256xf32> -> vector<8x256xf32>
    %c0_16 = arith.constant 0 : index
    %c256 = arith.constant 256 : index
    %38 = vector.load %arg6[%c0_16, %c256] : memref<1x4736xf32, #tpu.memory_space<vmem>>, vector<1x256xf32>
    %c0_17 = arith.constant 0 : index
    %c512 = arith.constant 512 : index
    %39 = vector.load %arg6[%c0_17, %c512] : memref<1x4736xf32, #tpu.memory_space<vmem>>, vector<1x256xf32>
    %cst_18 = arith.constant dense<0.000000e+00> : vector<256xf32>
    %40 = vector.multi_reduction <add>, %37, %cst_18 [0] : vector<8x256xf32> to vector<256xf32>
    %41 = vector.shape_cast %40 : vector<256xf32> to vector<1x256xf32>
    %cst_19 = arith.constant 1.250000e-01 : f32
    %42 = vector.broadcast %cst_19 : f32 to vector<1x256xf32>
    %43 = arith.mulf %41, %42 : vector<1x256xf32>
    %44 = arith.mulf %37, %37 : vector<8x256xf32>
    %cst_20 = arith.constant dense<0.000000e+00> : vector<256xf32>
    %45 = vector.multi_reduction <add>, %44, %cst_20 [0] : vector<8x256xf32> to vector<256xf32>
    %46 = vector.shape_cast %45 : vector<256xf32> to vector<1x256xf32>
    %cst_21 = arith.constant 1.250000e-01 : f32
    %47 = vector.broadcast %cst_21 : f32 to vector<1x256xf32>
    %48 = arith.mulf %46, %47 : vector<1x256xf32>
    %49 = arith.mulf %43, %43 : vector<1x256xf32>
    %50 = arith.subf %48, %49 : vector<1x256xf32>
    %cst_22 = arith.constant 0.000000e+00 : f32
    %51 = vector.broadcast %cst_22 : f32 to vector<1x256xf32>
    %52 = arith.maximumf %50, %51 : vector<1x256xf32>
    %cst_23 = arith.constant 8.000000e-01 : f32
    %53 = vector.broadcast %cst_23 : f32 to vector<1x256xf32>
    %54 = arith.addf %52, %53 : vector<1x256xf32>
    %55 = math.rsqrt %54 : vector<1x256xf32>
    %56 = arith.mulf %38, %55 : vector<1x256xf32>
    %57 = arith.mulf %43, %56 : vector<1x256xf32>
    %58 = arith.subf %39, %57 : vector<1x256xf32>
    %59 = vector.broadcast %56 : vector<1x256xf32> to vector<8x256xf32>
    %60 = arith.mulf %37, %59 : vector<8x256xf32>
    %61 = vector.broadcast %58 : vector<1x256xf32> to vector<8x256xf32>
    %62 = arith.addf %60, %61 : vector<8x256xf32>
    %cst_24 = arith.constant 2.000000e-01 : f32
    %63 = vector.broadcast %cst_24 : f32 to vector<8x256xf32>
    %64 = arith.mulf %63, %62 : vector<8x256xf32>
    %65 = arith.maximumf %62, %64 : vector<8x256xf32>
    %66 = arith.truncf %65 : vector<8x256xf32> to vector<8x256xbf16>
    %c0_25 = arith.constant 0 : index
    %c0_26 = arith.constant 0 : index
    %67 = vector.load %arg3[%c0_25, %c0_26] : memref<256x512xbf16, #tpu.memory_space<vmem>>, vector<256x512xbf16>
    %cst_27 = arith.constant dense<0.000000e+00> : vector<8x512xf32>
    %68 = tpu.matmul %66, %67, %cst_27 {dimension_numbers = #tpu.dot_dimension_numbers<[1], [0], [0], [1], [0, 0, 1, 1], [], []>} : vector<8x256xbf16>, vector<256x512xbf16>, vector<8x512xf32> -> vector<8x512xf32>
    %c0_28 = arith.constant 0 : index
    %c768 = arith.constant 768 : index
    %69 = vector.load %arg6[%c0_28, %c768] : memref<1x4736xf32, #tpu.memory_space<vmem>>, vector<1x512xf32>
    %c0_29 = arith.constant 0 : index
    %c1280 = arith.constant 1280 : index
    %70 = vector.load %arg6[%c0_29, %c1280] : memref<1x4736xf32, #tpu.memory_space<vmem>>, vector<1x512xf32>
    %cst_30 = arith.constant dense<0.000000e+00> : vector<512xf32>
    %71 = vector.multi_reduction <add>, %68, %cst_30 [0] : vector<8x512xf32> to vector<512xf32>
    %72 = vector.shape_cast %71 : vector<512xf32> to vector<1x512xf32>
    %cst_31 = arith.constant 1.250000e-01 : f32
    %73 = vector.broadcast %cst_31 : f32 to vector<1x512xf32>
    %74 = arith.mulf %72, %73 : vector<1x512xf32>
    %75 = arith.mulf %68, %68 : vector<8x512xf32>
    %cst_32 = arith.constant dense<0.000000e+00> : vector<512xf32>
    %76 = vector.multi_reduction <add>, %75, %cst_32 [0] : vector<8x512xf32> to vector<512xf32>
    %77 = vector.shape_cast %76 : vector<512xf32> to vector<1x512xf32>
    %cst_33 = arith.constant 1.250000e-01 : f32
    %78 = vector.broadcast %cst_33 : f32 to vector<1x512xf32>
    %79 = arith.mulf %77, %78 : vector<1x512xf32>
    %80 = arith.mulf %74, %74 : vector<1x512xf32>
    %81 = arith.subf %79, %80 : vector<1x512xf32>
    %cst_34 = arith.constant 0.000000e+00 : f32
    %82 = vector.broadcast %cst_34 : f32 to vector<1x512xf32>
    %83 = arith.maximumf %81, %82 : vector<1x512xf32>
    %cst_35 = arith.constant 8.000000e-01 : f32
    %84 = vector.broadcast %cst_35 : f32 to vector<1x512xf32>
    %85 = arith.addf %83, %84 : vector<1x512xf32>
    %86 = math.rsqrt %85 : vector<1x512xf32>
    %87 = arith.mulf %69, %86 : vector<1x512xf32>
    %88 = arith.mulf %74, %87 : vector<1x512xf32>
    %89 = arith.subf %70, %88 : vector<1x512xf32>
    %90 = vector.broadcast %87 : vector<1x512xf32> to vector<8x512xf32>
    %91 = arith.mulf %68, %90 : vector<8x512xf32>
    %92 = vector.broadcast %89 : vector<1x512xf32> to vector<8x512xf32>
    %93 = arith.addf %91, %92 : vector<8x512xf32>
    %cst_36 = arith.constant 2.000000e-01 : f32
    %94 = vector.broadcast %cst_36 : f32 to vector<8x512xf32>
    %95 = arith.mulf %94, %93 : vector<8x512xf32>
    %96 = arith.maximumf %93, %95 : vector<8x512xf32>
    %97 = arith.truncf %96 : vector<8x512xf32> to vector<8x512xbf16>
    %c0_i32_37 = arith.constant 0 : i32
    %98 = tpu.memref_slice %arg10[%c0_i32_37] : memref<2x!tpu.dma_semaphore, #tpu.memory_space<semaphore_mem>> -> memref<1x!tpu.dma_semaphore, #tpu.memory_space<semaphore_mem>>
    %99 = tpu.memref_squeeze %98 : memref<1x!tpu.dma_semaphore, #tpu.memory_space<semaphore_mem>> -> memref<!tpu.dma_semaphore, #tpu.memory_space<semaphore_mem>>
    tpu.wait_dma2 semaphore(%99 : memref<!tpu.dma_semaphore, #tpu.memory_space<semaphore_mem>>) src(%arg4 : memref<512x1024xbf16, #tpu.memory_space<any>>) dst(%arg8 : memref<512x1024xbf16, #tpu.memory_space<vmem>>)
    %c0_38 = arith.constant 0 : index
    %c0_39 = arith.constant 0 : index
    %100 = vector.load %arg8[%c0_38, %c0_39] : memref<512x1024xbf16, #tpu.memory_space<vmem>>, vector<512x1024xbf16>
    %cst_40 = arith.constant dense<0.000000e+00> : vector<8x1024xf32>
    %101 = tpu.matmul %97, %100, %cst_40 {dimension_numbers = #tpu.dot_dimension_numbers<[1], [0], [0], [1], [0, 0, 1, 1], [], []>} : vector<8x512xbf16>, vector<512x1024xbf16>, vector<8x1024xf32> -> vector<8x1024xf32>
    %c0_41 = arith.constant 0 : index
    %c1792 = arith.constant 1792 : index
    %102 = vector.load %arg6[%c0_41, %c1792] : memref<1x4736xf32, #tpu.memory_space<vmem>>, vector<1x1024xf32>
    %c0_42 = arith.constant 0 : index
    %c2816 = arith.constant 2816 : index
    %103 = vector.load %arg6[%c0_42, %c2816] : memref<1x4736xf32, #tpu.memory_space<vmem>>, vector<1x1024xf32>
    %cst_43 = arith.constant dense<0.000000e+00> : vector<1024xf32>
    %104 = vector.multi_reduction <add>, %101, %cst_43 [0] : vector<8x1024xf32> to vector<1024xf32>
    %105 = vector.shape_cast %104 : vector<1024xf32> to vector<1x1024xf32>
    %cst_44 = arith.constant 1.250000e-01 : f32
    %106 = vector.broadcast %cst_44 : f32 to vector<1x1024xf32>
    %107 = arith.mulf %105, %106 : vector<1x1024xf32>
    %108 = arith.mulf %101, %101 : vector<8x1024xf32>
    %cst_45 = arith.constant dense<0.000000e+00> : vector<1024xf32>
    %109 = vector.multi_reduction <add>, %108, %cst_45 [0] : vector<8x1024xf32> to vector<1024xf32>
    %110 = vector.shape_cast %109 : vector<1024xf32> to vector<1x1024xf32>
    %cst_46 = arith.constant 1.250000e-01 : f32
    %111 = vector.broadcast %cst_46 : f32 to vector<1x1024xf32>
    %112 = arith.mulf %110, %111 : vector<1x1024xf32>
    %113 = arith.mulf %107, %107 : vector<1x1024xf32>
    %114 = arith.subf %112, %113 : vector<1x1024xf32>
    %cst_47 = arith.constant 0.000000e+00 : f32
    %115 = vector.broadcast %cst_47 : f32 to vector<1x1024xf32>
    %116 = arith.maximumf %114, %115 : vector<1x1024xf32>
    %cst_48 = arith.constant 8.000000e-01 : f32
    %117 = vector.broadcast %cst_48 : f32 to vector<1x1024xf32>
    %118 = arith.addf %116, %117 : vector<1x1024xf32>
    %119 = math.rsqrt %118 : vector<1x1024xf32>
    %120 = arith.mulf %102, %119 : vector<1x1024xf32>
    %121 = arith.mulf %107, %120 : vector<1x1024xf32>
    %122 = arith.subf %103, %121 : vector<1x1024xf32>
    %123 = vector.broadcast %120 : vector<1x1024xf32> to vector<8x1024xf32>
    %124 = arith.mulf %101, %123 : vector<8x1024xf32>
    %125 = vector.broadcast %122 : vector<1x1024xf32> to vector<8x1024xf32>
    %126 = arith.addf %124, %125 : vector<8x1024xf32>
    %cst_49 = arith.constant 2.000000e-01 : f32
    %127 = vector.broadcast %cst_49 : f32 to vector<8x1024xf32>
    %128 = arith.mulf %127, %126 : vector<8x1024xf32>
    %129 = arith.maximumf %126, %128 : vector<8x1024xf32>
    %130 = arith.truncf %129 : vector<8x1024xf32> to vector<8x1024xbf16>
    %c1_i32_50 = arith.constant 1 : i32
    %131 = tpu.memref_slice %arg10[%c1_i32_50] : memref<2x!tpu.dma_semaphore, #tpu.memory_space<semaphore_mem>> -> memref<1x!tpu.dma_semaphore, #tpu.memory_space<semaphore_mem>>
    %132 = tpu.memref_squeeze %131 : memref<1x!tpu.dma_semaphore, #tpu.memory_space<semaphore_mem>> -> memref<!tpu.dma_semaphore, #tpu.memory_space<semaphore_mem>>
    tpu.wait_dma2 semaphore(%132 : memref<!tpu.dma_semaphore, #tpu.memory_space<semaphore_mem>>) src(%arg5 : memref<1024x896xbf16, #tpu.memory_space<any>>) dst(%arg9 : memref<1024x896xbf16, #tpu.memory_space<vmem>>)
    %c0_51 = arith.constant 0 : index
    %c0_52 = arith.constant 0 : index
    %133 = vector.load %arg9[%c0_51, %c0_52] : memref<1024x896xbf16, #tpu.memory_space<vmem>>, vector<1024x896xbf16>
    %cst_53 = arith.constant dense<0.000000e+00> : vector<8x896xf32>
    %134 = tpu.matmul %130, %133, %cst_53 {dimension_numbers = #tpu.dot_dimension_numbers<[1], [0], [0], [1], [0, 0, 1, 1], [], []>} : vector<8x1024xbf16>, vector<1024x896xbf16>, vector<8x896xf32> -> vector<8x896xf32>
    %c0_54 = arith.constant 0 : index
    %c3840 = arith.constant 3840 : index
    %135 = vector.load %arg6[%c0_54, %c3840] : memref<1x4736xf32, #tpu.memory_space<vmem>>, vector<1x896xf32>
    %136 = vector.broadcast %135 : vector<1x896xf32> to vector<8x896xf32>
    %137 = arith.addf %134, %136 : vector<8x896xf32>
    %138 = math.tanh %137 : vector<8x896xf32>
    %c0_55 = arith.constant 0 : index
    %c0_56 = arith.constant 0 : index
    %139 = vector.load %arg7[%c0_55, %c0_56] : memref<8x896xf32, #tpu.memory_space<vmem>>, vector<8x896xf32>
    tpu.vector_store %arg7[%c0_55, %c0_56], %138 {strides = array<i32>} : memref<8x896xf32, #tpu.memory_space<vmem>>, vector<8x896xf32>,
    return
  }
}

</mosaic_0001>

<bundles_post_ra>
// kernel: generator_forward.1
= control target key start
LH: loop header
LB: loop body
LE: loop exit
PB: predicated region body
PF: predicated region fallthrough
CT: control target
= control target key end

     0   :  { %12 = vsyncpa [#allocation6], 0  ;;  %s9278_s0 = inlined_call_operand.vmem [shape: bf16[8,128], index: 0, kind: input, shape index: {}]   ;;  %s9279_s1 = inlined_call_operand.hbm [shape: bf16[128,128], index: 1, kind: input, shape index: {}]   ;;  %s9280_s2 = inlined_call_operand.hbm [shape: bf16[128,256], index: 2, kind: input, shape index: {}]   ;;  %s9281_s3 = inlined_call_operand.hbm [shape: bf16[256,512], index: 3, kind: input, shape index: {}]   ;;  %s9282_s4 = inlined_call_operand.hbm [shape: bf16[512,1024], index: 4, kind: input, shape index: {}]   ;;  %s9283_s5 = inlined_call_operand.hbm [shape: bf16[1024,896], index: 5, kind: input, shape index: {}]   ;;  %s9284_s6 = inlined_call_operand.hbm [shape: f32[1,4736], index: 6, kind: input, shape index: {}]   ;;  %s9285_s7 = inlined_call_operand.vmem [shape: f32[8,896], index: 7, kind: output, shape index: {}]  }
   0x1   :  { %13 = vsyncpa [#allocation8], 0 }
   0x2   :  { %14 = vsyncpa [#allocation11], 0  ;;  %s8861_s24 = smov [#allocation7]  }
   0x3   :  { %s34_s25 = sshll.u32 %s8861_s24, 4  ;;  %s35_s25 = int_to_ptr.vmem [resolvable:$true] %s34_s25 }
   0x4   :  { %s8739_s26 = scalar_lea.vmem %s35_s25, 2048  ;;  %p8744_p1 = scmp.lt.s32.totalorder %s35_s25, %s35_s25 }
   0x5   :  { %p8740_p0 = scmp.ne.s32.totalorder %s35_s25, %s8739_s26  ;;  %p8745_p2 = scmp.lt.s32.totalorder %s8739_s26, %s8739_s26 }
   0x7   :  { %p8746_p3 = por %p8745_p2, %p8744_p1 }
   0x9   :  { %p8747_p4 = pnand %p8746_p3, %p8740_p0 }
   0xb   :  { %8750 = shalt.err (!%p8747_p4)
}
   0xc   :  { %s8862_s27 = smov 128   ;;  %s8863_s28 = smov 8  }
   0xd   :  { %40 = dma.hbm_to_vmem [thread:$0]  %s9280_s2, 2048, %s35_s25, [#allocation8], %s8862_s27, %s8862_s27, %s8863_s28  }
   0xe   :  { %s8864_s8 = smov [#allocation5]  }
   0xf   :  { %s22_s9 = sshll.u32 %s8864_s8, 4  ;;  %s23_s9 = int_to_ptr.vmem [resolvable:$true] %s22_s9 }
  0x10   :  { %s8759_s10 = scalar_lea.vmem %s23_s9, 1024  ;;  %p8764_p6 = scmp.lt.s32.totalorder %s23_s9, %s23_s9 }
  0x11   :  { %p8760_p5 = scmp.ne.s32.totalorder %s23_s9, %s8759_s10  ;;  %p8765_p7 = scmp.lt.s32.totalorder %s8759_s10, %s8759_s10 }
  0x13   :  { %p8766_p8 = por %p8765_p7, %p8764_p6 }
  0x15   :  { %p8767_p9 = pnand %p8766_p8, %p8760_p5 }
  0x17   :  { %8770 = shalt.err (!%p8767_p9)
}
  0x18   :  { %s8865_s11 = smov 64   ;;  %s8866_s12 = smov 4  }
  0x19   :  { %28 = dma.hbm_to_vmem [thread:$0]  %s9279_s1, 1024, %s23_s9, [#allocation6], %s8865_s11, %s8865_s11, %s8866_s12  }
  0x1a   :  { %s8867_s15 = smov [#allocation9]  }
  0x1b   :  { %s46_s16 = sshll.u32 %s8867_s15, 4  ;;  %s47_s16 = int_to_ptr.vmem [resolvable:$true] %s46_s16 }
  0x1c   :  { %s8779_s2 = scalar_lea.vmem %s47_s16, 8192  ;;  %p8784_p11 = scmp.lt.s32.totalorder %s47_s16, %s47_s16 }
  0x1d   :  { %p8780_p10 = scmp.ne.s32.totalorder %s47_s16, %s8779_s2  ;;  %p8785_p12 = scmp.lt.s32.totalorder %s8779_s2, %s8779_s2 }
  0x1f   :  { %p8786_p13 = por %p8785_p12, %p8784_p11 }
  0x21   :  { %p8787_p0 = pnand %p8786_p13, %p8780_p10 }
  0x23   :  { %8790 = shalt.err (!%p8787_p0)
}
  0x24   :  { %s8868_s17 = smov 256   ;;  %s8869_s18 = smov 16  }
  0x25   :  { %52 = dma.hbm_to_vmem [thread:$0]  %s9281_s3, 8192, %s47_s16, [#allocation8], %s8868_s17, %s8868_s17, %s8869_s18  }
  0x26   :  { %s8870_s21 = smov [#allocation10]  }
  0x27   :  { %s59_s22 = sshll.u32 %s8870_s21, 4  ;;  %s60_s22 = int_to_ptr.vmem [resolvable:$true] %s59_s22 }
  0x28   :  { %s8799_s1 = scalar_lea.vmem %s60_s22, 592  ;;  %s8803_s23 = scalar_lea.vmem %s60_s22, 608 }
  0x29   :  { %p8800_p1 = scmp.ne.s32.totalorder %s60_s22, %s8799_s1  ;;  %p8804_p2 = scmp.lt.s32.totalorder %s60_s22, %s60_s22 }
  0x2a   :  { %p8805_p3 = scmp.lt.s32.totalorder %s8803_s23, %s8799_s1 }
  0x2c   :  { %p8806_p4 = por %p8805_p3, %p8804_p2 }
  0x2e   :  { %p8807_p5 = pnand %p8806_p4, %p8800_p1 }
  0x30   :  { %8810 = shalt.err (!%p8807_p5)
}
  0x31   :  { %62 = dma.hbm_to_vmem [thread:$0]  %s9284_s6, 592, %s60_s22, [#allocation11]  }
  0x32   :  { %8851 = dma.done.wait [#allocation6], 1024  }
  0x33   :  { %8852 = vsyncadd [#allocation6], 4294966272 }
  0x34   :  { %8853 = dma.done.wait [#allocation8], 10240  }
  0x35   :  { %8854 = vsyncadd [#allocation8], 4294957056 }
  0x36   :  { %8855 = dma.done.wait [#allocation11], 592  }
  0x37   :  { %8856 = vsyncadd [#allocation11], 4294966704  ;;  %v8871_v0 = vmov 0.0   ;;  %vm8872_vm0 = vmmov 0   ;;  %v7919_v1 = vld [vmem:[#allocation5 + $0x38] sm:$0xff]   ;;  %v7920_v2 = vld [vmem:[#allocation5 + $0x30] sm:$0xff]   ;;  %v230_v50 = vlaneseq }
  0x38   :  { %7883 = vmatprep.subr.bf16.mxu0 %v8871_v0  ;;  %7899 = vmatprep.mubr.msk.bf16.mxu0 %vm8872_vm0, %v8871_v0  ;;  %v7921_v3 = vld [vmem:[#allocation5 + $0x28] sm:$0xff]   ;;  %v7922_v4 = vld [vmem:[#allocation5 + $0x20] sm:$0xff]   ;;  %v7923_v5 = vld [vmem:[#allocation5 + $0x18] sm:$0xff]   ;;  %v8873_v25 = vmov 0   ;;  %s8876_s27 = smov [#allocation3]  }
  0x39   :  { %7884 = vmatpush3.bf16.msra.mxu0 %v7919_v1  ;;  %v7924_v6 = vld [vmem:[#allocation5 + $0x10] sm:$0xff]   ;;  %v7925_v7 = vld [vmem:[#allocation5 + $0x8] sm:$0xff]   ;;  %v7926_v8 = vld [vmem:[#allocation5] sm:$0xff]   ;;  %374 = vmatprep.mubr.bf16.mxu1 %v8873_v25  ;;  %v8932_v51 = vshrl.u32 %v230_v50, 7  ;;  %s95_s28 = sshll.u32 %s8876_s27, 4  ;;  %s96_s28 = int_to_ptr.vmem [resolvable:$true] %s95_s28 }
  0x3a   :  { %7885 = vmatprep.subr.bf16.mxu0 %v8871_v0  ;;  %v99_v9 = vld [vmem:[%s9278_s0] sm:$0xf]  ;;  %v7927_v10 = vld [vmem:[#allocation7 + $0x74] ss:$8 sps:$4 sm:$0xff]   ;;  %v7929_v11 = vld [vmem:[#allocation7 + $0x70] ss:$8 sps:$4 sm:$0xff]  }
  0x3b   :  { %342 = vmatprep.subr.bf16.mxu1 %v7927_v10  ;;  %v7930_v12 = vld [vmem:[#allocation7 + $0x64] ss:$8 sps:$4 sm:$0xff]   ;;  %v7932_v13 = vld [vmem:[#allocation7 + $0x60] ss:$8 sps:$4 sm:$0xff]   ;;  %v7933_v14 = vld [vmem:[#allocation7 + $0x54] ss:$8 sps:$4 sm:$0xff]  }
  0x3c   :  { %343 = vmatpush1.bf16.msra.mxu1 %v7929_v11  ;;  %v7935_v15 = vld [vmem:[#allocation7 + $0x50] ss:$8 sps:$4 sm:$0xff]   ;;  %v7936_v16 = vld [vmem:[#allocation7 + $0x44] ss:$8 sps:$4 sm:$0xff]   ;;  %v7938_v17 = vld [vmem:[#allocation7 + $0x40] ss:$8 sps:$4 sm:$0xff]  }
  0x3d   :  { %7886 = vmatpush3.bf16.msra.mxu0 %v7920_v2  ;;  %344 = vmatprep.subr.bf16.mxu1 %v7930_v12  ;;  %v7939_v18 = vld [vmem:[#allocation7 + $0x34] ss:$8 sps:$4 sm:$0xff]   ;;  %v7941_v19 = vld [vmem:[#allocation7 + $0x30] ss:$8 sps:$4 sm:$0xff]   ;;  %v7942_v20 = vld [vmem:[#allocation7 + $0x24] ss:$8 sps:$4 sm:$0xff]  }
  0x3e   :  { %7887 = vmatprep.subr.bf16.mxu0 %v8871_v0  ;;  %v7944_v21 = vld [vmem:[#allocation7 + $0x20] ss:$8 sps:$4 sm:$0xff]   ;;  %v7945_v22 = vld [vmem:[#allocation7 + $0x14] ss:$8 sps:$4 sm:$0xff]   ;;  %v7947_v23 = vld [vmem:[#allocation7 + $0x10] ss:$8 sps:$4 sm:$0xff]  }
  0x3f   :  { %v7948_v24 = vld [vmem:[#allocation7 + $0x4] ss:$8 sps:$4 sm:$0xff]   ;;  %v7950_v26 = vld [vmem:[#allocation7] ss:$8 sps:$4 sm:$0xff]   ;;  %v8935_v53 = vsub.s32 0, %v8932_v51  ;;  %s8875_s0 = smov [#allocation2]  }
  0x40   :  { %345 = vmatpush1.bf16.msra.mxu1 %v7932_v13  ;;  %v204_v52 = vld [vmem:[#allocation10] sm:$0x1]  ;;  %v205_v56 = vld [vmem:[#allocation10 + $0x1] sm:$0x1]  ;;  %v7953_v2 = vld [vmem:[#allocation9 + $0xe4] ss:$16 sps:$4 sm:$0xff]  }
  0x41   :  { %7888 = vmatpush3.bf16.msra.mxu0 %v7921_v3  ;;  %346 = vmatprep.subr.bf16.mxu1 %v7933_v14  ;;  %v7956_v3 = vld [vmem:[#allocation9 + $0xec] ss:$16 sps:$4 sm:$0xff]   ;;  %v7965_v10 = vld [vmem:[#allocation9 + $0xa4] ss:$16 sps:$4 sm:$0xff]   ;;  %v7963_v12 = vld [vmem:[#allocation9 + $0xa0] ss:$16 sps:$4 sm:$0xff]  }
  0x42   :  { %7889 = vmatprep.subr.bf16.mxu0 %v8871_v0  ;;  %v7968_v11 = vld [vmem:[#allocation9 + $0xac] ss:$16 sps:$4 sm:$0xff]   ;;  %v7966_v13 = vld [vmem:[#allocation9 + $0xa8] ss:$16 sps:$4 sm:$0xff]   ;;  %v7971_v14 = vld [vmem:[#allocation9 + $0x84] ss:$16 sps:$4 sm:$0xff]  }
  0x43   :  { %v7984_v25 = vld [vmem:[#allocation9 + $0x48] ss:$16 sps:$4 sm:$0xff]   ;;  %v8025_v50 = vld [vmem:[#allocation9 + $0x164] ss:$16 sps:$4 sm:$0xff]   ;;  %s83_s26 = sshll.u32 %s8875_s0, 4  ;;  %s84_s26 = int_to_ptr.vmem [resolvable:$true] %s83_s26 }
  0x44   :  { %347 = vmatpush1.bf16.msra.mxu1 %v7935_v15  ;;  %v7974_v15 = vld [vmem:[#allocation9 + $0x8c] ss:$16 sps:$4 sm:$0xff]   ;;  %s8819_s29 = scalar_lea.vmem %s84_s26, 32768  ;;  %p8824_p7 = scmp.lt.s32.totalorder %s84_s26, %s84_s26 }
  0x45   :  { %7890 = vmatpush3.bf16.msra.mxu0 %v7922_v4  ;;  %348 = vmatprep.subr.bf16.mxu1 %v7936_v16  ;;  %v7951_v4 = vld [vmem:[#allocation9 + $0xe0] ss:$16 sps:$4 sm:$0xff]   ;;  %p8820_p6 = scmp.ne.s32.totalorder %s84_s26, %s8819_s29  ;;  %p8825_p8 = scmp.lt.s32.totalorder %s8819_s29, %s8819_s29 }
  0x46   :  { %7891 = vmatprep.subr.bf16.mxu0 %v8871_v0  ;;  %v7969_v16 = vld [vmem:[#allocation9 + $0x80] ss:$16 sps:$4 sm:$0xff]  }
  0x47   :  { %p8826_p9 = por %p8825_p8, %p8824_p7 }
  0x48   :  { %349 = vmatpush1.bf16.msra.mxu1 %v7938_v17  ;;  %v7972_v17 = vld [vmem:[#allocation9 + $0x88] ss:$16 sps:$4 sm:$0xff]  }
  0x49   :  { %7892 = vmatpush3.bf16.msra.mxu0 %v7923_v5  ;;  %350 = vmatprep.subr.bf16.mxu1 %v7939_v18  ;;  %v7954_v5 = vld [vmem:[#allocation9 + $0xe8] ss:$16 sps:$4 sm:$0xff]   ;;  %v7977_v18 = vld [vmem:[#allocation9 + $0x64] ss:$16 sps:$4 sm:$0xff]   ;;  %p8827_p10 = pnand %p8826_p9, %p8820_p6 }
  0x4a   :  { %7893 = vmatprep.subr.bf16.mxu0 %v8871_v0 }
  0x4c   :  { %351 = vmatpush1.bf16.msra.mxu1 %v7941_v19  ;;  %v7980_v19 = vld [vmem:[#allocation9 + $0x6c] ss:$16 sps:$4 sm:$0xff]  }
  0x4d   :  { %7894 = vmatpush3.bf16.msra.mxu0 %v7924_v6  ;;  %352 = vmatprep.subr.bf16.mxu1 %v7942_v20  ;;  %v7959_v6 = vld [vmem:[#allocation9 + $0xc4] ss:$16 sps:$4 sm:$0xff]   ;;  %v7975_v20 = vld [vmem:[#allocation9 + $0x60] ss:$16 sps:$4 sm:$0xff]  }
  0x4e   :  { %7895 = vmatprep.subr.bf16.mxu0 %v8871_v0 }
  0x50   :  { %353 = vmatpush1.bf16.msra.mxu1 %v7944_v21  ;;  %v7978_v21 = vld [vmem:[#allocation9 + $0x68] ss:$16 sps:$4 sm:$0xff]  }
  0x51   :  { %7896 = vmatpush3.bf16.msra.mxu0 %v7925_v7  ;;  %354 = vmatprep.subr.bf16.mxu1 %v7945_v22  ;;  %v7962_v7 = vld [vmem:[#allocation9 + $0xcc] ss:$16 sps:$4 sm:$0xff]   ;;  %v7983_v22 = vld [vmem:[#allocation9 + $0x44] ss:$16 sps:$4 sm:$0xff]  }
  0x52   :  { %7897 = vmatprep.subr.bf16.mxu0 %v8871_v0 }
  0x54   :  { %355 = vmatpush1.bf16.msra.mxu1 %v7947_v23  ;;  %v7986_v23 = vld [vmem:[#allocation9 + $0x4c] ss:$16 sps:$4 sm:$0xff]  }
  0x55   :  { %7898 = vmatpush3.bf16.msra.mxu0 %v7926_v8  ;;  %356 = vmatprep.subr.bf16.mxu1 %v7948_v24  ;;  %v7957_v8 = vld [vmem:[#allocation9 + $0xc0] ss:$16 sps:$4 sm:$0xff]  }
  0x56   :  { %881 = vmatprep.subr.bf16.mxu0 %v7953_v2  ;;  %v7981_v24 = vld [vmem:[#allocation9 + $0x40] ss:$16 sps:$4 sm:$0xff]  }
  0x57   :  { %v8041_v2 = vld [vmem:[#allocation9 + $0x100] ss:$16 sps:$4 sm:$0xff]  }
  0x58   :  { %7900 = vmatmul.mubr.bf16.vlgmr.msra.gmra.mxu0 %v99_v9  ;;  %357 = vmatpush1.bf16.msra.mxu1 %v7950_v26  ;;  %v7960_v9 = vld [vmem:[#allocation9 + $0xc8] ss:$16 sps:$4 sm:$0xff]   ;;  %v7989_v26 = vld [vmem:[#allocation9 + $0x24] ss:$16 sps:$4 sm:$0xff]  }
  0x59   :  { %922 = vmatprep.subr.bf16.mxu1 %v7956_v3  ;;  %882 = vmatpush1.bf16.msra.mxu0 %v7951_v4  ;;  %v8044_v3 = vld [vmem:[#allocation9 + $0x108] ss:$16 sps:$4 sm:$0xff]  }
  0x5a   :  { %883 = vmatprep.subr.bf16.mxu0 %v7959_v6 }
  0x5d   :  { %884 = vmatpush1.bf16.msra.mxu0 %v7957_v8 }
  0x5e   :  { %885 = vmatprep.subr.bf16.mxu0 %v7965_v10 }
  0x61   :  { %886 = vmatpush1.bf16.msra.mxu0 %v7963_v12 }
  0x62   :  { %887 = vmatprep.subr.bf16.mxu0 %v7971_v14 }
  0x65   :  { %888 = vmatpush1.bf16.msra.mxu0 %v7969_v16 }
  0x66   :  { %889 = vmatprep.subr.bf16.mxu0 %v7977_v18 }
  0x69   :  { %890 = vmatpush1.bf16.msra.mxu0 %v7975_v20 }
  0x6a   :  { %891 = vmatprep.subr.bf16.mxu0 %v7983_v22 }
  0x6d   :  { %892 = vmatpush1.bf16.msra.mxu0 %v7981_v24 }
  0x6e   :  { %893 = vmatprep.subr.bf16.mxu0 %v7989_v26 }
 0x118   :  { %v198_v27 = vpop.f32.mrf.mxu0 }
 0x119   :  { %v206_v28 = vrot.slane %v198_v27, 4  ;;  %v213_v29 = vmul.f32 %v198_v27, %v198_v27 }
 0x11a   :  { %v7901_v30 = vpop.f32.mrf.mxu0 }
 0x11b   :  { %v207_v31 = vadd.f32 %v206_v28, %v198_v27  ;;  %v214_v32 = vrot.slane %v213_v29, 4  ;;  %v7987_v28 = vld [vmem:[#allocation9 + $0x20] ss:$16 sps:$4 sm:$0xff]   ;;  %v7995_v30 = vld [vmem:[#allocation9 + $0x4] ss:$16 sps:$4 sm:$0xff]  }
 0x11c   :  { %v201_v33 = vpop.f32.mrf.mxu0  ;;  %894 = vmatpush1.bf16.msra.mxu0 %v7987_v28 }
 0x11d   :  { %v208_v34 = vrot.slane %v207_v31, 2  ;;  %v215_v35 = vadd.f32 %v214_v32, %v213_v29  ;;  %v7990_v29 = vld [vmem:[#allocation9 + $0x28] ss:$16 sps:$4 sm:$0xff]   ;;  %v7993_v32 = vld [vmem:[#allocation9] ss:$16 sps:$4 sm:$0xff]   ;;  %895 = vmatprep.subr.bf16.mxu0 %v7995_v30 }
 0x11e   :  { %v7902_v36 = vpop.f32.mrf.mxu0  ;;  %v7996_v33 = vld [vmem:[#allocation9 + $0x8] ss:$16 sps:$4 sm:$0xff]  }
 0x11f   :  { %v209_v37 = vadd.f32 %v208_v34, %v207_v31  ;;  %v216_v38 = vrot.slane %v215_v35, 2  ;;  %v7998_v31 = vld [vmem:[#allocation9 + $0xc] ss:$16 sps:$4 sm:$0xff]   ;;  %v8001_v34 = vld [vmem:[#allocation9 + $0x1e4] ss:$16 sps:$4 sm:$0xff]  }
 0x120   :  { %896 = vmatpush1.bf16.msra.mxu0 %v7993_v32  ;;  %v7999_v36 = vld [vmem:[#allocation9 + $0x1e0] ss:$16 sps:$4 sm:$0xff]  }
 0x121   :  { %v210_v39 = vrot.slane %v209_v37, 1  ;;  %v217_v40 = vadd.f32 %v216_v38, %v215_v35  ;;  %v8004_v35 = vld [vmem:[#allocation9 + $0x1ec] ss:$16 sps:$4 sm:$0xff]   ;;  %897 = vmatprep.subr.bf16.mxu0 %v8001_v34  ;;  %v8007_v38 = vld [vmem:[#allocation9 + $0x1c4] ss:$16 sps:$4 sm:$0xff]  }
 0x123   :  { %v211_v41 = vadd.f32 %v210_v39, %v209_v37  ;;  %v218_v42 = vrot.slane %v217_v40, 1  ;;  %v8002_v37 = vld [vmem:[#allocation9 + $0x1e8] ss:$16 sps:$4 sm:$0xff]   ;;  %v8010_v39 = vld [vmem:[#allocation9 + $0x1cc] ss:$16 sps:$4 sm:$0xff]  }
 0x124   :  { %898 = vmatpush2.bf16.msra.mxu0 %v7999_v36 }
 0x125   :  { %v212_v43 = vmul.f32 0.125, %v211_v41  ;;  %v219_v44 = vadd.f32 %v218_v42, %v217_v40  ;;  %v8005_v40 = vld [vmem:[#allocation9 + $0x1c0] ss:$16 sps:$4 sm:$0xff]   ;;  %v8008_v41 = vld [vmem:[#allocation9 + $0x1c8] ss:$16 sps:$4 sm:$0xff]   ;;  %899 = vmatprep.subr.bf16.mxu0 %v8007_v38 }
 0x126   :  { %v8013_v42 = vld [vmem:[#allocation9 + $0x1a4] ss:$16 sps:$4 sm:$0xff]  }
 0x127   :  { %v220_v45 = vmul.f32 0.125, %v219_v44  ;;  %v221_v46 = vmul.f32 %v212_v43, %v212_v43  ;;  %v8011_v44 = vld [vmem:[#allocation9 + $0x1a0] ss:$16 sps:$4 sm:$0xff]  }
 0x128   :  { %900 = vmatpush2.bf16.msra.mxu0 %v8005_v40 }
 0x129   :  { %v222_v47 = vsub.f32 %v220_v45, %v221_v46  ;;  %v8014_v45 = vld [vmem:[#allocation9 + $0x1a8] ss:$16 sps:$4 sm:$0xff]   ;;  %901 = vmatprep.subr.bf16.mxu0 %v8013_v42  ;;  %v8019_v46 = vld [vmem:[#allocation9 + $0x184] ss:$16 sps:$4 sm:$0xff]  }
 0x12b   :  { %v223_v48 = vmax.f32 %v222_v47, 0.0  ;;  %v8022_v47 = vld [vmem:[#allocation9 + $0x18c] ss:$16 sps:$4 sm:$0xff]  }
 0x12c   :  { %902 = vmatpush2.bf16.msra.mxu0 %v8011_v44 }
 0x12d   :  { %v224_v49 = vadd.f32 0.8, %v223_v48  ;;  %v8017_v48 = vld [vmem:[#allocation9 + $0x180] ss:$16 sps:$4 sm:$0xff]   ;;  %903 = vmatprep.subr.bf16.mxu0 %v8019_v46  ;;  %v8874_v46 = vmov 1966171168  }
 0x12f   :  { %8047 = vrsqrt.f32 %v224_v49  ;;  %v8020_v49 = vld [vmem:[#allocation9 + $0x188] ss:$16 sps:$4 sm:$0xff]  }
 0x130   :  { %904 = vmatpush2.bf16.msra.mxu0 %v8017_v48 }
 0x131   :  { %905 = vmatprep.subr.bf16.mxu0 %v8025_v50 }
 0x13c   :  { %v8048_v54 = vpop.eup %8047 }
 0x13d   :  { %v226_v55 = vmul.f32 %v8048_v54, %v204_v52  ;;  %v8028_v52 = vld [vmem:[#allocation9 + $0x16c] ss:$16 sps:$4 sm:$0xff]   ;;  %v8023_v54 = vld [vmem:[#allocation9 + $0x160] ss:$16 sps:$4 sm:$0xff]  }
 0x13e   :  { %906 = vmatpush2.bf16.msra.mxu0 %v8023_v54 }
 0x13f   :  { %v227_v57 = vmul.f32 %v226_v55, %v212_v43  ;;  %v233_v58 = vrot.slane %v226_v55, %v8935_v53  ;;  %v8016_v43 = vld [vmem:[#allocation9 + $0x1ac] ss:$16 sps:$4 sm:$0xff]   ;;  %v8026_v55 = vld [vmem:[#allocation9 + $0x168] ss:$16 sps:$4 sm:$0xff]  }
 0x141   :  { %v228_v59 = vsub.f32 %v205_v56, %v227_v57  ;;  %v235_v60 = vmul.f32 %v233_v58, %v198_v27  ;;  %v7992_v27 = vld [vmem:[#allocation9 + $0x2c] ss:$16 sps:$4 sm:$0xff]   ;;  %v8031_v56 = vld [vmem:[#allocation9 + $0x144] ss:$16 sps:$4 sm:$0xff]   ;;  %v8029_v58 = vld [vmem:[#allocation9 + $0x140] ss:$16 sps:$4 sm:$0xff]  }
 0x142   :  { %v8034_v57 = vld [vmem:[#allocation9 + $0x14c] ss:$16 sps:$4 sm:$0xff]   ;;  %907 = vmatprep.subr.bf16.mxu0 %v8031_v56  ;;  %v383_v56 = vld [vmem:[#allocation10 + $0x2] sm:$0x3] }
 0x143   :  { %v240_v61 = vrot.slane %v228_v59, %v8935_v53  ;;  %v8032_v59 = vld [vmem:[#allocation9 + $0x148] ss:$16 sps:$4 sm:$0xff]   ;;  %908 = vmatpush2.bf16.msra.mxu0 %v8029_v58  ;;  %v8951_v58 = vsub.s32 1, %v8932_v51 }
 0x145   :  { %v242_v62 = vadd.f32 %v240_v61, %v235_v60  ;;  %v8037_v60 = vld [vmem:[#allocation9 + $0x124] ss:$16 sps:$4 sm:$0xff]   ;;  %v8040_v61 = vld [vmem:[#allocation9 + $0x12c] ss:$16 sps:$4 sm:$0xff]  }
 0x146   :  { %909 = vmatprep.subr.bf16.mxu0 %v8037_v60 }
 0x147   :  { %v243_v63 = vmul.f32 0.2, %v242_v62 }
 0x149   :  { %v244_v0 = vmax.f32 %v242_v62, %v243_v63  ;;  %v8035_v62 = vld [vmem:[#allocation9 + $0x120] ss:$16 sps:$4 sm:$0xff]   ;;  %v8038_v63 = vld [vmem:[#allocation9 + $0x128] ss:$16 sps:$4 sm:$0xff]  }
 0x14a   :  { %910 = vmatpush2.bf16.msra.mxu0 %v8035_v62 }
 0x14b   :  { %v245_v1 = vpack.c.bf16 %v244_v0, %v244_v0  ;;  %v8043_v0 = vld [vmem:[#allocation9 + $0x104] ss:$16 sps:$4 sm:$0xff]  }
 0x14c   :  { %911 = vmatprep.subr.bf16.mxu0 %v8043_v0 }
 0x14d   :  { %375 = vmatmul.mubr.bf16.vlgmr.msra.gmra.mxu1 %v245_v1  ;;  %v8046_v1 = vld [vmem:[#allocation9 + $0x10c] ss:$16 sps:$4 sm:$0xff]  }
 0x14e   :  { %923 = vmatpush1.bf16.msra.mxu1 %v7954_v5  ;;  %912 = vmatpush2.bf16.msra.mxu0 %v8041_v2  ;;  %v384_v2 = vld [vmem:[#allocation10 + $0x4] sm:$0x3] }
 0x14f   :  { %924 = vmatprep.subr.bf16.mxu1 %v7962_v7 }
 0x152   :  { %925 = vmatpush1.bf16.msra.mxu1 %v7960_v9 }
 0x153   :  { %926 = vmatprep.subr.bf16.mxu1 %v7968_v11 }
 0x156   :  { %927 = vmatpush1.bf16.msra.mxu1 %v7966_v13 }
 0x157   :  { %928 = vmatprep.subr.bf16.mxu1 %v7974_v15 }
 0x15a   :  { %929 = vmatpush1.bf16.msra.mxu1 %v7972_v17 }
 0x15b   :  { %930 = vmatprep.subr.bf16.mxu1 %v7980_v19 }
 0x15e   :  { %931 = vmatpush1.bf16.msra.mxu1 %v7978_v21 }
 0x15f   :  { %932 = vmatprep.subr.bf16.mxu1 %v7986_v23 }
 0x162   :  { %933 = vmatpush1.bf16.msra.mxu1 %v7984_v25 }
 0x163   :  { %934 = vmatprep.subr.bf16.mxu1 %v7992_v27 }
 0x166   :  { %935 = vmatpush1.bf16.msra.mxu1 %v7990_v29 }
 0x167   :  { %936 = vmatprep.subr.bf16.mxu1 %v7998_v31 }
 0x16a   :  { %937 = vmatpush1.bf16.msra.mxu1 %v7996_v33 }
 0x16b   :  { %938 = vmatprep.subr.bf16.mxu1 %v8004_v35 }
 0x16e   :  { %939 = vmatpush2.bf16.msra.mxu1 %v8002_v37 }
 0x16f   :  { %940 = vmatprep.subr.bf16.mxu1 %v8010_v39 }
 0x172   :  { %941 = vmatpush2.bf16.msra.mxu1 %v8008_v41 }
 0x173   :  { %942 = vmatprep.subr.bf16.mxu1 %v8016_v43 }
 0x176   :  { %943 = vmatpush2.bf16.msra.mxu1 %v8014_v45 }
 0x177   :  { %944 = vmatprep.subr.bf16.mxu1 %v8022_v47  ;;  %v429_v47 = vunpack.c.l.s4 %v8874_v46 }
 0x179   :  { %v430_v48 = vunpack.c.0.s8 %v429_v47 }
 0x17a   :  { %945 = vmatpush2.bf16.msra.mxu1 %v8020_v49 }
 0x17b   :  { %946 = vmatprep.subr.bf16.mxu1 %v8028_v52  ;;  %v8946_v50 = vsub.s32 %v430_v48, %v8932_v51 }
 0x17e   :  { %947 = vmatpush2.bf16.msra.mxu1 %v8026_v55 }
 0x17f   :  { %948 = vmatprep.subr.bf16.mxu1 %v8034_v57 }
 0x182   :  { %949 = vmatpush2.bf16.msra.mxu1 %v8032_v59 }
 0x183   :  { %950 = vmatprep.subr.bf16.mxu1 %v8040_v61 }
 0x186   :  { %951 = vmatpush2.bf16.msra.mxu1 %v8038_v63 }
 0x187   :  { %952 = vmatprep.subr.bf16.mxu1 %v8046_v1 }
 0x18a   :  { %953 = vmatpush2.bf16.msra.mxu1 %v8044_v3 }
 0x20d   :  { %v8939_v4 = vpop.f32.mrf.mxu1 }
 0x20e   :  { %v385_v5 = vrot.slane %v8939_v4, 4  ;;  %v399_v6 = vmul.f32 %v8939_v4, %v8939_v4 }
 0x20f   :  { %v378_v7 = vpop.f32.mrf.mxu1 }
 0x210   :  { %v386_v8 = vadd.f32 %v385_v5, %v8939_v4  ;;  %v401_v9 = vrot.slane %v399_v6, 4  ;;  %v391_v10 = vrot.slane %v378_v7, 4  ;;  %v400_v11 = vmul.f32 %v378_v7, %v378_v7 }
 0x211   :  { %v380_v12 = vpop.f32.mrf.mxu1 }
 0x212   :  { %v387_v13 = vrot.slane %v386_v8, 2  ;;  %v402_v14 = vadd.f32 %v401_v9, %v399_v6  ;;  %v392_v15 = vadd.f32 %v391_v10, %v378_v7  ;;  %v407_v16 = vrot.slane %v400_v11, 4 }
 0x213   :  { %v381_v17 = vpop.f32.mrf.mxu1 }
 0x214   :  { %v388_v18 = vadd.f32 %v387_v13, %v386_v8  ;;  %v403_v19 = vrot.slane %v402_v14, 2  ;;  %v393_v20 = vrot.slane %v392_v15, 2  ;;  %v408_v21 = vadd.f32 %v407_v16, %v400_v11 }
 0x216   :  { %v389_v22 = vrot.slane %v388_v18, 1  ;;  %v404_v23 = vadd.f32 %v403_v19, %v402_v14  ;;  %v394_v24 = vadd.f32 %v393_v20, %v392_v15  ;;  %v409_v25 = vrot.slane %v408_v21, 2 }
 0x218   :  { %v390_v26 = vadd.f32 %v389_v22, %v388_v18  ;;  %v405_v27 = vrot.slane %v404_v23, 1  ;;  %v395_v28 = vrot.slane %v394_v24, 1  ;;  %v410_v29 = vadd.f32 %v409_v25, %v408_v21 }
 0x21a   :  { %v397_v30 = vmul.f32 0.125, %v390_v26  ;;  %v406_v31 = vadd.f32 %v405_v27, %v404_v23  ;;  %v396_v32 = vadd.f32 %v395_v28, %v394_v24  ;;  %v411_v33 = vrot.slane %v410_v29, 1 }
 0x21c   :  { %v413_v34 = vmul.f32 0.125, %v406_v31  ;;  %v415_v35 = vmul.f32 %v397_v30, %v397_v30  ;;  %v398_v36 = vmul.f32 0.125, %v396_v32  ;;  %v412_v37 = vadd.f32 %v411_v33, %v410_v29 }
 0x21e   :  { %v417_v38 = vsub.f32 %v413_v34, %v415_v35  ;;  %v414_v39 = vmul.f32 0.125, %v412_v37  ;;  %v416_v40 = vmul.f32 %v398_v36, %v398_v36 }
 0x220   :  { %v419_v41 = vmax.f32 %v417_v38, 0.0  ;;  %v418_v42 = vsub.f32 %v414_v39, %v416_v40 }
 0x222   :  { %v421_v43 = vadd.f32 0.8, %v419_v41  ;;  %v420_v44 = vmax.f32 %v418_v42, 0.0 }
 0x224   :  { %v422_v45 = vadd.f32 0.8, %v420_v44  ;;  %8049 = vrsqrt.f32 %v421_v43 }
 0x226   :  { %8051 = vrsqrt.f32 %v422_v45 }
 0x231   :  { %v8050_v49 = vpop.eup %8049 }
 0x233   :  { %v8052_v52 = vpop.eup %8051 }
 0x234   :  { %v427_v54 = vcombine.low %v8050_v49, %v8052_v52 }
 0x236   :  { %v434_v55 = vrot.slane %v427_v54, %v8946_v50 }
 0x238   :  { %v441_v57 = vrot.slane %v434_v55, %v8946_v50 }
 0x23a   :  { %v443_v59 = vmul.f32 %v441_v57, %v383_v56 }
 0x23c   :  { %v448_v60 = vrot.slane %v443_v59, %v8935_v53  ;;  %v452_v61 = vrot.slane %v443_v59, %v8951_v58 }
 0x23e   :  { %v455_v62 = vmul.f32 %v448_v60, %v397_v30  ;;  %v456_v63 = vmul.f32 %v452_v61, %v398_v36  ;;  %v477_v6 = vmul.f32 %v452_v61, %v378_v7  ;;  %v476_v9 = vmul.f32 %v448_v60, %v8939_v4 }
 0x240   :  { %v459_v0 = vcombine.low %v455_v62, %v456_v63 }
 0x242   :  { %v466_v1 = vrot.slane %v459_v0, %v8946_v50 }
 0x244   :  { %v473_v3 = vrot.slane %v466_v1, %v8946_v50 }
 0x246   :  { %v475_v5 = vsub.f32 %v384_v2, %v473_v3 }
 0x248   :  { %v486_v8 = vrot.slane %v475_v5, %v8951_v58  ;;  %v482_v10 = vrot.slane %v475_v5, %v8935_v53 }
 0x24a   :  { %v490_v11 = vadd.f32 %v486_v8, %v477_v6  ;;  %v489_v12 = vadd.f32 %v482_v10, %v476_v9 }
 0x24c   :  { %v492_v13 = vmul.f32 0.2, %v490_v11  ;;  %v491_v14 = vmul.f32 0.2, %v489_v12 }
 0x24e   :  { %v494_v15 = vmax.f32 %v490_v11, %v492_v13  ;;  %v493_v16 = vmax.f32 %v489_v12, %v491_v14 }
 0x250   :  { %v496_v17 = vpack.c.bf16 %v494_v15, %v494_v15  ;;  %v495_v18 = vpack.c.bf16 %v493_v16, %v493_v16 }
 0x252   :  { %913 = vmatprep.mubr.bf16.mxu0 %v496_v17  ;;  %954 = vmatprep.mubr.bf16.mxu1 %v496_v17 }
 0x253   :  { %914 = vmatmul.mubr.bf16.vlgmr.msra.gmra.mxu0 %v495_v18  ;;  %955 = vmatmul.mubr.bf16.vlgmr.msra.gmra.mxu1 %v495_v18 }
 0x254   :  { %8830 = shalt.err (!%p8827_p10)  }
 0x255   :  { %86 = dma.hbm_to_vmem [thread:$0]  %s9282_s4, 32768, %s84_s26, [#allocation4] }
 0x256   :  { %s8839_s9 = scalar_lea.vmem %s96_s28, 57344  ;;  %p8844_p12 = scmp.lt.s32.totalorder %s96_s28, %s96_s28 }
 0x257   :  { %p8840_p11 = scmp.ne.s32.totalorder %s96_s28, %s8839_s9  ;;  %p8845_p13 = scmp.lt.s32.totalorder %s8839_s9, %s8839_s9 }
 0x259   :  { %p8846_p0 = por %p8845_p13, %p8844_p12 }
 0x25b   :  { %p8847_p1 = pnand %p8846_p0, %p8840_p11 }
 0x25d   :  { %8850 = shalt.err (!%p8847_p1)  }
 0x25e   :  { %98 = dma.hbm_to_vmem [thread:$0]  %s9283_s5, 57344, %s96_s28, [#allocation4 + $0x1] }
 0x313   :  { %v8966_v4 = vpop.f32.mrf.mxu0  ;;  %v8968_v7 = vpop.f32.mrf.mxu1 }
 0x314   :  { %v965_v19 = vrot.slane %v8966_v4, 4  ;;  %v993_v20 = vmul.f32 %v8966_v4, %v8966_v4  ;;  %v977_v21 = vrot.slane %v8968_v7, 4  ;;  %v995_v22 = vmul.f32 %v8968_v7, %v8968_v7 }
 0x315   :  { %v8976_v23 = vpop.f32.mrf.mxu0  ;;  %v8978_v24 = vpop.f32.mrf.mxu1 }
 0x316   :  { %v966_v25 = vadd.f32 %v965_v19, %v8966_v4  ;;  %v997_v26 = vrot.slane %v993_v20, 4  ;;  %v978_v27 = vadd.f32 %v977_v21, %v8968_v7  ;;  %v1009_v28 = vrot.slane %v995_v22, 4 }
 0x317   :  { %v971_v29 = vrot.slane %v8976_v23, 4  ;;  %v994_v30 = vmul.f32 %v8976_v23, %v8976_v23  ;;  %v983_v31 = vrot.slane %v8978_v24, 4  ;;  %v996_v32 = vmul.f32 %v8978_v24, %v8978_v24  ;;  %v919_v33 = vpop.f32.mrf.mxu0  ;;  %v960_v34 = vpop.f32.mrf.mxu1 }
 0x318   :  { %v967_v35 = vrot.slane %v966_v25, 2  ;;  %v998_v36 = vadd.f32 %v997_v26, %v993_v20  ;;  %v979_v37 = vrot.slane %v978_v27, 2  ;;  %v1010_v38 = vadd.f32 %v1009_v28, %v995_v22 }
 0x319   :  { %v972_v39 = vadd.f32 %v971_v29, %v8976_v23  ;;  %v1003_v40 = vrot.slane %v994_v30, 4  ;;  %v984_v41 = vadd.f32 %v983_v31, %v8978_v24  ;;  %v1015_v42 = vrot.slane %v996_v32, 4  ;;  %v920_v43 = vpop.f32.mrf.mxu0  ;;  %v961_v44 = vpop.f32.mrf.mxu1 }
 0x31a   :  { %v968_v45 = vadd.f32 %v967_v35, %v966_v25  ;;  %v999_v46 = vrot.slane %v998_v36, 2  ;;  %v980_v47 = vadd.f32 %v979_v37, %v978_v27  ;;  %v1011_v48 = vrot.slane %v1010_v38, 2 }
 0x31b   :  { %v973_v49 = vrot.slane %v972_v39, 2  ;;  %v1004_v52 = vadd.f32 %v1003_v40, %v994_v30  ;;  %v985_v54 = vrot.slane %v984_v41, 2  ;;  %v1016_v55 = vadd.f32 %v1015_v42, %v996_v32 }
 0x31c   :  { %v969_v56 = vrot.slane %v968_v45, 1  ;;  %v1000_v57 = vadd.f32 %v999_v46, %v998_v36  ;;  %v981_v59 = vrot.slane %v980_v47, 1  ;;  %v1012_v60 = vadd.f32 %v1011_v48, %v1010_v38 }
 0x31d   :  { %v974_v61 = vadd.f32 %v973_v49, %v972_v39  ;;  %v1005_v62 = vrot.slane %v1004_v52, 2  ;;  %v986_v63 = vadd.f32 %v985_v54, %v984_v41  ;;  %v1017_v0 = vrot.slane %v1016_v55, 2 }
 0x31e   :  { %v970_v1 = vadd.f32 %v969_v56, %v968_v45  ;;  %v1001_v2 = vrot.slane %v1000_v57, 1  ;;  %v982_v3 = vadd.f32 %v981_v59, %v980_v47  ;;  %v1013_v5 = vrot.slane %v1012_v60, 1 }
 0x31f   :  { %v975_v6 = vrot.slane %v974_v61, 1  ;;  %v1006_v8 = vadd.f32 %v1005_v62, %v1004_v52  ;;  %v987_v9 = vrot.slane %v986_v63, 1  ;;  %v1018_v10 = vadd.f32 %v1017_v0, %v1016_v55 }
 0x320   :  { %v989_v11 = vmul.f32 0.125, %v970_v1  ;;  %v1002_v12 = vadd.f32 %v1001_v2, %v1000_v57  ;;  %v991_v13 = vmul.f32 0.125, %v982_v3  ;;  %v1014_v14 = vadd.f32 %v1013_v5, %v1012_v60  ;;  %v963_v57 = vld [vmem:[#allocation10 + $0x6] sm:$0xf] }
 0x321   :  { %v976_v15 = vadd.f32 %v975_v6, %v974_v61  ;;  %v1007_v16 = vrot.slane %v1006_v8, 1  ;;  %v988_v17 = vadd.f32 %v987_v9, %v986_v63  ;;  %v1019_v18 = vrot.slane %v1018_v10, 1 }
 0x322   :  { %v1021_v19 = vmul.f32 0.125, %v1002_v12  ;;  %v1025_v20 = vmul.f32 %v989_v11, %v989_v11  ;;  %v1023_v21 = vmul.f32 0.125, %v1014_v14  ;;  %v1027_v22 = vmul.f32 %v991_v13, %v991_v13 }
 0x323   :  { %v990_v25 = vmul.f32 0.125, %v976_v15  ;;  %v1008_v26 = vadd.f32 %v1007_v16, %v1006_v8  ;;  %v992_v27 = vmul.f32 0.125, %v988_v17  ;;  %v1020_v28 = vadd.f32 %v1019_v18, %v1018_v10  ;;  %v964_v16 = vld [vmem:[#allocation10 + $0xa] sm:$0xf] }
 0x324   :  { %v1029_v29 = vsub.f32 %v1021_v19, %v1025_v20  ;;  %v1031_v30 = vsub.f32 %v1023_v21, %v1027_v22  ;;  %v8994_v60 = vsub.s32 2, %v8932_v51  ;;  %v8997_v61 = vsub.s32 3, %v8932_v51 }
 0x325   :  { %v1022_v31 = vmul.f32 0.125, %v1008_v26  ;;  %v1026_v32 = vmul.f32 %v990_v25, %v990_v25  ;;  %v1024_v33 = vmul.f32 0.125, %v1020_v28  ;;  %v1028_v34 = vmul.f32 %v992_v27, %v992_v27 }
 0x326   :  { %v1033_v35 = vmax.f32 %v1029_v29, 0.0  ;;  %v1035_v36 = vmax.f32 %v1031_v30, 0.0 }
 0x327   :  { %v1030_v37 = vsub.f32 %v1022_v31, %v1026_v32  ;;  %v1032_v38 = vsub.f32 %v1024_v33, %v1028_v34 }
 0x328   :  { %v1037_v39 = vadd.f32 0.8, %v1033_v35  ;;  %v1039_v40 = vadd.f32 0.8, %v1035_v36 }
 0x329   :  { %v1034_v41 = vmax.f32 %v1030_v37, 0.0  ;;  %v1036_v42 = vmax.f32 %v1032_v38, 0.0 }
 0x32a   :  { %8053 = vrsqrt.f32 %v1037_v39 }
 0x32b   :  { %v1038_v43 = vadd.f32 0.8, %v1034_v41  ;;  %v1040_v44 = vadd.f32 0.8, %v1036_v42  ;;  %8055 = vrsqrt.f32 %v1039_v40 }
 0x32d   :  { %8057 = vrsqrt.f32 %v1038_v43 }
 0x32e   :  { %8059 = vrsqrt.f32 %v1040_v44 }
 0x337   :  { %v8054_v45 = vpop.eup %8053 }
 0x338   :  { %v8056_v46 = vpop.eup %8055 }
 0x33a   :  { %v8058_v47 = vpop.eup %8057 }
 0x33b   :  { %v8060_v48 = vpop.eup %8059  ;;  %v1049_v49 = vcombine.low %v8054_v45, %v8058_v47 }
 0x33c   :  { %v1050_v52 = vcombine.low %v8056_v46, %v8060_v48 }
 0x33d   :  { %v1057_v54 = vrot.slane %v1049_v49, %v8946_v50 }
 0x33e   :  { %v1064_v55 = vrot.slane %v1050_v52, %v8946_v50 }
 0x340   :  { %v1065_v56 = vcombine.low %v1057_v54, %v1064_v55 }
 0x342   :  { %v1072_v59 = vrot.slane %v1065_v56, %v8946_v50 }
 0x344   :  { %v1074_v62 = vmul.f32 %v1072_v59, %v963_v57 }
 0x346   :  { %v1079_v63 = vrot.slane %v1074_v62, %v8935_v53  ;;  %v1083_v0 = vrot.slane %v1074_v62, %v8951_v58  ;;  %v1087_v1 = vrot.slane %v1074_v62, %v8994_v60  ;;  %v1091_v2 = vrot.slane %v1074_v62, %v8997_v61 }
 0x348   :  { %v1096_v3 = vmul.f32 %v1079_v63, %v989_v11  ;;  %v1097_v5 = vmul.f32 %v1083_v0, %v990_v25  ;;  %v1098_v6 = vmul.f32 %v1087_v1, %v991_v13  ;;  %v1099_v8 = vmul.f32 %v1091_v2, %v992_v27 }
 0x349   :  { %v1130_v19 = vmul.f32 %v1079_v63, %v8966_v4  ;;  %v1131_v20 = vmul.f32 %v1083_v0, %v8976_v23  ;;  %v1132_v11 = vmul.f32 %v1087_v1, %v8968_v7  ;;  %v1133_v13 = vmul.f32 %v1091_v2, %v8978_v24 }
 0x34a   :  { %v1104_v9 = vcombine.low %v1096_v3, %v1097_v5  ;;  %v1105_v10 = vcombine.low %v1098_v6, %v1099_v8 }
 0x34c   :  { %v1112_v12 = vrot.slane %v1104_v9, %v8946_v50  ;;  %v1119_v14 = vrot.slane %v1105_v10, %v8946_v50 }
 0x34e   :  { %v1120_v15 = vcombine.low %v1112_v12, %v1119_v14 }
 0x350   :  { %v1127_v17 = vrot.slane %v1120_v15, %v8946_v50 }
 0x352   :  { %v1129_v18 = vsub.f32 %v964_v16, %v1127_v17 }
 0x354   :  { %v1138_v21 = vrot.slane %v1129_v18, %v8935_v53  ;;  %v1142_v22 = vrot.slane %v1129_v18, %v8951_v58  ;;  %v1146_v25 = vrot.slane %v1129_v18, %v8994_v60  ;;  %v1150_v26 = vrot.slane %v1129_v18, %v8997_v61 }
 0x356   :  { %v1155_v27 = vadd.f32 %v1138_v21, %v1130_v19  ;;  %v1156_v28 = vadd.f32 %v1142_v22, %v1131_v20  ;;  %v1157_v29 = vadd.f32 %v1146_v25, %v1132_v11  ;;  %v1158_v30 = vadd.f32 %v1150_v26, %v1133_v13 }
 0x358   :  { %v1159_v31 = vmul.f32 0.2, %v1155_v27  ;;  %v1160_v4 = vmul.f32 0.2, %v1156_v28  ;;  %v1161_v32 = vmul.f32 0.2, %v1157_v29 }
 0x359   :  { %v1162_v23 = vmul.f32 0.2, %v1158_v30 }
 0x35a   :  { %v1163_v33 = vmax.f32 %v1155_v27, %v1159_v31  ;;  %v1164_v7 = vmax.f32 %v1156_v28, %v1160_v4  ;;  %v1165_v34 = vmax.f32 %v1157_v29, %v1161_v32 }
 0x35b   :  { %v1166_v24 = vmax.f32 %v1158_v30, %v1162_v23 }
 0x35c   :  { %v9014_v35 = vpack.c.bf16 %v1163_v33, %v1163_v33  ;;  %v9016_v36 = vpack.c.bf16 %v1164_v7, %v1164_v7  ;;  %v9018_v37 = vpack.c.bf16 %v1165_v34, %v1165_v34 }
 0x35d   :  { %v9020_v38 = vpack.c.bf16 %v1166_v24, %v1166_v24 }
 0x35e   :  { %8857 = dma.done.wait [#allocation4], 32768 }
 0x35f   :  { %8858 = vsyncadd [#allocation4], 4294934528  ;;  %2743 = vmatprep.mubr.bf16.mxu0 %v9016_v36  ;;  %2784 = vmatprep.mubr.bf16.mxu1 %v9020_v38  ;;  %v1231_v39 = vld [vmem:[#allocation2 + $0x1c0] sm:$0xff] }
 0x360   :  { %v1235_v40 = vld [vmem:[#allocation2 + $0x1e0] sm:$0xff] }
 0x361   :  { %v1359_v41 = vld [vmem:[#allocation2 + $0x5c0] sm:$0xff]  ;;  %v7137_v42 = vcombine.high %v1231_v39, %v1235_v40  ;;  %v7136_v44 = vcombine.low %v1231_v39, %v1235_v40 }
 0x362   :  { %v1363_v43 = vld [vmem:[#allocation2 + $0x5e0] sm:$0xff] }
 0x363   :  { %v1223_v45 = vld [vmem:[#allocation2 + $0x180] sm:$0xff]  ;;  %v7265_v47 = vcombine.high %v1359_v41, %v1363_v43  ;;  %v7264_v48 = vcombine.low %v1359_v41, %v1363_v43  ;;  %2711 = vmatprep.subr.bf16.mxu0 %v7137_v42 }
 0x364   :  { %v1227_v46 = vld [vmem:[#allocation2 + $0x1a0] sm:$0xff]  ;;  %2712 = vmatpush1.bf16.msra.mxu0 %v7136_v44 }
 0x365   :  { %v7129_v49 = vcombine.high %v1223_v45, %v1227_v46  ;;  %v1351_v52 = vld [vmem:[#allocation2 + $0x580] sm:$0xff]  ;;  %2752 = vmatprep.subr.bf16.mxu1 %v7265_v47  ;;  %v7128_v63 = vcombine.low %v1223_v45, %v1227_v46 }
 0x366   :  { %v1355_v54 = vld [vmem:[#allocation2 + $0x5a0] sm:$0xff]  ;;  %2753 = vmatpush1.bf16.msra.mxu1 %v7264_v48 }
 0x367   :  { %v1215_v55 = vld [vmem:[#allocation2 + $0x140] sm:$0xff]  ;;  %v7257_v56 = vcombine.high %v1351_v52, %v1355_v54  ;;  %2713 = vmatprep.subr.bf16.mxu0 %v7129_v49  ;;  %v7256_v0 = vcombine.low %v1351_v52, %v1355_v54 }
 0x368   :  { %v1219_v57 = vld [vmem:[#allocation2 + $0x160] sm:$0xff]  ;;  %2714 = vmatpush1.bf16.msra.mxu0 %v7128_v63 }
 0x369   :  { %v1343_v59 = vld [vmem:[#allocation2 + $0x540] sm:$0xff]  ;;  %v7121_v1 = vcombine.high %v1215_v55, %v1219_v57  ;;  %2754 = vmatprep.subr.bf16.mxu1 %v7257_v56  ;;  %v7120_v9 = vcombine.low %v1215_v55, %v1219_v57 }
 0x36a   :  { %v1347_v62 = vld [vmem:[#allocation2 + $0x560] sm:$0xff]  ;;  %2755 = vmatpush1.bf16.msra.mxu1 %v7256_v0 }
 0x36b   :  { %v7249_v2 = vcombine.high %v1343_v59, %v1347_v62  ;;  %v1207_v3 = vld [vmem:[#allocation2 + $0x100] sm:$0xff]  ;;  %2715 = vmatprep.subr.bf16.mxu0 %v7121_v1  ;;  %v7248_v10 = vcombine.low %v1343_v59, %v1347_v62 }
 0x36c   :  { %v1211_v5 = vld [vmem:[#allocation2 + $0x120] sm:$0xff]  ;;  %2716 = vmatpush1.bf16.msra.mxu0 %v7120_v9 }
 0x36d   :  { %v1335_v6 = vld [vmem:[#allocation2 + $0x500] sm:$0xff]  ;;  %v7113_v12 = vcombine.high %v1207_v3, %v1211_v5  ;;  %2756 = vmatprep.subr.bf16.mxu1 %v7249_v2  ;;  %v7112_v19 = vcombine.low %v1207_v3, %v1211_v5 }
 0x36e   :  { %v1339_v8 = vld [vmem:[#allocation2 + $0x520] sm:$0xff]  ;;  %2757 = vmatpush1.bf16.msra.mxu1 %v7248_v10 }
 0x36f   :  { %v7241_v14 = vcombine.high %v1335_v6, %v1339_v8  ;;  %v1199_v15 = vld [vmem:[#allocation2 + $0xc0] sm:$0xff]  ;;  %2717 = vmatprep.subr.bf16.mxu0 %v7113_v12  ;;  %v7240_v20 = vcombine.low %v1335_v6, %v1339_v8 }
 0x370   :  { %v1203_v16 = vld [vmem:[#allocation2 + $0xe0] sm:$0xff]  ;;  %2718 = vmatpush1.bf16.msra.mxu0 %v7112_v19 }
 0x371   :  { %v1327_v17 = vld [vmem:[#allocation2 + $0x4c0] sm:$0xff]  ;;  %v7105_v11 = vcombine.high %v1199_v15, %v1203_v16  ;;  %2758 = vmatprep.subr.bf16.mxu1 %v7241_v14  ;;  %v7104_v27 = vcombine.low %v1199_v15, %v1203_v16 }
 0x372   :  { %v1331_v18 = vld [vmem:[#allocation2 + $0x4e0] sm:$0xff]  ;;  %2759 = vmatpush1.bf16.msra.mxu1 %v7240_v20 }
 0x373   :  { %v7233_v13 = vcombine.high %v1327_v17, %v1331_v18  ;;  %v1191_v21 = vld [vmem:[#allocation2 + $0x80] sm:$0xff]  ;;  %2719 = vmatprep.subr.bf16.mxu0 %v7105_v11  ;;  %v7232_v28 = vcombine.low %v1327_v17, %v1331_v18 }
 0x374   :  { %v1195_v22 = vld [vmem:[#allocation2 + $0xa0] sm:$0xff]  ;;  %2720 = vmatpush1.bf16.msra.mxu0 %v7104_v27 }
 0x375   :  { %v1319_v25 = vld [vmem:[#allocation2 + $0x480] sm:$0xff]  ;;  %v7097_v29 = vcombine.high %v1191_v21, %v1195_v22  ;;  %2760 = vmatprep.subr.bf16.mxu1 %v7233_v13  ;;  %v7096_v33 = vcombine.low %v1191_v21, %v1195_v22 }
 0x376   :  { %v1323_v26 = vld [vmem:[#allocation2 + $0x4a0] sm:$0xff]  ;;  %2761 = vmatpush1.bf16.msra.mxu1 %v7232_v28 }
 0x377   :  { %v7225_v30 = vcombine.high %v1319_v25, %v1323_v26  ;;  %v1183_v31 = vld [vmem:[#allocation2 + $0x40] sm:$0xff]  ;;  %2721 = vmatprep.subr.bf16.mxu0 %v7097_v29  ;;  %v7224_v7 = vcombine.low %v1319_v25, %v1323_v26 }
 0x378   :  { %v1187_v4 = vld [vmem:[#allocation2 + $0x60] sm:$0xff]  ;;  %2722 = vmatpush1.bf16.msra.mxu0 %v7096_v33 }
 0x379   :  { %v1311_v32 = vld [vmem:[#allocation2 + $0x440] sm:$0xff]  ;;  %v7089_v34 = vcombine.high %v1183_v31, %v1187_v4  ;;  %2762 = vmatprep.subr.bf16.mxu1 %v7225_v30  ;;  %v7088_v43 = vcombine.low %v1183_v31, %v1187_v4 }
 0x37a   :  { %v1315_v23 = vld [vmem:[#allocation2 + $0x460] sm:$0xff]  ;;  %2763 = vmatpush1.bf16.msra.mxu1 %v7224_v7 }
 0x37b   :  { %v7217_v24 = vcombine.high %v1311_v32, %v1315_v23  ;;  %v1175_v39 = vld [vmem:[#allocation2] sm:$0xff]  ;;  %2723 = vmatprep.subr.bf16.mxu0 %v7089_v34  ;;  %v7216_v44 = vcombine.low %v1311_v32, %v1315_v23 }
 0x37c   :  { %v1179_v40 = vld [vmem:[#allocation2 + $0x20] sm:$0xff]  ;;  %2724 = vmatpush1.bf16.msra.mxu0 %v7088_v43 }
 0x37d   :  { %v1303_v41 = vld [vmem:[#allocation2 + $0x400] sm:$0xff]  ;;  %v7081_v45 = vcombine.high %v1175_v39, %v1179_v40  ;;  %2764 = vmatprep.subr.bf16.mxu1 %v7217_v24  ;;  %v7080_v54 = vcombine.low %v1175_v39, %v1179_v40 }
 0x37e   :  { %v1307_v42 = vld [vmem:[#allocation2 + $0x420] sm:$0xff]  ;;  %2765 = vmatpush1.bf16.msra.mxu1 %v7216_v44 }
 0x37f   :  { %v7209_v46 = vcombine.high %v1303_v41, %v1307_v42  ;;  %v1295_v47 = vld [vmem:[#allocation2 + $0x3c0] sm:$0xff]  ;;  %2725 = vmatprep.subr.bf16.mxu0 %v7081_v45  ;;  %v7208_v55 = vcombine.low %v1303_v41, %v1307_v42 }
 0x380   :  { %v1299_v48 = vld [vmem:[#allocation2 + $0x3e0] sm:$0xff]  ;;  %2726 = vmatpush1.bf16.msra.mxu0 %v7080_v54 }
 0x381   :  { %v1423_v49 = vld [vmem:[#allocation2 + $0x7c0] sm:$0xff]  ;;  %v7201_v56 = vcombine.high %v1295_v47, %v1299_v48  ;;  %2766 = vmatprep.subr.bf16.mxu1 %v7209_v46  ;;  %v7200_v1 = vcombine.low %v1295_v47, %v1299_v48 }
 0x382   :  { %v1427_v52 = vld [vmem:[#allocation2 + $0x7e0] sm:$0xff]  ;;  %2767 = vmatpush1.bf16.msra.mxu1 %v7208_v55 }
 0x383   :  { %v7329_v57 = vcombine.high %v1423_v49, %v1427_v52  ;;  %v1287_v59 = vld [vmem:[#allocation2 + $0x380] sm:$0xff]  ;;  %2727 = vmatprep.subr.bf16.mxu0 %v7201_v56  ;;  %v7328_v2 = vcombine.low %v1423_v49, %v1427_v52 }
 0x384   :  { %v1291_v62 = vld [vmem:[#allocation2 + $0x3a0] sm:$0xff]  ;;  %2728 = vmatpush2.bf16.msra.mxu0 %v7200_v1  ;;  %v1360_v1 = vld [vmem:[#allocation2 + $0x5c8] sm:$0xff] }
 0x385   :  { %v1415_v63 = vld [vmem:[#allocation2 + $0x780] sm:$0xff]  ;;  %v7193_v3 = vcombine.high %v1287_v59, %v1291_v62  ;;  %2768 = vmatprep.subr.bf16.mxu1 %v7329_v57  ;;  %v7192_v12 = vcombine.low %v1287_v59, %v1291_v62 }
 0x386   :  { %v1419_v0 = vld [vmem:[#allocation2 + $0x7a0] sm:$0xff]  ;;  %2769 = vmatpush2.bf16.msra.mxu1 %v7328_v2  ;;  %v1364_v2 = vld [vmem:[#allocation2 + $0x5e8] sm:$0xff] }
 0x387   :  { %v7321_v5 = vcombine.high %v1415_v63, %v1419_v0  ;;  %v1279_v6 = vld [vmem:[#allocation2 + $0x340] sm:$0xff]  ;;  %2729 = vmatprep.subr.bf16.mxu0 %v7193_v3  ;;  %v7320_v14 = vcombine.low %v1415_v63, %v1419_v0  ;;  %v1232_v63 = vld [vmem:[#allocation2 + $0x1c8] sm:$0xff] }
 0x388   :  { %v1283_v8 = vld [vmem:[#allocation2 + $0x360] sm:$0xff]  ;;  %2730 = vmatpush2.bf16.msra.mxu0 %v7192_v12  ;;  %v1236_v0 = vld [vmem:[#allocation2 + $0x1e8] sm:$0xff] }
 0x389   :  { %v1407_v9 = vld [vmem:[#allocation2 + $0x740] sm:$0xff]  ;;  %v7185_v15 = vcombine.high %v1279_v6, %v1283_v8  ;;  %2770 = vmatprep.subr.bf16.mxu1 %v7321_v5  ;;  %v7184_v11 = vcombine.low %v1279_v6, %v1283_v8  ;;  %v7139_v6 = vcombine.high %v1232_v63, %v1236_v0  ;;  %v7267_v8 = vcombine.high %v1360_v1, %v1364_v2  ;;  %v1352_v12 = vld [vmem:[#allocation2 + $0x588] sm:$0xff] }
 0x38a   :  { %v1411_v10 = vld [vmem:[#allocation2 + $0x760] sm:$0xff]  ;;  %2771 = vmatpush2.bf16.msra.mxu1 %v7320_v14  ;;  %v1356_v14 = vld [vmem:[#allocation2 + $0x5a8] sm:$0xff] }
 0x38b   :  { %v7313_v16 = vcombine.high %v1407_v9, %v1411_v10  ;;  %v1271_v17 = vld [vmem:[#allocation2 + $0x300] sm:$0xff]  ;;  %2731 = vmatprep.subr.bf16.mxu0 %v7185_v15  ;;  %v7312_v13 = vcombine.low %v1407_v9, %v1411_v10  ;;  %v1224_v9 = vld [vmem:[#allocation2 + $0x188] sm:$0xff]  ;;  %v7138_v15 = vcombine.low %v1232_v63, %v1236_v0 }
 0x38c   :  { %v1275_v18 = vld [vmem:[#allocation2 + $0x320] sm:$0xff]  ;;  %2732 = vmatpush2.bf16.msra.mxu0 %v7184_v11  ;;  %v1228_v10 = vld [vmem:[#allocation2 + $0x1a8] sm:$0xff] }
 0x38d   :  { %v1399_v19 = vld [vmem:[#allocation2 + $0x700] sm:$0xff]  ;;  %v7177_v21 = vcombine.high %v1271_v17, %v1275_v18  ;;  %2772 = vmatprep.subr.bf16.mxu1 %v7313_v16  ;;  %v7176_v29 = vcombine.low %v1271_v17, %v1275_v18  ;;  %v7266_v16 = vcombine.low %v1360_v1, %v1364_v2  ;;  %v7131_v17 = vcombine.high %v1224_v9, %v1228_v10  ;;  %v1344_v11 = vld [vmem:[#allocation2 + $0x548] sm:$0xff] }
 0x38e   :  { %v1403_v20 = vld [vmem:[#allocation2 + $0x720] sm:$0xff]  ;;  %2773 = vmatpush2.bf16.msra.mxu1 %v7312_v13  ;;  %v7259_v18 = vcombine.high %v1352_v12, %v1356_v14  ;;  %v1348_v13 = vld [vmem:[#allocation2 + $0x568] sm:$0xff] }
 0x38f   :  { %v7305_v22 = vcombine.high %v1399_v19, %v1403_v20  ;;  %v1263_v25 = vld [vmem:[#allocation2 + $0x2c0] sm:$0xff]  ;;  %2733 = vmatprep.subr.bf16.mxu0 %v7177_v21  ;;  %v7304_v30 = vcombine.low %v1399_v19, %v1403_v20  ;;  %v1216_v19 = vld [vmem:[#allocation2 + $0x148] sm:$0xff]  ;;  %v7130_v21 = vcombine.low %v1224_v9, %v1228_v10 }
 0x390   :  { %v1267_v26 = vld [vmem:[#allocation2 + $0x2e0] sm:$0xff]  ;;  %2734 = vmatpush2.bf16.msra.mxu0 %v7176_v29  ;;  %v1220_v20 = vld [vmem:[#allocation2 + $0x168] sm:$0xff] }
 0x391   :  { %v1391_v27 = vld [vmem:[#allocation2 + $0x6c0] sm:$0xff]  ;;  %v7169_v31 = vcombine.high %v1263_v25, %v1267_v26  ;;  %2774 = vmatprep.subr.bf16.mxu1 %v7305_v22  ;;  %v7168_v34 = vcombine.low %v1263_v25, %v1267_v26  ;;  %v7258_v22 = vcombine.low %v1352_v12, %v1356_v14  ;;  %v7123_v25 = vcombine.high %v1216_v19, %v1220_v20  ;;  %v1336_v29 = vld [vmem:[#allocation2 + $0x508] sm:$0xff] }
 0x392   :  { %v1395_v28 = vld [vmem:[#allocation2 + $0x6e0] sm:$0xff]  ;;  %2775 = vmatpush2.bf16.msra.mxu1 %v7304_v30  ;;  %v7251_v26 = vcombine.high %v1344_v11, %v1348_v13  ;;  %v1340_v30 = vld [vmem:[#allocation2 + $0x528] sm:$0xff] }
 0x393   :  { %v7297_v4 = vcombine.high %v1391_v27, %v1395_v28  ;;  %v1255_v32 = vld [vmem:[#allocation2 + $0x280] sm:$0xff]  ;;  %2735 = vmatprep.subr.bf16.mxu0 %v7169_v31  ;;  %v7296_v24 = vcombine.low %v1391_v27, %v1395_v28  ;;  %v1208_v27 = vld [vmem:[#allocation2 + $0x108] sm:$0xff]  ;;  %v7122_v31 = vcombine.low %v1216_v19, %v1220_v20 }
 0x394   :  { %v1259_v23 = vld [vmem:[#allocation2 + $0x2a0] sm:$0xff]  ;;  %2736 = vmatpush2.bf16.msra.mxu0 %v7168_v34  ;;  %v1212_v28 = vld [vmem:[#allocation2 + $0x128] sm:$0xff] }
 0x395   :  { %v1383_v33 = vld [vmem:[#allocation2 + $0x680] sm:$0xff]  ;;  %v7161_v39 = vcombine.high %v1255_v32, %v1259_v23  ;;  %2776 = vmatprep.subr.bf16.mxu1 %v7297_v4  ;;  %v7160_v45 = vcombine.low %v1255_v32, %v1259_v23  ;;  %v7250_v4 = vcombine.low %v1344_v11, %v1348_v13  ;;  %v7115_v32 = vcombine.high %v1208_v27, %v1212_v28  ;;  %v1328_v34 = vld [vmem:[#allocation2 + $0x4c8] sm:$0xff] }
 0x396   :  { %v1387_v7 = vld [vmem:[#allocation2 + $0x6a0] sm:$0xff]  ;;  %2777 = vmatpush2.bf16.msra.mxu1 %v7296_v24  ;;  %v7243_v23 = vcombine.high %v1336_v29, %v1340_v30  ;;  %v1332_v24 = vld [vmem:[#allocation2 + $0x4e8] sm:$0xff] }
 0x397   :  { %v7289_v40 = vcombine.high %v1383_v33, %v1387_v7  ;;  %v1247_v41 = vld [vmem:[#allocation2 + $0x240] sm:$0xff]  ;;  %2737 = vmatprep.subr.bf16.mxu0 %v7161_v39  ;;  %v7288_v46 = vcombine.low %v1383_v33, %v1387_v7  ;;  %v1200_v33 = vld [vmem:[#allocation2 + $0xc8] sm:$0xff]  ;;  %v7114_v39 = vcombine.low %v1208_v27, %v1212_v28 }
 0x398   :  { %v1251_v42 = vld [vmem:[#allocation2 + $0x260] sm:$0xff]  ;;  %2738 = vmatpush2.bf16.msra.mxu0 %v7160_v45  ;;  %v1204_v7 = vld [vmem:[#allocation2 + $0xe8] sm:$0xff] }
 0x399   :  { %v1375_v43 = vld [vmem:[#allocation2 + $0x640] sm:$0xff]  ;;  %v7153_v47 = vcombine.high %v1247_v41, %v1251_v42  ;;  %2778 = vmatprep.subr.bf16.mxu1 %v7289_v40  ;;  %v7152_v56 = vcombine.low %v1247_v41, %v1251_v42  ;;  %v7242_v40 = vcombine.low %v1336_v29, %v1340_v30  ;;  %v7107_v41 = vcombine.high %v1200_v33, %v1204_v7  ;;  %v1320_v45 = vld [vmem:[#allocation2 + $0x488] sm:$0xff] }
 0x39a   :  { %v1379_v44 = vld [vmem:[#allocation2 + $0x660] sm:$0xff]  ;;  %2779 = vmatpush2.bf16.msra.mxu1 %v7288_v46  ;;  %v7235_v42 = vcombine.high %v1328_v34, %v1332_v24  ;;  %v1324_v46 = vld [vmem:[#allocation2 + $0x4a8] sm:$0xff] }
 0x39b   :  { %v7281_v48 = vcombine.high %v1375_v43, %v1379_v44  ;;  %v1239_v49 = vld [vmem:[#allocation2 + $0x200] sm:$0xff]  ;;  %2739 = vmatprep.subr.bf16.mxu0 %v7153_v47  ;;  %v7280_v57 = vcombine.low %v1375_v43, %v1379_v44  ;;  %v1192_v43 = vld [vmem:[#allocation2 + $0x88] sm:$0xff]  ;;  %v7106_v47 = vcombine.low %v1200_v33, %v1204_v7 }
 0x39c   :  { %v1243_v52 = vld [vmem:[#allocation2 + $0x220] sm:$0xff]  ;;  %2740 = vmatpush2.bf16.msra.mxu0 %v7152_v56  ;;  %v1196_v44 = vld [vmem:[#allocation2 + $0xa8] sm:$0xff] }
 0x39d   :  { %v1367_v54 = vld [vmem:[#allocation2 + $0x600] sm:$0xff]  ;;  %v7145_v59 = vcombine.high %v1239_v49, %v1243_v52  ;;  %2780 = vmatprep.subr.bf16.mxu1 %v7281_v48  ;;  %v7144_v3 = vcombine.low %v1239_v49, %v1243_v52  ;;  %v7234_v48 = vcombine.low %v1328_v34, %v1332_v24  ;;  %v7099_v49 = vcombine.high %v1192_v43, %v1196_v44  ;;  %v1312_v56 = vld [vmem:[#allocation2 + $0x448] sm:$0xff] }
 0x39e   :  { %v1371_v55 = vld [vmem:[#allocation2 + $0x620] sm:$0xff]  ;;  %2781 = vmatpush2.bf16.msra.mxu1 %v7280_v57  ;;  %v7227_v52 = vcombine.high %v1320_v45, %v1324_v46  ;;  %v1316_v57 = vld [vmem:[#allocation2 + $0x468] sm:$0xff] }
 0x39f   :  { %v7273_v62 = vcombine.high %v1367_v54, %v1371_v55  ;;  %2741 = vmatprep.subr.bf16.mxu0 %v7145_v59  ;;  %v7272_v5 = vcombine.low %v1367_v54, %v1371_v55  ;;  %v1184_v54 = vld [vmem:[#allocation2 + $0x48] sm:$0xff]  ;;  %v7098_v59 = vcombine.low %v1192_v43, %v1196_v44  ;;  %v7219_v0 = vcombine.high %v1312_v56, %v1316_v57 }
 0x3a0   :  { %2742 = vmatpush2.bf16.msra.mxu0 %v7144_v3  ;;  %v1188_v55 = vld [vmem:[#allocation2 + $0x68] sm:$0xff] }
 0x3a1   :  { %2782 = vmatprep.subr.bf16.mxu1 %v7273_v62  ;;  %2793 = vmatprep.subr.bf16.mxu0 %v7139_v6  ;;  %v7226_v62 = vcombine.low %v1320_v45, %v1324_v46  ;;  %v7091_v63 = vcombine.high %v1184_v54, %v1188_v55  ;;  %v1176_v1 = vld [vmem:[#allocation2 + $0x8] sm:$0xff]  ;;  %v7090_v6 = vcombine.low %v1184_v54, %v1188_v55 }
 0x3a2   :  { %2783 = vmatpush2.bf16.msra.mxu1 %v7272_v5  ;;  %v1180_v2 = vld [vmem:[#allocation2 + $0x28] sm:$0xff] }
 0x3a3   :  { %2834 = vmatprep.subr.bf16.mxu1 %v7267_v8  ;;  %2744 = vmatmul.mubr.bf16.vlgmr.msra.gmra.mxu0 %v9014_v35  ;;  %v1304_v3 = vld [vmem:[#allocation2 + $0x408] sm:$0xff]  ;;  %v7218_v8 = vcombine.low %v1312_v56, %v1316_v57  ;;  %v7083_v9 = vcombine.high %v1176_v1, %v1180_v2 }
 0x3a4   :  { %2794 = vmatpush1.bf16.msra.mxu0 %v7138_v15  ;;  %2825 = vmatprep.mubr.bf16.mxu0 %v9016_v36  ;;  %v1308_v5 = vld [vmem:[#allocation2 + $0x428] sm:$0xff] }
 0x3a5   :  { %2785 = vmatmul.mubr.bf16.vlgmr.msra.gmra.mxu1 %v9018_v37  ;;  %2795 = vmatprep.subr.bf16.mxu0 %v7131_v17  ;;  %v7211_v10 = vcombine.high %v1304_v3, %v1308_v5  ;;  %v1296_v12 = vld [vmem:[#allocation2 + $0x3c8] sm:$0xff]  ;;  %v7082_v17 = vcombine.low %v1176_v1, %v1180_v2 }
 0x3a6   :  { %2835 = vmatpush1.bf16.msra.mxu1 %v7266_v16  ;;  %2866 = vmatprep.mubr.bf16.mxu1 %v9020_v38  ;;  %v1300_v14 = vld [vmem:[#allocation2 + $0x3e8] sm:$0xff] }
 0x3a7   :  { %2836 = vmatprep.subr.bf16.mxu1 %v7259_v18  ;;  %v1424_v15 = vld [vmem:[#allocation2 + $0x7c8] sm:$0xff]  ;;  %v7210_v18 = vcombine.low %v1304_v3, %v1308_v5  ;;  %v7203_v19 = vcombine.high %v1296_v12, %v1300_v14 }
 0x3a8   :  { %2796 = vmatpush1.bf16.msra.mxu0 %v7130_v21  ;;  %v1428_v16 = vld [vmem:[#allocation2 + $0x7e8] sm:$0xff] }
 0x3a9   :  { %2797 = vmatprep.subr.bf16.mxu0 %v7123_v25  ;;  %v7331_v20 = vcombine.high %v1424_v15, %v1428_v16  ;;  %v1288_v11 = vld [vmem:[#allocation2 + $0x388] sm:$0xff]  ;;  %v7202_v25 = vcombine.low %v1296_v12, %v1300_v14 }
 0x3aa   :  { %2837 = vmatpush1.bf16.msra.mxu1 %v7258_v22  ;;  %v1292_v13 = vld [vmem:[#allocation2 + $0x3a8] sm:$0xff] }
 0x3ab   :  { %2838 = vmatprep.subr.bf16.mxu1 %v7251_v26  ;;  %v1416_v21 = vld [vmem:[#allocation2 + $0x788] sm:$0xff]  ;;  %v7330_v26 = vcombine.low %v1424_v15, %v1428_v16  ;;  %v7195_v27 = vcombine.high %v1288_v11, %v1292_v13 }
 0x3ac   :  { %2798 = vmatpush1.bf16.msra.mxu0 %v7122_v31  ;;  %v1420_v22 = vld [vmem:[#allocation2 + $0x7a8] sm:$0xff] }
 0x3ad   :  { %2799 = vmatprep.subr.bf16.mxu0 %v7115_v32  ;;  %v7323_v28 = vcombine.high %v1416_v21, %v1420_v22  ;;  %v1280_v29 = vld [vmem:[#allocation2 + $0x348] sm:$0xff]  ;;  %v7194_v32 = vcombine.low %v1288_v11, %v1292_v13 }
 0x3ae   :  { %2839 = vmatpush1.bf16.msra.mxu1 %v7250_v4  ;;  %v1284_v30 = vld [vmem:[#allocation2 + $0x368] sm:$0xff] }
 0x3af   :  { %2840 = vmatprep.subr.bf16.mxu1 %v7243_v23  ;;  %v1408_v31 = vld [vmem:[#allocation2 + $0x748] sm:$0xff]  ;;  %v7322_v23 = vcombine.low %v1416_v21, %v1420_v22  ;;  %v7187_v33 = vcombine.high %v1280_v29, %v1284_v30  ;;  %v1233_v21 = vld [vmem:[#allocation2 + $0x1d0] sm:$0xff] }
 0x3b0   :  { %2800 = vmatpush1.bf16.msra.mxu0 %v7114_v39  ;;  %v1412_v4 = vld [vmem:[#allocation2 + $0x768] sm:$0xff]  ;;  %v1237_v22 = vld [vmem:[#allocation2 + $0x1f0] sm:$0xff] }
 0x3b1   :  { %2801 = vmatprep.subr.bf16.mxu0 %v7107_v41  ;;  %v7315_v7 = vcombine.high %v1408_v31, %v1412_v4  ;;  %v1272_v34 = vld [vmem:[#allocation2 + $0x308] sm:$0xff]  ;;  %v7186_v41 = vcombine.low %v1280_v29, %v1284_v30  ;;  %v7141_v29 = vcombine.high %v1233_v21, %v1237_v22 }
 0x3b2   :  { %2841 = vmatpush1.bf16.msra.mxu1 %v7242_v40  ;;  %v1276_v24 = vld [vmem:[#allocation2 + $0x328] sm:$0xff] }
 0x3b3   :  { %2842 = vmatprep.subr.bf16.mxu1 %v7235_v42  ;;  %v1400_v39 = vld [vmem:[#allocation2 + $0x708] sm:$0xff]  ;;  %v7314_v42 = vcombine.low %v1408_v31, %v1412_v4  ;;  %v7179_v43 = vcombine.high %v1272_v34, %v1276_v24  ;;  %v1225_v31 = vld [vmem:[#allocation2 + $0x190] sm:$0xff] }
 0x3b4   :  { %2802 = vmatpush1.bf16.msra.mxu0 %v7106_v47  ;;  %v1404_v40 = vld [vmem:[#allocation2 + $0x728] sm:$0xff]  ;;  %v1229_v4 = vld [vmem:[#allocation2 + $0x1b0] sm:$0xff] }
 0x3b5   :  { %2803 = vmatprep.subr.bf16.mxu0 %v7099_v49  ;;  %v7307_v44 = vcombine.high %v1400_v39, %v1404_v40  ;;  %v1264_v45 = vld [vmem:[#allocation2 + $0x2c8] sm:$0xff]  ;;  %v7178_v49 = vcombine.low %v1272_v34, %v1276_v24  ;;  %v7133_v34 = vcombine.high %v1225_v31, %v1229_v4 }
 0x3b6   :  { %2843 = vmatpush1.bf16.msra.mxu1 %v7234_v48  ;;  %v1268_v46 = vld [vmem:[#allocation2 + $0x2e8] sm:$0xff] }
 0x3b7   :  { %2844 = vmatprep.subr.bf16.mxu1 %v7227_v52  ;;  %v1392_v47 = vld [vmem:[#allocation2 + $0x6c8] sm:$0xff]  ;;  %v7306_v52 = vcombine.low %v1400_v39, %v1404_v40  ;;  %v7171_v54 = vcombine.high %v1264_v45, %v1268_v46  ;;  %v1217_v39 = vld [vmem:[#allocation2 + $0x150] sm:$0xff] }
 0x3b8   :  { %2804 = vmatpush1.bf16.msra.mxu0 %v7098_v59  ;;  %v1396_v48 = vld [vmem:[#allocation2 + $0x6e8] sm:$0xff]  ;;  %v1221_v40 = vld [vmem:[#allocation2 + $0x170] sm:$0xff] }
 0x3b9   :  { %2805 = vmatprep.subr.bf16.mxu0 %v7091_v63  ;;  %v7299_v55 = vcombine.high %v1392_v47, %v1396_v48  ;;  %v1256_v56 = vld [vmem:[#allocation2 + $0x288] sm:$0xff]  ;;  %v7170_v63 = vcombine.low %v1264_v45, %v1268_v46  ;;  %v7125_v45 = vcombine.high %v1217_v39, %v1221_v40 }
 0x3ba   :  { %2845 = vmatpush1.bf16.msra.mxu1 %v7226_v62  ;;  %v1260_v57 = vld [vmem:[#allocation2 + $0x2a8] sm:$0xff] }
 0x3bb   :  { %2846 = vmatprep.subr.bf16.mxu1 %v7219_v0  ;;  %v1384_v59 = vld [vmem:[#allocation2 + $0x688] sm:$0xff]  ;;  %v7298_v0 = vcombine.low %v1392_v47, %v1396_v48  ;;  %v7163_v1 = vcombine.high %v1256_v56, %v1260_v57  ;;  %v1209_v47 = vld [vmem:[#allocation2 + $0x110] sm:$0xff] }
 0x3bc   :  { %2806 = vmatpush1.bf16.msra.mxu0 %v7090_v6  ;;  %v1388_v62 = vld [vmem:[#allocation2 + $0x6a8] sm:$0xff]  ;;  %v1213_v48 = vld [vmem:[#allocation2 + $0x130] sm:$0xff] }
 0x3bd   :  { %2807 = vmatprep.subr.bf16.mxu0 %v7083_v9  ;;  %v7291_v2 = vcombine.high %v1384_v59, %v1388_v62  ;;  %v1248_v3 = vld [vmem:[#allocation2 + $0x248] sm:$0xff]  ;;  %v7162_v9 = vcombine.low %v1256_v56, %v1260_v57  ;;  %v7117_v56 = vcombine.high %v1209_v47, %v1213_v48 }
 0x3be   :  { %2847 = vmatpush1.bf16.msra.mxu1 %v7218_v8  ;;  %v1252_v5 = vld [vmem:[#allocation2 + $0x268] sm:$0xff] }
 0x3bf   :  { %2848 = vmatprep.subr.bf16.mxu1 %v7211_v10  ;;  %v1376_v6 = vld [vmem:[#allocation2 + $0x648] sm:$0xff]  ;;  %v7290_v10 = vcombine.low %v1384_v59, %v1388_v62  ;;  %v7155_v12 = vcombine.high %v1248_v3, %v1252_v5  ;;  %v1201_v59 = vld [vmem:[#allocation2 + $0xd0] sm:$0xff] }
 0x3c0   :  { %2808 = vmatpush1.bf16.msra.mxu0 %v7082_v17  ;;  %v1380_v8 = vld [vmem:[#allocation2 + $0x668] sm:$0xff]  ;;  %v1205_v62 = vld [vmem:[#allocation2 + $0xf0] sm:$0xff] }
 0x3c1   :  { %2809 = vmatprep.subr.bf16.mxu0 %v7203_v19  ;;  %v7283_v14 = vcombine.high %v1376_v6, %v1380_v8  ;;  %v1240_v15 = vld [vmem:[#allocation2 + $0x208] sm:$0xff]  ;;  %v7154_v19 = vcombine.low %v1248_v3, %v1252_v5  ;;  %v7109_v3 = vcombine.high %v1201_v59, %v1205_v62 }
 0x3c2   :  { %2849 = vmatpush1.bf16.msra.mxu1 %v7210_v18  ;;  %v1244_v16 = vld [vmem:[#allocation2 + $0x228] sm:$0xff] }
 0x3c3   :  { %2850 = vmatprep.subr.bf16.mxu1 %v7331_v20  ;;  %v1368_v17 = vld [vmem:[#allocation2 + $0x608] sm:$0xff]  ;;  %v7282_v20 = vcombine.low %v1376_v6, %v1380_v8  ;;  %v7147_v11 = vcombine.high %v1240_v15, %v1244_v16  ;;  %v1193_v6 = vld [vmem:[#allocation2 + $0x90] sm:$0xff] }
 0x3c4   :  { %2810 = vmatpush2.bf16.msra.mxu0 %v7202_v25  ;;  %v1372_v18 = vld [vmem:[#allocation2 + $0x628] sm:$0xff]  ;;  %v1361_v25 = vld [vmem:[#allocation2 + $0x5d0] sm:$0xff] }
 0x3c5   :  { %2811 = vmatprep.subr.bf16.mxu0 %v7195_v27  ;;  %v7275_v13 = vcombine.high %v1368_v17, %v1372_v18  ;;  %v7146_v27 = vcombine.low %v1240_v15, %v1244_v16  ;;  %v1197_v8 = vld [vmem:[#allocation2 + $0xb0] sm:$0xff] }
 0x3c6   :  { %2851 = vmatpush2.bf16.msra.mxu1 %v7330_v26  ;;  %v1365_v26 = vld [vmem:[#allocation2 + $0x5f0] sm:$0xff]  ;;  %v7101_v15 = vcombine.high %v1193_v6, %v1197_v8 }
 0x3c7   :  { %2852 = vmatprep.subr.bf16.mxu1 %v7323_v28  ;;  %v7274_v28 = vcombine.low %v1368_v17, %v1372_v18  ;;  %v7269_v30 = vcombine.high %v1361_v25, %v1365_v26  ;;  %v1185_v17 = vld [vmem:[#allocation2 + $0x50] sm:$0xff] }
 0x3c8   :  { %2812 = vmatpush2.bf16.msra.mxu0 %v7194_v32  ;;  %v1353_v32 = vld [vmem:[#allocation2 + $0x590] sm:$0xff] }
 0x3c9   :  { %2813 = vmatprep.subr.bf16.mxu0 %v7187_v33  ;;  %v7140_v33 = vcombine.low %v1233_v21, %v1237_v22  ;;  %v1189_v18 = vld [vmem:[#allocation2 + $0x70] sm:$0xff] }
 0x3ca   :  { %2853 = vmatpush2.bf16.msra.mxu1 %v7322_v23  ;;  %v1357_v23 = vld [vmem:[#allocation2 + $0x5b0] sm:$0xff]  ;;  %v7093_v21 = vcombine.high %v1185_v17, %v1189_v18 }
 0x3cb   :  { %2854 = vmatprep.subr.bf16.mxu1 %v7315_v7  ;;  %v7268_v7 = vcombine.low %v1361_v25, %v1365_v26  ;;  %v7261_v24 = vcombine.high %v1353_v32, %v1357_v23  ;;  %v1177_v25 = vld [vmem:[#allocation2 + $0x10] sm:$0xff] }
 0x3cc   :  { %2814 = vmatpush2.bf16.msra.mxu0 %v7186_v41  ;;  %v1345_v41 = vld [vmem:[#allocation2 + $0x550] sm:$0xff] }
 0x3cd   :  { %2815 = vmatprep.subr.bf16.mxu0 %v7179_v43  ;;  %v7132_v43 = vcombine.low %v1225_v31, %v1229_v4  ;;  %v1181_v26 = vld [vmem:[#allocation2 + $0x30] sm:$0xff] }
 0x3ce   :  { %2855 = vmatpush2.bf16.msra.mxu1 %v7314_v42  ;;  %v1349_v42 = vld [vmem:[#allocation2 + $0x570] sm:$0xff]  ;;  %v7085_v31 = vcombine.high %v1177_v25, %v1181_v26 }
 0x3cf   :  { %2856 = vmatprep.subr.bf16.mxu1 %v7307_v44  ;;  %v7260_v44 = vcombine.low %v1353_v32, %v1357_v23  ;;  %v7253_v46 = vcombine.high %v1345_v41, %v1349_v42  ;;  %v1297_v32 = vld [vmem:[#allocation2 + $0x3d0] sm:$0xff] }
 0x3d0   :  { %2816 = vmatpush2.bf16.msra.mxu0 %v7178_v49  ;;  %v1337_v49 = vld [vmem:[#allocation2 + $0x510] sm:$0xff] }
 0x3d1   :  { %2817 = vmatprep.subr.bf16.mxu0 %v7171_v54  ;;  %v7124_v54 = vcombine.low %v1217_v39, %v1221_v40  ;;  %v1301_v23 = vld [vmem:[#allocation2 + $0x3f0] sm:$0xff] }
 0x3d2   :  { %2857 = vmatpush2.bf16.msra.mxu1 %v7306_v52  ;;  %v1341_v52 = vld [vmem:[#allocation2 + $0x530] sm:$0xff]  ;;  %v7205_v39 = vcombine.high %v1297_v32, %v1301_v23 }
 0x3d3   :  { %2858 = vmatprep.subr.bf16.mxu1 %v7299_v55  ;;  %v7252_v55 = vcombine.low %v1345_v41, %v1349_v42  ;;  %v7245_v57 = vcombine.high %v1337_v49, %v1341_v52  ;;  %v1289_v41 = vld [vmem:[#allocation2 + $0x390] sm:$0xff] }
 0x3d4   :  { %2818 = vmatpush2.bf16.msra.mxu0 %v7170_v63  ;;  %v1329_v63 = vld [vmem:[#allocation2 + $0x4d0] sm:$0xff] }
 0x3d5   :  { %2819 = vmatprep.subr.bf16.mxu0 %v7163_v1  ;;  %v7116_v1 = vcombine.low %v1209_v47, %v1213_v48  ;;  %v1293_v42 = vld [vmem:[#allocation2 + $0x3b0] sm:$0xff] }
 0x3d6   :  { %2859 = vmatpush2.bf16.msra.mxu1 %v7298_v0  ;;  %v1333_v0 = vld [vmem:[#allocation2 + $0x4f0] sm:$0xff]  ;;  %v7197_v47 = vcombine.high %v1289_v41, %v1293_v42 }
 0x3d7   :  { %2860 = vmatprep.subr.bf16.mxu1 %v7291_v2  ;;  %v7244_v2 = vcombine.low %v1337_v49, %v1341_v52  ;;  %v7237_v5 = vcombine.high %v1329_v63, %v1333_v0  ;;  %v1281_v49 = vld [vmem:[#allocation2 + $0x350] sm:$0xff] }
 0x3d8   :  { %2820 = vmatpush2.bf16.msra.mxu0 %v7162_v9  ;;  %v1321_v9 = vld [vmem:[#allocation2 + $0x490] sm:$0xff] }
 0x3d9   :  { %2821 = vmatprep.subr.bf16.mxu0 %v7155_v12  ;;  %v7108_v12 = vcombine.low %v1201_v59, %v1205_v62  ;;  %v1285_v52 = vld [vmem:[#allocation2 + $0x370] sm:$0xff] }
 0x3da   :  { %2861 = vmatpush2.bf16.msra.mxu1 %v7290_v10  ;;  %v1325_v10 = vld [vmem:[#allocation2 + $0x4b0] sm:$0xff]  ;;  %v7189_v59 = vcombine.high %v1281_v49, %v1285_v52 }
 0x3db   :  { %2862 = vmatprep.subr.bf16.mxu1 %v7283_v14  ;;  %v7236_v14 = vcombine.low %v1329_v63, %v1333_v0  ;;  %v7229_v16 = vcombine.high %v1321_v9, %v1325_v10  ;;  %v1273_v63 = vld [vmem:[#allocation2 + $0x310] sm:$0xff] }
 0x3dc   :  { %2822 = vmatpush2.bf16.msra.mxu0 %v7154_v19  ;;  %v1313_v19 = vld [vmem:[#allocation2 + $0x450] sm:$0xff] }
 0x3dd   :  { %2823 = vmatprep.subr.bf16.mxu0 %v7147_v11  ;;  %v7100_v11 = vcombine.low %v1193_v6, %v1197_v8  ;;  %v1277_v0 = vld [vmem:[#allocation2 + $0x330] sm:$0xff] }
 0x3de   :  { %2863 = vmatpush2.bf16.msra.mxu1 %v7282_v20  ;;  %v1317_v20 = vld [vmem:[#allocation2 + $0x470] sm:$0xff]  ;;  %v7181_v6 = vcombine.high %v1273_v63, %v1277_v0 }
 0x3df   :  { %2864 = vmatprep.subr.bf16.mxu1 %v7275_v13  ;;  %v7228_v13 = vcombine.low %v1321_v9, %v1325_v10  ;;  %v7221_v22 = vcombine.high %v1313_v19, %v1317_v20  ;;  %v1265_v9 = vld [vmem:[#allocation2 + $0x2d0] sm:$0xff] }
 0x3e0   :  { %2824 = vmatpush2.bf16.msra.mxu0 %v7146_v27  ;;  %v1305_v27 = vld [vmem:[#allocation2 + $0x410] sm:$0xff] }
 0x3e1   :  { %2875 = vmatprep.subr.bf16.mxu0 %v7141_v29  ;;  %v7092_v29 = vcombine.low %v1185_v17, %v1189_v18  ;;  %v1269_v10 = vld [vmem:[#allocation2 + $0x2f0] sm:$0xff] }
 0x3e2   :  { %2865 = vmatpush2.bf16.msra.mxu1 %v7274_v28  ;;  %v1309_v28 = vld [vmem:[#allocation2 + $0x430] sm:$0xff]  ;;  %v7173_v17 = vcombine.high %v1265_v9, %v1269_v10 }
 0x3e3   :  { %2916 = vmatprep.subr.bf16.mxu1 %v7269_v30  ;;  %2826 = vmatmul.mubr.bf16.vlgmr.msra.gmra.mxu0 %v9014_v35  ;;  %v7220_v30 = vcombine.low %v1313_v19, %v1317_v20  ;;  %v7213_v4 = vcombine.high %v1305_v27, %v1309_v28  ;;  %v1257_v19 = vld [vmem:[#allocation2 + $0x290] sm:$0xff] }
 0x3e4   :  { %2876 = vmatpush1.bf16.msra.mxu0 %v7140_v33  ;;  %2907 = vmatprep.mubr.bf16.mxu0 %v9016_v36  ;;  %v1425_v33 = vld [vmem:[#allocation2 + $0x7d0] sm:$0xff] }
 0x3e5   :  { %2867 = vmatmul.mubr.bf16.vlgmr.msra.gmra.mxu1 %v9018_v37  ;;  %2877 = vmatprep.subr.bf16.mxu0 %v7133_v34  ;;  %v7084_v34 = vcombine.low %v1177_v25, %v1181_v26  ;;  %v1261_v20 = vld [vmem:[#allocation2 + $0x2b0] sm:$0xff] }
 0x3e6   :  { %2917 = vmatpush1.bf16.msra.mxu1 %v7268_v7  ;;  %2948 = vmatprep.mubr.bf16.mxu1 %v9020_v38  ;;  %v1429_v7 = vld [vmem:[#allocation2 + $0x7f0] sm:$0xff]  ;;  %v7165_v25 = vcombine.high %v1257_v19, %v1261_v20 }
 0x3e7   :  { %2918 = vmatprep.subr.bf16.mxu1 %v7261_v24  ;;  %v7212_v24 = vcombine.low %v1305_v27, %v1309_v28  ;;  %v7333_v40 = vcombine.high %v1425_v33, %v1429_v7  ;;  %v1249_v27 = vld [vmem:[#allocation2 + $0x250] sm:$0xff] }
 0x3e8   :  { %2878 = vmatpush1.bf16.msra.mxu0 %v7132_v43  ;;  %v1417_v43 = vld [vmem:[#allocation2 + $0x790] sm:$0xff] }
 0x3e9   :  { %2879 = vmatprep.subr.bf16.mxu0 %v7125_v45  ;;  %v7204_v45 = vcombine.low %v1297_v32, %v1301_v23  ;;  %v1253_v28 = vld [vmem:[#allocation2 + $0x270] sm:$0xff] }
 0x3ea   :  { %2919 = vmatpush1.bf16.msra.mxu1 %v7260_v44  ;;  %v1421_v44 = vld [vmem:[#allocation2 + $0x7b0] sm:$0xff]  ;;  %v7157_v32 = vcombine.high %v1249_v27, %v1253_v28 }
 0x3eb   :  { %2920 = vmatprep.subr.bf16.mxu1 %v7253_v46  ;;  %v7332_v46 = vcombine.low %v1425_v33, %v1429_v7  ;;  %v7325_v48 = vcombine.high %v1417_v43, %v1421_v44  ;;  %v1241_v33 = vld [vmem:[#allocation2 + $0x210] sm:$0xff] }
 0x3ec   :  { %2880 = vmatpush1.bf16.msra.mxu0 %v7124_v54  ;;  %v1409_v54 = vld [vmem:[#allocation2 + $0x750] sm:$0xff] }
 0x3ed   :  { %2881 = vmatprep.subr.bf16.mxu0 %v7117_v56  ;;  %v7196_v56 = vcombine.low %v1289_v41, %v1293_v42  ;;  %v1245_v7 = vld [vmem:[#allocation2 + $0x230] sm:$0xff] }
 0x3ee   :  { %2921 = vmatpush1.bf16.msra.mxu1 %v7252_v55  ;;  %v1413_v55 = vld [vmem:[#allocation2 + $0x770] sm:$0xff]  ;;  %v7149_v41 = vcombine.high %v1241_v33, %v1245_v7 }
 0x3ef   :  { %2922 = vmatprep.subr.bf16.mxu1 %v7245_v57  ;;  %v7324_v57 = vcombine.low %v1417_v43, %v1421_v44  ;;  %v7317_v62 = vcombine.high %v1409_v54, %v1413_v55  ;;  %v1234_v43 = vld [vmem:[#allocation2 + $0x1d8] sm:$0xff] }
 0x3f0   :  { %2882 = vmatpush1.bf16.msra.mxu0 %v7116_v1  ;;  %v1401_v1 = vld [vmem:[#allocation2 + $0x710] sm:$0xff]  ;;  %v1238_v44 = vld [vmem:[#allocation2 + $0x1f8] sm:$0xff] }
 0x3f1   :  { %2883 = vmatprep.subr.bf16.mxu0 %v7109_v3  ;;  %v7188_v3 = vcombine.low %v1281_v49, %v1285_v52  ;;  %v7143_v49 = vcombine.high %v1234_v43, %v1238_v44 }
 0x3f2   :  { %2923 = vmatpush1.bf16.msra.mxu1 %v7244_v2  ;;  %v1405_v2 = vld [vmem:[#allocation2 + $0x730] sm:$0xff] }
 0x3f3   :  { %2924 = vmatprep.subr.bf16.mxu1 %v7237_v5  ;;  %v7316_v5 = vcombine.low %v1409_v54, %v1413_v55  ;;  %v7309_v8 = vcombine.high %v1401_v1, %v1405_v2  ;;  %v1226_v54 = vld [vmem:[#allocation2 + $0x198] sm:$0xff] }
 0x3f4   :  { %2884 = vmatpush1.bf16.msra.mxu0 %v7108_v12  ;;  %v1393_v12 = vld [vmem:[#allocation2 + $0x6d0] sm:$0xff]  ;;  %v1230_v55 = vld [vmem:[#allocation2 + $0x1b8] sm:$0xff] }
 0x3f5   :  { %2885 = vmatprep.subr.bf16.mxu0 %v7101_v15  ;;  %v7180_v15 = vcombine.low %v1273_v63, %v1277_v0  ;;  %v7135_v63 = vcombine.high %v1226_v54, %v1230_v55 }
 0x3f6   :  { %2925 = vmatpush1.bf16.msra.mxu1 %v7236_v14  ;;  %v1397_v14 = vld [vmem:[#allocation2 + $0x6f0] sm:$0xff] }
 0x3f7   :  { %2926 = vmatprep.subr.bf16.mxu1 %v7229_v16  ;;  %v7308_v16 = vcombine.low %v1401_v1, %v1405_v2  ;;  %v7301_v18 = vcombine.high %v1393_v12, %v1397_v14  ;;  %v1218_v1 = vld [vmem:[#allocation2 + $0x158] sm:$0xff] }
 0x3f8   :  { %2886 = vmatpush1.bf16.msra.mxu0 %v7100_v11  ;;  %v1385_v11 = vld [vmem:[#allocation2 + $0x690] sm:$0xff]  ;;  %v1222_v2 = vld [vmem:[#allocation2 + $0x178] sm:$0xff] }
 0x3f9   :  { %2887 = vmatprep.subr.bf16.mxu0 %v7093_v21  ;;  %v7172_v21 = vcombine.low %v1265_v9, %v1269_v10  ;;  %v7127_v9 = vcombine.high %v1218_v1, %v1222_v2 }
 0x3fa   :  { %2927 = vmatpush1.bf16.msra.mxu1 %v7228_v13  ;;  %v1389_v13 = vld [vmem:[#allocation2 + $0x6b0] sm:$0xff] }
 0x3fb   :  { %2928 = vmatprep.subr.bf16.mxu1 %v7221_v22  ;;  %v7300_v22 = vcombine.low %v1393_v12, %v1397_v14  ;;  %v7293_v26 = vcombine.high %v1385_v11, %v1389_v13  ;;  %v1210_v12 = vld [vmem:[#allocation2 + $0x118] sm:$0xff] }
 0x3fc   :  { %2888 = vmatpush1.bf16.msra.mxu0 %v7092_v29  ;;  %v1377_v29 = vld [vmem:[#allocation2 + $0x650] sm:$0xff]  ;;  %v1214_v14 = vld [vmem:[#allocation2 + $0x138] sm:$0xff] }
 0x3fd   :  { %2889 = vmatprep.subr.bf16.mxu0 %v7085_v31  ;;  %v7164_v31 = vcombine.low %v1257_v19, %v1261_v20  ;;  %v7119_v19 = vcombine.high %v1210_v12, %v1214_v14 }
 0x3fe   :  { %2929 = vmatpush1.bf16.msra.mxu1 %v7220_v30  ;;  %v1381_v30 = vld [vmem:[#allocation2 + $0x670] sm:$0xff] }
 0x3ff   :  { %2930 = vmatprep.subr.bf16.mxu1 %v7213_v4  ;;  %v7292_v4 = vcombine.low %v1385_v11, %v1389_v13  ;;  %v7285_v23 = vcombine.high %v1377_v29, %v1381_v30  ;;  %v1202_v11 = vld [vmem:[#allocation2 + $0xd8] sm:$0xff] }
 0x400   :  { %2890 = vmatpush1.bf16.msra.mxu0 %v7084_v34  ;;  %v1369_v34 = vld [vmem:[#allocation2 + $0x610] sm:$0xff]  ;;  %v1206_v13 = vld [vmem:[#allocation2 + $0xf8] sm:$0xff] }
 0x401   :  { %2891 = vmatprep.subr.bf16.mxu0 %v7205_v39  ;;  %v7156_v39 = vcombine.low %v1249_v27, %v1253_v28  ;;  %v1194_v27 = vld [vmem:[#allocation2 + $0x98] sm:$0xff] }
 0x402   :  { %2931 = vmatpush1.bf16.msra.mxu1 %v7212_v24  ;;  %v1373_v24 = vld [vmem:[#allocation2 + $0x630] sm:$0xff]  ;;  %v1198_v28 = vld [vmem:[#allocation2 + $0xb8] sm:$0xff] }
 0x403   :  { %2932 = vmatprep.subr.bf16.mxu1 %v7333_v40  ;;  %v7284_v40 = vcombine.low %v1377_v29, %v1381_v30  ;;  %v7277_v42 = vcombine.high %v1369_v34, %v1373_v24  ;;  %v1322_v29 = vld [vmem:[#allocation2 + $0x498] sm:$0xff] }
 0x404   :  { %2892 = vmatpush2.bf16.msra.mxu0 %v7204_v45  ;;  %v1362_v45 = vld [vmem:[#allocation2 + $0x5d8] sm:$0xff] }
 0x405   :  { %2893 = vmatprep.subr.bf16.mxu0 %v7197_v47  ;;  %v7148_v47 = vcombine.low %v1241_v33, %v1245_v7  ;;  %v1326_v30 = vld [vmem:[#allocation2 + $0x4b8] sm:$0xff] }
 0x406   :  { %2933 = vmatpush2.bf16.msra.mxu1 %v7332_v46  ;;  %v1366_v46 = vld [vmem:[#allocation2 + $0x5f8] sm:$0xff] }
 0x407   :  { %2934 = vmatprep.subr.bf16.mxu1 %v7325_v48  ;;  %v7276_v48 = vcombine.low %v1369_v34, %v1373_v24  ;;  %v7271_v52 = vcombine.high %v1362_v45, %v1366_v46  ;;  %v1186_v33 = vld [vmem:[#allocation2 + $0x58] sm:$0xff] }
 0x408   :  { %2894 = vmatpush2.bf16.msra.mxu0 %v7196_v56  ;;  %v1354_v56 = vld [vmem:[#allocation2 + $0x598] sm:$0xff] }
 0x409   :  { %2895 = vmatprep.subr.bf16.mxu0 %v7189_v59  ;;  %v7142_v59 = vcombine.low %v1234_v43, %v1238_v44  ;;  %v1190_v7 = vld [vmem:[#allocation2 + $0x78] sm:$0xff] }
 0x40a   :  { %2935 = vmatpush2.bf16.msra.mxu1 %v7324_v57  ;;  %v1358_v57 = vld [vmem:[#allocation2 + $0x5b8] sm:$0xff] }
 0x40b   :  { %2936 = vmatprep.subr.bf16.mxu1 %v7317_v62  ;;  %v7270_v62 = vcombine.low %v1362_v45, %v1366_v46  ;;  %v7263_v0 = vcombine.high %v1354_v56, %v1358_v57  ;;  %v1314_v34 = vld [vmem:[#allocation2 + $0x458] sm:$0xff] }
 0x40c   :  { %2896 = vmatpush2.bf16.msra.mxu0 %v7188_v3  ;;  %v1346_v3 = vld [vmem:[#allocation2 + $0x558] sm:$0xff] }
 0x40d   :  { %2897 = vmatprep.subr.bf16.mxu0 %v7181_v6  ;;  %v7134_v6 = vcombine.low %v1226_v54, %v1230_v55  ;;  %v1318_v24 = vld [vmem:[#allocation2 + $0x478] sm:$0xff] }
 0x40e   :  { %2937 = vmatpush2.bf16.msra.mxu1 %v7316_v5  ;;  %v1350_v5 = vld [vmem:[#allocation2 + $0x578] sm:$0xff] }
 0x40f   :  { %2938 = vmatprep.subr.bf16.mxu1 %v7309_v8  ;;  %v7262_v8 = vcombine.low %v1354_v56, %v1358_v57  ;;  %v7255_v10 = vcombine.high %v1346_v3, %v1350_v5  ;;  %v1178_v43 = vld [vmem:[#allocation2 + $0x18] sm:$0xff] }
 0x410   :  { %2898 = vmatpush2.bf16.msra.mxu0 %v7180_v15  ;;  %v1338_v15 = vld [vmem:[#allocation2 + $0x518] sm:$0xff] }
 0x411   :  { %2899 = vmatprep.subr.bf16.mxu0 %v7173_v17  ;;  %v7126_v17 = vcombine.low %v1218_v1, %v1222_v2  ;;  %v1182_v44 = vld [vmem:[#allocation2 + $0x38] sm:$0xff] }
 0x412   :  { %2939 = vmatpush2.bf16.msra.mxu1 %v7308_v16  ;;  %v1342_v16 = vld [vmem:[#allocation2 + $0x538] sm:$0xff] }
 0x413   :  { %2940 = vmatprep.subr.bf16.mxu1 %v7301_v18  ;;  %v7254_v18 = vcombine.low %v1346_v3, %v1350_v5  ;;  %v7247_v20 = vcombine.high %v1338_v15, %v1342_v16  ;;  %v1306_v45 = vld [vmem:[#allocation2 + $0x418] sm:$0xff] }
 0x414   :  { %2900 = vmatpush2.bf16.msra.mxu0 %v7172_v21  ;;  %v1330_v21 = vld [vmem:[#allocation2 + $0x4d8] sm:$0xff] }
 0x415   :  { %2901 = vmatprep.subr.bf16.mxu0 %v7165_v25  ;;  %v7118_v25 = vcombine.low %v1210_v12, %v1214_v14  ;;  %v1310_v46 = vld [vmem:[#allocation2 + $0x438] sm:$0xff] }
 0x416   :  { %2941 = vmatpush2.bf16.msra.mxu1 %v7300_v22  ;;  %v1334_v22 = vld [vmem:[#allocation2 + $0x4f8] sm:$0xff] }
 0x417   :  { %2942 = vmatprep.subr.bf16.mxu1 %v7293_v26  ;;  %v7111_v26 = vcombine.high %v1202_v11, %v1206_v13  ;;  %v1298_v54 = vld [vmem:[#allocation2 + $0x3d8] sm:$0xff] }
 0x418   :  { %2902 = vmatpush2.bf16.msra.mxu0 %v7164_v31  ;;  %v7110_v31 = vcombine.low %v1202_v11, %v1206_v13  ;;  %v1302_v55 = vld [vmem:[#allocation2 + $0x3f8] sm:$0xff] }
 0x419   :  { %2903 = vmatprep.subr.bf16.mxu0 %v7157_v32  ;;  %v7103_v32 = vcombine.high %v1194_v27, %v1198_v28  ;;  %v1426_v56 = vld [vmem:[#allocation2 + $0x7d8] sm:$0xff] }
 0x41a   :  { %2943 = vmatpush2.bf16.msra.mxu1 %v7292_v4  ;;  %v7238_v4 = vcombine.low %v1330_v21, %v1334_v22  ;;  %v1430_v57 = vld [vmem:[#allocation2 + $0x7f8] sm:$0xff] }
 0x41b   :  { %2944 = vmatprep.subr.bf16.mxu1 %v7285_v23  ;;  %v7231_v23 = vcombine.high %v1322_v29, %v1326_v30  ;;  %v1290_v1 = vld [vmem:[#allocation2 + $0x398] sm:$0xff] }
 0x41c   :  { %2904 = vmatpush2.bf16.msra.mxu0 %v7156_v39  ;;  %v7102_v39 = vcombine.low %v1194_v27, %v1198_v28  ;;  %v1294_v2 = vld [vmem:[#allocation2 + $0x3b8] sm:$0xff] }
 0x41d   :  { %2905 = vmatprep.subr.bf16.mxu0 %v7149_v41  ;;  %v7095_v41 = vcombine.high %v1186_v33, %v1190_v7  ;;  %v1418_v3 = vld [vmem:[#allocation2 + $0x798] sm:$0xff] }
 0x41e   :  { %2945 = vmatpush2.bf16.msra.mxu1 %v7284_v40  ;;  %v7230_v40 = vcombine.low %v1322_v29, %v1326_v30  ;;  %v1422_v5 = vld [vmem:[#allocation2 + $0x7b8] sm:$0xff] }
 0x41f   :  { %2946 = vmatprep.subr.bf16.mxu1 %v7277_v42  ;;  %v7223_v42 = vcombine.high %v1314_v34, %v1318_v24  ;;  %v1282_v12 = vld [vmem:[#allocation2 + $0x358] sm:$0xff] }
 0x420   :  { %2906 = vmatpush2.bf16.msra.mxu0 %v7148_v47  ;;  %v7094_v47 = vcombine.low %v1186_v33, %v1190_v7  ;;  %v1286_v14 = vld [vmem:[#allocation2 + $0x378] sm:$0xff] }
 0x421   :  { %2957 = vmatprep.subr.bf16.mxu0 %v7143_v49  ;;  %v7087_v49 = vcombine.high %v1178_v43, %v1182_v44  ;;  %v1274_v11 = vld [vmem:[#allocation2 + $0x318] sm:$0xff] }
 0x422   :  { %2947 = vmatpush2.bf16.msra.mxu1 %v7276_v48  ;;  %v7222_v48 = vcombine.low %v1314_v34, %v1318_v24  ;;  %v1278_v13 = vld [vmem:[#allocation2 + $0x338] sm:$0xff] }
 0x423   :  { %2998 = vmatprep.subr.bf16.mxu1 %v7271_v52  ;;  %2908 = vmatmul.mubr.bf16.vlgmr.msra.gmra.mxu0 %v9014_v35  ;;  %v7215_v52 = vcombine.high %v1306_v45, %v1310_v46  ;;  %v1266_v27 = vld [vmem:[#allocation2 + $0x2d8] sm:$0xff] }
 0x424   :  { %2958 = vmatpush1.bf16.msra.mxu0 %v7142_v59  ;;  %2989 = vmatprep.mubr.bf16.mxu0 %v9016_v36  ;;  %v7246_v36 = vcombine.low %v1338_v15, %v1342_v16  ;;  %v7086_v59 = vcombine.low %v1178_v43, %v1182_v44  ;;  %v1410_v15 = vld [vmem:[#allocation2 + $0x758] sm:$0xff] }
 0x425   :  { %2949 = vmatmul.mubr.bf16.vlgmr.msra.gmra.mxu1 %v9018_v37  ;;  %2959 = vmatprep.subr.bf16.mxu0 %v7135_v63  ;;  %v7207_v63 = vcombine.high %v1298_v54, %v1302_v55  ;;  %v1414_v16 = vld [vmem:[#allocation2 + $0x778] sm:$0xff] }
 0x426   :  { %2999 = vmatpush1.bf16.msra.mxu1 %v7270_v62  ;;  %3030 = vmatprep.mubr.bf16.mxu1 %v9020_v38  ;;  %v7239_v38 = vcombine.high %v1330_v21, %v1334_v22  ;;  %v7214_v62 = vcombine.low %v1306_v45, %v1310_v46  ;;  %v1402_v21 = vld [vmem:[#allocation2 + $0x718] sm:$0xff] }
 0x427   :  { %3000 = vmatprep.subr.bf16.mxu1 %v7263_v0  ;;  %v7335_v0 = vcombine.high %v1426_v56, %v1430_v57  ;;  %v1406_v22 = vld [vmem:[#allocation2 + $0x738] sm:$0xff] }
 0x428   :  { %2960 = vmatpush1.bf16.msra.mxu0 %v7134_v6  ;;  %v7206_v6 = vcombine.low %v1298_v54, %v1302_v55  ;;  %v1270_v28 = vld [vmem:[#allocation2 + $0x2f8] sm:$0xff] }
 0x429   :  { %2961 = vmatprep.subr.bf16.mxu0 %v7127_v9  ;;  %v7199_v9 = vcombine.high %v1290_v1, %v1294_v2  ;;  %v1394_v29 = vld [vmem:[#allocation2 + $0x6d8] sm:$0xff] }
 0x42a   :  { %3001 = vmatpush1.bf16.msra.mxu1 %v7262_v8  ;;  %v7334_v8 = vcombine.low %v1426_v56, %v1430_v57  ;;  %v1398_v30 = vld [vmem:[#allocation2 + $0x6f8] sm:$0xff] }
 0x42b   :  { %3002 = vmatprep.subr.bf16.mxu1 %v7255_v10  ;;  %v7327_v10 = vcombine.high %v1418_v3, %v1422_v5  ;;  %v1258_v33 = vld [vmem:[#allocation2 + $0x298] sm:$0xff] }
 0x42c   :  { %2962 = vmatpush1.bf16.msra.mxu0 %v7126_v17  ;;  %v7198_v17 = vcombine.low %v1290_v1, %v1294_v2  ;;  %v1262_v7 = vld [vmem:[#allocation2 + $0x2b8] sm:$0xff] }
 0x42d   :  { %2963 = vmatprep.subr.bf16.mxu0 %v7119_v19  ;;  %v7191_v19 = vcombine.high %v1282_v12, %v1286_v14  ;;  %v1386_v34 = vld [vmem:[#allocation2 + $0x698] sm:$0xff] }
 0x42e   :  { %3003 = vmatpush1.bf16.msra.mxu1 %v7254_v18  ;;  %v7326_v18 = vcombine.low %v1418_v3, %v1422_v5  ;;  %v1390_v24 = vld [vmem:[#allocation2 + $0x6b8] sm:$0xff] }
 0x42f   :  { %3004 = vmatprep.subr.bf16.mxu1 %v7247_v20  ;;  %v7319_v20 = vcombine.high %v1410_v15, %v1414_v16  ;;  %v1250_v43 = vld [vmem:[#allocation2 + $0x258] sm:$0xff] }
 0x430   :  { %2964 = vmatpush1.bf16.msra.mxu0 %v7118_v25  ;;  %v7190_v25 = vcombine.low %v1282_v12, %v1286_v14  ;;  %v1254_v44 = vld [vmem:[#allocation2 + $0x278] sm:$0xff] }
 0x431   :  { %2965 = vmatprep.subr.bf16.mxu0 %v7111_v26  ;;  %v7183_v26 = vcombine.high %v1274_v11, %v1278_v13  ;;  %v1378_v45 = vld [vmem:[#allocation2 + $0x658] sm:$0xff] }
 0x432   :  { %3005 = vmatpush1.bf16.msra.mxu1 %v7246_v36  ;;  %v7318_v36 = vcombine.low %v1410_v15, %v1414_v16  ;;  %v1382_v46 = vld [vmem:[#allocation2 + $0x678] sm:$0xff] }
 0x433   :  { %3006 = vmatprep.subr.bf16.mxu1 %v7239_v38  ;;  %v7311_v38 = vcombine.high %v1402_v21, %v1406_v22  ;;  %v1242_v54 = vld [vmem:[#allocation2 + $0x218] sm:$0xff] }
 0x434   :  { %2966 = vmatpush1.bf16.msra.mxu0 %v7110_v31  ;;  %v7182_v31 = vcombine.low %v1274_v11, %v1278_v13  ;;  %v1246_v55 = vld [vmem:[#allocation2 + $0x238] sm:$0xff] }
 0x435   :  { %2967 = vmatprep.subr.bf16.mxu0 %v7103_v32  ;;  %v7175_v32 = vcombine.high %v1266_v27, %v1270_v28  ;;  %v1370_v56 = vld [vmem:[#allocation2 + $0x618] sm:$0xff]  ;;  %v7150_v1 = vcombine.low %v1242_v54, %v1246_v55 }
 0x436   :  { %3007 = vmatpush1.bf16.msra.mxu1 %v7238_v4  ;;  %v7310_v4 = vcombine.low %v1402_v21, %v1406_v22  ;;  %v1374_v57 = vld [vmem:[#allocation2 + $0x638] sm:$0xff] }
 0x437   :  { %3008 = vmatprep.subr.bf16.mxu1 %v7231_v23  ;;  %v7303_v23 = vcombine.high %v1394_v29, %v1398_v30  ;;  %v7278_v2 = vcombine.low %v1370_v56, %v1374_v57 }
 0x438   :  { %2968 = vmatpush1.bf16.msra.mxu0 %v7102_v39  ;;  %v7174_v39 = vcombine.low %v1266_v27, %v1270_v28 }
 0x439   :  { %2969 = vmatprep.subr.bf16.mxu0 %v7095_v41  ;;  %v7167_v41 = vcombine.high %v1258_v33, %v1262_v7 }
 0x43a   :  { %3009 = vmatpush1.bf16.msra.mxu1 %v7230_v40  ;;  %v7302_v40 = vcombine.low %v1394_v29, %v1398_v30 }
 0x43b   :  { %3010 = vmatprep.subr.bf16.mxu1 %v7223_v42  ;;  %v7295_v42 = vcombine.high %v1386_v34, %v1390_v24 }
 0x43c   :  { %2970 = vmatpush1.bf16.msra.mxu0 %v7094_v47  ;;  %v7166_v47 = vcombine.low %v1258_v33, %v1262_v7 }
 0x43d   :  { %2971 = vmatprep.subr.bf16.mxu0 %v7087_v49  ;;  %v7159_v49 = vcombine.high %v1250_v43, %v1254_v44 }
 0x43e   :  { %3011 = vmatpush1.bf16.msra.mxu1 %v7222_v48  ;;  %v7294_v48 = vcombine.low %v1386_v34, %v1390_v24 }
 0x43f   :  { %3012 = vmatprep.subr.bf16.mxu1 %v7215_v52  ;;  %v7287_v52 = vcombine.high %v1378_v45, %v1382_v46 }
 0x440   :  { %2972 = vmatpush1.bf16.msra.mxu0 %v7086_v59  ;;  %v7158_v59 = vcombine.low %v1250_v43, %v1254_v44 }
 0x441   :  { %2973 = vmatprep.subr.bf16.mxu0 %v7207_v63  ;;  %v7151_v63 = vcombine.high %v1242_v54, %v1246_v55 }
 0x442   :  { %3013 = vmatpush1.bf16.msra.mxu1 %v7214_v62  ;;  %v7286_v62 = vcombine.low %v1378_v45, %v1382_v46 }
 0x443   :  { %3014 = vmatprep.subr.bf16.mxu1 %v7335_v0  ;;  %v7279_v0 = vcombine.high %v1370_v56, %v1374_v57 }
 0x444   :  { %2974 = vmatpush2.bf16.msra.mxu0 %v7206_v6 }
 0x445   :  { %2975 = vmatprep.subr.bf16.mxu0 %v7199_v9 }
 0x446   :  { %3015 = vmatpush2.bf16.msra.mxu1 %v7334_v8 }
 0x447   :  { %3016 = vmatprep.subr.bf16.mxu1 %v7327_v10 }
 0x448   :  { %2976 = vmatpush2.bf16.msra.mxu0 %v7198_v17 }
 0x449   :  { %2977 = vmatprep.subr.bf16.mxu0 %v7191_v19 }
 0x44a   :  { %3017 = vmatpush2.bf16.msra.mxu1 %v7326_v18 }
 0x44b   :  { %3018 = vmatprep.subr.bf16.mxu1 %v7319_v20 }
 0x44c   :  { %2978 = vmatpush2.bf16.msra.mxu0 %v7190_v25 }
 0x44d   :  { %2979 = vmatprep.subr.bf16.mxu0 %v7183_v26 }
 0x44e   :  { %3019 = vmatpush2.bf16.msra.mxu1 %v7318_v36 }
 0x44f   :  { %3020 = vmatprep.subr.bf16.mxu1 %v7311_v38 }
 0x450   :  { %2980 = vmatpush2.bf16.msra.mxu0 %v7182_v31 }
 0x451   :  { %2981 = vmatprep.subr.bf16.mxu0 %v7175_v32 }
 0x452   :  { %3021 = vmatpush2.bf16.msra.mxu1 %v7310_v4 }
 0x453   :  { %3022 = vmatprep.subr.bf16.mxu1 %v7303_v23 }
 0x454   :  { %2982 = vmatpush2.bf16.msra.mxu0 %v7174_v39 }
 0x455   :  { %2983 = vmatprep.subr.bf16.mxu0 %v7167_v41 }
 0x456   :  { %3023 = vmatpush2.bf16.msra.mxu1 %v7302_v40 }
 0x457   :  { %3024 = vmatprep.subr.bf16.mxu1 %v7295_v42 }
 0x458   :  { %2984 = vmatpush2.bf16.msra.mxu0 %v7166_v47 }
 0x459   :  { %2985 = vmatprep.subr.bf16.mxu0 %v7159_v49 }
 0x45a   :  { %3025 = vmatpush2.bf16.msra.mxu1 %v7294_v48 }
 0x45b   :  { %3026 = vmatprep.subr.bf16.mxu1 %v7287_v52 }
 0x45c   :  { %2986 = vmatpush2.bf16.msra.mxu0 %v7158_v59 }
 0x45d   :  { %2987 = vmatprep.subr.bf16.mxu0 %v7151_v63 }
 0x45e   :  { %3027 = vmatpush2.bf16.msra.mxu1 %v7286_v62 }
 0x45f   :  { %3028 = vmatprep.subr.bf16.mxu1 %v7279_v0 }
 0x460   :  { %2988 = vmatpush2.bf16.msra.mxu0 %v7150_v1 }
 0x462   :  { %3029 = vmatpush2.bf16.msra.mxu1 %v7278_v2 }
 0x463   :  { %v2745_v3 = vpop.f32.mrf.mxu0  ;;  %2990 = vmatmul.mubr.bf16.vlgmr.msra.gmra.mxu0 %v9014_v35 }
 0x465   :  { %v2786_v5 = vpop.f32.mrf.mxu1  ;;  %3031 = vmatmul.mubr.bf16.vlgmr.msra.gmra.mxu1 %v9018_v37  ;;  %v2747_v8 = vpop.f32.mrf.mxu0 }
 0x466   :  { %v9038_v6 = vadd.f32 %v2786_v5, %v2745_v3 }
 0x467   :  { %v2788_v9 = vpop.f32.mrf.mxu1  ;;  %v2749_v15 = vpop.f32.mrf.mxu0 }
 0x468   :  { %v3041_v10 = vrot.slane %v9038_v6, 4  ;;  %v3097_v12 = vmul.f32 %v9038_v6, %v9038_v6  ;;  %v9043_v14 = vadd.f32 %v2788_v9, %v2747_v8 }
 0x469   :  { %v2790_v16 = vpop.f32.mrf.mxu1  ;;  %v2750_v19 = vpop.f32.mrf.mxu0 }
 0x46a   :  { %v3042_v17 = vadd.f32 %v3041_v10, %v9038_v6  ;;  %v3105_v18 = vrot.slane %v3097_v12, 4  ;;  %v3047_v35 = vrot.slane %v9043_v14, 4  ;;  %v3098_v37 = vmul.f32 %v9043_v14, %v9043_v14 }
 0x46b   :  { %v2791_v20 = vpop.f32.mrf.mxu1 }
 0x46c   :  { %v3043_v11 = vrot.slane %v3042_v17, 2  ;;  %v3106_v13 = vadd.f32 %v3105_v18, %v3097_v12  ;;  %v3048_v21 = vadd.f32 %v3047_v35, %v9043_v14  ;;  %v3111_v22 = vrot.slane %v3098_v37, 4 }
 0x46e   :  { %v3044_v25 = vadd.f32 %v3043_v11, %v3042_v17  ;;  %v3107_v36 = vrot.slane %v3106_v13, 2  ;;  %v3049_v26 = vrot.slane %v3048_v21, 2  ;;  %v3112_v38 = vadd.f32 %v3111_v22, %v3098_v37 }
 0x470   :  { %v3045_v27 = vrot.slane %v3044_v25, 1  ;;  %v3108_v28 = vadd.f32 %v3107_v36, %v3106_v13  ;;  %v3050_v29 = vadd.f32 %v3049_v26, %v3048_v21  ;;  %v3113_v30 = vrot.slane %v3112_v38, 2 }
 0x472   :  { %v3046_v31 = vadd.f32 %v3045_v27, %v3044_v25  ;;  %v3109_v4 = vrot.slane %v3108_v28, 1  ;;  %v3051_v32 = vrot.slane %v3050_v29, 1  ;;  %v3114_v23 = vadd.f32 %v3113_v30, %v3112_v38 }
 0x474   :  { %v9050_v33 = vmul.f32 0.125, %v3046_v31  ;;  %v3110_v7 = vadd.f32 %v3109_v4, %v3108_v28  ;;  %v3052_v34 = vadd.f32 %v3051_v32, %v3050_v29  ;;  %v3115_v24 = vrot.slane %v3114_v23, 1 }
 0x476   :  { %v3153_v39 = vmul.f32 0.125, %v3110_v7  ;;  %v3161_v40 = vmul.f32 %v9050_v33, %v9050_v33  ;;  %v9054_v41 = vmul.f32 0.125, %v3052_v34  ;;  %v3116_v42 = vadd.f32 %v3115_v24, %v3114_v23 }
 0x478   :  { %v3169_v43 = vsub.f32 %v3153_v39, %v3161_v40  ;;  %v3154_v44 = vmul.f32 0.125, %v3116_v42  ;;  %v3162_v45 = vmul.f32 %v9054_v41, %v9054_v41 }
 0x47a   :  { %v3177_v46 = vmax.f32 %v3169_v43, 0.0  ;;  %v3170_v47 = vsub.f32 %v3154_v44, %v3162_v45 }
 0x47c   :  { %v3185_v48 = vadd.f32 0.8, %v3177_v46  ;;  %v3178_v49 = vmax.f32 %v3170_v47, 0.0 }
 0x47e   :  { %v3186_v52 = vadd.f32 0.8, %v3178_v49  ;;  %8061 = vrsqrt.f32 %v3185_v48 }
 0x480   :  { %8063 = vrsqrt.f32 %v3186_v52 }
 0x48b   :  { %v8062_v54 = vpop.eup %8061 }
 0x48d   :  { %v8064_v55 = vpop.eup %8063 }
 0x48e   :  { %v3209_v56 = vcombine.low %v8062_v54, %v8064_v55 }
 0x490   :  { %v9079_v54 = vrot.slane %v3209_v56, %v8946_v50 }
 0x4a3   :  { %v2827_v57 = vpop.f32.mrf.mxu0 }
 0x4a5   :  { %v2868_v59 = vpop.f32.mrf.mxu1  ;;  %v2829_v63 = vpop.f32.mrf.mxu0 }
 0x4a6   :  { %v9058_v62 = vadd.f32 %v2868_v59, %v2827_v57 }
 0x4a7   :  { %v2870_v0 = vpop.f32.mrf.mxu1  ;;  %v2831_v5 = vpop.f32.mrf.mxu0 }
 0x4a8   :  { %v3053_v1 = vrot.slane %v9058_v62, 4  ;;  %v3099_v2 = vmul.f32 %v9058_v62, %v9058_v62  ;;  %v9063_v3 = vadd.f32 %v2870_v0, %v2829_v63 }
 0x4a9   :  { %v2872_v8 = vpop.f32.mrf.mxu1  ;;  %v2832_v16 = vpop.f32.mrf.mxu0 }
 0x4aa   :  { %v3054_v9 = vadd.f32 %v3053_v1, %v9058_v62  ;;  %v3117_v10 = vrot.slane %v3099_v2, 4  ;;  %v3059_v12 = vrot.slane %v9063_v3, 4  ;;  %v3100_v15 = vmul.f32 %v9063_v3, %v9063_v3 }
 0x4ab   :  { %v2873_v17 = vpop.f32.mrf.mxu1 }
 0x4ac   :  { %v3055_v18 = vrot.slane %v3054_v9, 2  ;;  %v3118_v35 = vadd.f32 %v3117_v10, %v3099_v2  ;;  %v3060_v37 = vadd.f32 %v3059_v12, %v9063_v3  ;;  %v3123_v19 = vrot.slane %v3100_v15, 4 }
 0x4ae   :  { %v3056_v20 = vadd.f32 %v3055_v18, %v3054_v9  ;;  %v3119_v11 = vrot.slane %v3118_v35, 2  ;;  %v3061_v13 = vrot.slane %v3060_v37, 2  ;;  %v3124_v21 = vadd.f32 %v3123_v19, %v3100_v15 }
 0x4b0   :  { %v3057_v22 = vrot.slane %v3056_v20, 1  ;;  %v3120_v25 = vadd.f32 %v3119_v11, %v3118_v35  ;;  %v3062_v36 = vadd.f32 %v3061_v13, %v3060_v37  ;;  %v3125_v26 = vrot.slane %v3124_v21, 2 }
 0x4b2   :  { %v3058_v38 = vadd.f32 %v3057_v22, %v3056_v20  ;;  %v3121_v27 = vrot.slane %v3120_v25, 1  ;;  %v3063_v28 = vrot.slane %v3062_v36, 1  ;;  %v3126_v29 = vadd.f32 %v3125_v26, %v3124_v21 }
 0x4b4   :  { %v9070_v30 = vmul.f32 0.125, %v3058_v38  ;;  %v3122_v31 = vadd.f32 %v3121_v27, %v3120_v25  ;;  %v3064_v4 = vadd.f32 %v3063_v28, %v3062_v36  ;;  %v3127_v32 = vrot.slane %v3126_v29, 1 }
 0x4b6   :  { %v3155_v23 = vmul.f32 0.125, %v3122_v31  ;;  %v3163_v7 = vmul.f32 %v9070_v30, %v9070_v30  ;;  %v9074_v34 = vmul.f32 0.125, %v3064_v4  ;;  %v3128_v24 = vadd.f32 %v3127_v32, %v3126_v29 }
 0x4b8   :  { %v3171_v39 = vsub.f32 %v3155_v23, %v3163_v7  ;;  %v3156_v40 = vmul.f32 0.125, %v3128_v24  ;;  %v3164_v42 = vmul.f32 %v9074_v34, %v9074_v34 }
 0x4ba   :  { %v3179_v43 = vmax.f32 %v3171_v39, 0.0  ;;  %v3172_v44 = vsub.f32 %v3156_v40, %v3164_v42 }
 0x4bc   :  { %v3187_v45 = vadd.f32 0.8, %v3179_v43  ;;  %v3180_v46 = vmax.f32 %v3172_v44, 0.0 }
 0x4be   :  { %v3188_v47 = vadd.f32 0.8, %v3180_v46  ;;  %8065 = vrsqrt.f32 %v3187_v45 }
 0x4c0   :  { %8067 = vrsqrt.f32 %v3188_v47 }
 0x4cb   :  { %v8066_v48 = vpop.eup %8065 }
 0x4cd   :  { %v8068_v49 = vpop.eup %8067 }
 0x4ce   :  { %v3210_v52 = vcombine.low %v8066_v48, %v8068_v49 }
 0x4d0   :  { %v9082_v55 = vrot.slane %v3210_v52, %v8946_v50 }
 0x4d2   :  { %v3241_v57 = vcombine.low %v9079_v54, %v9082_v55 }
 0x4e3   :  { %v2909_v59 = vpop.f32.mrf.mxu0 }
 0x4e5   :  { %v2950_v63 = vpop.f32.mrf.mxu1  ;;  %v2911_v1 = vpop.f32.mrf.mxu0 }
 0x4e6   :  { %v9086_v0 = vadd.f32 %v2950_v63, %v2909_v59 }
 0x4e7   :  { %v2952_v2 = vpop.f32.mrf.mxu1  ;;  %v2913_v56 = vpop.f32.mrf.mxu0 }
 0x4e8   :  { %v3065_v5 = vrot.slane %v9086_v0, 4  ;;  %v3101_v8 = vmul.f32 %v9086_v0, %v9086_v0  ;;  %v9091_v9 = vadd.f32 %v2952_v2, %v2911_v1 }
 0x4e9   :  { %v2954_v10 = vpop.f32.mrf.mxu1  ;;  %v2914_v18 = vpop.f32.mrf.mxu0 }
 0x4ea   :  { %v3066_v12 = vadd.f32 %v3065_v5, %v9086_v0  ;;  %v3129_v15 = vrot.slane %v3101_v8, 4  ;;  %v3071_v16 = vrot.slane %v9091_v9, 4  ;;  %v3102_v17 = vmul.f32 %v9091_v9, %v9091_v9 }
 0x4eb   :  { %v2955_v35 = vpop.f32.mrf.mxu1 }
 0x4ec   :  { %v3067_v37 = vrot.slane %v3066_v12, 2  ;;  %v3130_v19 = vadd.f32 %v3129_v15, %v3101_v8  ;;  %v3072_v20 = vadd.f32 %v3071_v16, %v9091_v9  ;;  %v3135_v11 = vrot.slane %v3102_v17, 4 }
 0x4ee   :  { %v3068_v13 = vadd.f32 %v3067_v37, %v3066_v12  ;;  %v3131_v21 = vrot.slane %v3130_v19, 2  ;;  %v3073_v22 = vrot.slane %v3072_v20, 2  ;;  %v3136_v25 = vadd.f32 %v3135_v11, %v3102_v17 }
 0x4f0   :  { %v3069_v36 = vrot.slane %v3068_v13, 1  ;;  %v3132_v26 = vadd.f32 %v3131_v21, %v3130_v19  ;;  %v3074_v38 = vadd.f32 %v3073_v22, %v3072_v20  ;;  %v3137_v27 = vrot.slane %v3136_v25, 2 }
 0x4f2   :  { %v3070_v28 = vadd.f32 %v3069_v36, %v3068_v13  ;;  %v3133_v29 = vrot.slane %v3132_v26, 1  ;;  %v3075_v31 = vrot.slane %v3074_v38, 1  ;;  %v3138_v4 = vadd.f32 %v3137_v27, %v3136_v25 }
 0x4f4   :  { %v9098_v32 = vmul.f32 0.125, %v3070_v28  ;;  %v3134_v23 = vadd.f32 %v3133_v29, %v3132_v26  ;;  %v3076_v7 = vadd.f32 %v3075_v31, %v3074_v38  ;;  %v3139_v24 = vrot.slane %v3138_v4, 1 }
 0x4f6   :  { %v3157_v39 = vmul.f32 0.125, %v3134_v23  ;;  %v3165_v40 = vmul.f32 %v9098_v32, %v9098_v32  ;;  %v9102_v42 = vmul.f32 0.125, %v3076_v7  ;;  %v3140_v43 = vadd.f32 %v3139_v24, %v3138_v4 }
 0x4f8   :  { %v3173_v44 = vsub.f32 %v3157_v39, %v3165_v40  ;;  %v3158_v45 = vmul.f32 0.125, %v3140_v43  ;;  %v3166_v46 = vmul.f32 %v9102_v42, %v9102_v42 }
 0x4fa   :  { %v3181_v47 = vmax.f32 %v3173_v44, 0.0  ;;  %v3174_v48 = vsub.f32 %v3158_v45, %v3166_v46 }
 0x4fc   :  { %v3189_v49 = vadd.f32 0.8, %v3181_v47  ;;  %v3182_v52 = vmax.f32 %v3174_v48, 0.0 }
 0x4fe   :  { %v3190_v59 = vadd.f32 0.8, %v3182_v52  ;;  %8069 = vrsqrt.f32 %v3189_v49 }
 0x500   :  { %8071 = vrsqrt.f32 %v3190_v59 }
 0x50b   :  { %v8070_v63 = vpop.eup %8069 }
 0x50d   :  { %v8072_v1 = vpop.eup %8071 }
 0x50e   :  { %v3211_v2 = vcombine.low %v8070_v63, %v8072_v1 }
 0x523   :  { %v2991_v5 = vpop.f32.mrf.mxu0 }
 0x525   :  { %v3032_v8 = vpop.f32.mrf.mxu1  ;;  %v2993_v10 = vpop.f32.mrf.mxu0 }
 0x526   :  { %v9106_v56 = vadd.f32 %v3032_v8, %v2991_v5 }
 0x527   :  { %v3034_v12 = vpop.f32.mrf.mxu1  ;;  %v2995_v18 = vpop.f32.mrf.mxu0 }
 0x528   :  { %v3077_v15 = vrot.slane %v9106_v56, 4  ;;  %v3103_v16 = vmul.f32 %v9106_v56, %v9106_v56  ;;  %v9111_v17 = vadd.f32 %v3034_v12, %v2993_v10 }
 0x529   :  { %v3036_v35 = vpop.f32.mrf.mxu1  ;;  %v2996_v13 = vpop.f32.mrf.mxu0 }
 0x52a   :  { %v3078_v37 = vadd.f32 %v3077_v15, %v9106_v56  ;;  %v3141_v19 = vrot.slane %v3103_v16, 4  ;;  %v3083_v20 = vrot.slane %v9111_v17, 4  ;;  %v3104_v11 = vmul.f32 %v9111_v17, %v9111_v17 }
 0x52b   :  { %v3037_v21 = vpop.f32.mrf.mxu1  ;;  %v3249_v13 = vrot.slane %v3241_v57, %v8946_v50 }
 0x52c   :  { %v3079_v22 = vrot.slane %v3078_v37, 2  ;;  %v3142_v25 = vadd.f32 %v3141_v19, %v3103_v16  ;;  %v3084_v36 = vadd.f32 %v3083_v20, %v9111_v17  ;;  %v3147_v26 = vrot.slane %v3104_v11, 4 }
 0x52d   :  { %v3233_v19 = vrot.slane %v3211_v2, %v8946_v50  ;;  %v9132_v2 = vsub.s32 6, %v8932_v51 }
 0x52e   :  { %v3080_v38 = vadd.f32 %v3079_v22, %v3078_v37  ;;  %v3143_v27 = vrot.slane %v3142_v25, 2  ;;  %v3085_v28 = vrot.slane %v3084_v36, 2  ;;  %v3148_v29 = vadd.f32 %v3147_v26, %v3104_v11  ;;  %v3039_v22 = vld [vmem:[#allocation10 + $0xe] sm:$0xff] }
 0x52f   :  { %v9129_v26 = vsub.s32 5, %v8932_v51 }
 0x530   :  { %v3081_v31 = vrot.slane %v3080_v38, 1  ;;  %v3144_v4 = vadd.f32 %v3143_v27, %v3142_v25  ;;  %v3086_v23 = vadd.f32 %v3085_v28, %v3084_v36  ;;  %v3149_v7 = vrot.slane %v3148_v29, 2 }
 0x531   :  { %v9126_v36 = vsub.s32 4, %v8932_v51 }
 0x532   :  { %v3082_v24 = vadd.f32 %v3081_v31, %v3080_v38  ;;  %v3145_v39 = vrot.slane %v3144_v4, 1  ;;  %v3087_v40 = vrot.slane %v3086_v23, 1  ;;  %v3150_v43 = vadd.f32 %v3149_v7, %v3148_v29 }
 0x533   :  { %v3291_v38 = vsub.s32 7, %v8932_v51 }
 0x534   :  { %v3095_v44 = vmul.f32 0.125, %v3082_v24  ;;  %v3146_v45 = vadd.f32 %v3145_v39, %v3144_v4  ;;  %v3088_v46 = vadd.f32 %v3087_v40, %v3086_v23  ;;  %v3151_v47 = vrot.slane %v3150_v43, 1 }
 0x536   :  { %v3159_v48 = vmul.f32 0.125, %v3146_v45  ;;  %v3167_v49 = vmul.f32 %v3095_v44, %v3095_v44  ;;  %v3096_v52 = vmul.f32 0.125, %v3088_v46  ;;  %v3152_v59 = vadd.f32 %v3151_v47, %v3150_v43 }
 0x538   :  { %v3175_v63 = vsub.f32 %v3159_v48, %v3167_v49  ;;  %v3160_v1 = vmul.f32 0.125, %v3152_v59  ;;  %v3168_v5 = vmul.f32 %v3096_v52, %v3096_v52 }
 0x53a   :  { %v3183_v8 = vmax.f32 %v3175_v63, 0.0  ;;  %v3176_v10 = vsub.f32 %v3160_v1, %v3168_v5 }
 0x53c   :  { %v3191_v12 = vadd.f32 0.8, %v3183_v8  ;;  %v3184_v15 = vmax.f32 %v3176_v10, 0.0  ;;  %v3040_v10 = vld [vmem:[#allocation10 + $0x16] sm:$0xff] }
 0x53e   :  { %v3192_v16 = vadd.f32 0.8, %v3184_v15  ;;  %8073 = vrsqrt.f32 %v3191_v12 }
 0x540   :  { %8075 = vrsqrt.f32 %v3192_v16 }
 0x54b   :  { %v8074_v18 = vpop.eup %8073 }
 0x54d   :  { %v8076_v35 = vpop.eup %8075 }
 0x54e   :  { %v3212_v37 = vcombine.low %v8074_v18, %v8076_v35 }
 0x550   :  { %v3240_v20 = vrot.slane %v3212_v37, %v8946_v50 }
 0x552   :  { %v3242_v11 = vcombine.low %v3233_v19, %v3240_v20 }
 0x554   :  { %v3256_v21 = vrot.slane %v3242_v11, %v8946_v50 }
 0x556   :  { %v3257_v25 = vcombine.low %v3249_v13, %v3256_v21 }
 0x558   :  { %v3259_v27 = vmul.f32 %v3257_v25, %v3039_v22 }
 0x55a   :  { %v3264_v28 = vrot.slane %v3259_v27, %v8935_v53  ;;  %v3268_v54 = vrot.slane %v3259_v27, %v8951_v58  ;;  %v3272_v55 = vrot.slane %v3259_v27, %v8994_v60  ;;  %v3276_v57 = vrot.slane %v3259_v27, %v8997_v61 }
 0x55b   :  { %v3280_v29 = vrot.slane %v3259_v27, %v9126_v36  ;;  %v3284_v31 = vrot.slane %v3259_v27, %v9129_v26  ;;  %v3288_v4 = vrot.slane %v3259_v27, %v9132_v2  ;;  %v3292_v23 = vrot.slane %v3259_v27, %v3291_v38 }
 0x55c   :  { %v3301_v7 = vmul.f32 %v3264_v28, %v9050_v33  ;;  %v3302_v51 = vmul.f32 %v3268_v54, %v9054_v41  ;;  %v3303_v24 = vmul.f32 %v3272_v55, %v9070_v30  ;;  %v3304_v39 = vmul.f32 %v3276_v57, %v9074_v34 }
 0x55d   :  { %v3305_v40 = vmul.f32 %v3280_v29, %v9098_v32  ;;  %v3306_v43 = vmul.f32 %v3284_v31, %v9102_v42  ;;  %v3307_v45 = vmul.f32 %v3288_v4, %v3095_v44  ;;  %v3308_v46 = vmul.f32 %v3292_v23, %v3096_v52 }
 0x55e   :  { %v3317_v47 = vcombine.low %v3301_v7, %v3302_v51  ;;  %v3318_v48 = vcombine.low %v3303_v24, %v3304_v39  ;;  %v3368_v49 = vmul.f32 %v3264_v28, %v9038_v6  ;;  %v3369_v59 = vmul.f32 %v3268_v54, %v9043_v14 }
 0x55f   :  { %v3319_v63 = vcombine.low %v3305_v40, %v3306_v43  ;;  %v3320_v33 = vcombine.low %v3307_v45, %v3308_v46  ;;  %v3370_v41 = vmul.f32 %v3272_v55, %v9058_v62  ;;  %v3371_v30 = vmul.f32 %v3276_v57, %v9063_v3 }
 0x560   :  { %v3327_v34 = vrot.slane %v3317_v47, %v8946_v50  ;;  %v3334_v32 = vrot.slane %v3318_v48, %v8946_v50  ;;  %v3372_v42 = vmul.f32 %v3280_v29, %v9086_v0  ;;  %v3373_v44 = vmul.f32 %v3284_v31, %v9091_v9 }
 0x561   :  { %v3341_v52 = vrot.slane %v3319_v63, %v8946_v50  ;;  %v3348_v6 = vrot.slane %v3320_v33, %v8946_v50  ;;  %v3374_v14 = vmul.f32 %v3288_v4, %v9106_v56  ;;  %v3375_v1 = vmul.f32 %v3292_v23, %v9111_v17 }
 0x562   :  { %v3349_v5 = vcombine.low %v3327_v34, %v3334_v32 }
 0x563   :  { %v3350_v62 = vcombine.low %v3341_v52, %v3348_v6 }
 0x564   :  { %v3357_v3 = vrot.slane %v3349_v5, %v8946_v50 }
 0x565   :  { %v3364_v8 = vrot.slane %v3350_v62, %v8946_v50 }
 0x567   :  { %v3365_v12 = vcombine.low %v3357_v3, %v3364_v8 }
 0x569   :  { %v3367_v15 = vsub.f32 %v3040_v10, %v3365_v12 }
 0x56b   :  { %v3380_v0 = vrot.slane %v3367_v15, %v8935_v53  ;;  %v3384_v9 = vrot.slane %v3367_v15, %v8951_v58  ;;  %v3388_v16 = vrot.slane %v3367_v15, %v8994_v60  ;;  %v3392_v18 = vrot.slane %v3367_v15, %v8997_v61 }
 0x56c   :  { %v3396_v56 = vrot.slane %v3367_v15, %v9126_v36  ;;  %v3400_v17 = vrot.slane %v3367_v15, %v9129_v26  ;;  %v3404_v35 = vrot.slane %v3367_v15, %v9132_v2  ;;  %v3408_v37 = vrot.slane %v3367_v15, %v3291_v38 }
 0x56d   :  { %v3417_v19 = vadd.f32 %v3380_v0, %v3368_v49  ;;  %v3418_v50 = vadd.f32 %v3384_v9, %v3369_v59  ;;  %v3419_v20 = vadd.f32 %v3388_v16, %v3370_v41  ;;  %v3420_v11 = vadd.f32 %v3392_v18, %v3371_v30 }
 0x56e   :  { %v3421_v13 = vadd.f32 %v3396_v56, %v3372_v42  ;;  %v3422_v21 = vadd.f32 %v3400_v17, %v3373_v44  ;;  %v3423_v22 = vadd.f32 %v3404_v35, %v3374_v14  ;;  %v3424_v25 = vadd.f32 %v3408_v37, %v3375_v1 }
 0x56f   :  { %v3425_v27 = vmul.f32 0.2, %v3417_v19  ;;  %v3426_v28 = vmul.f32 0.2, %v3418_v50  ;;  %v3427_v54 = vmul.f32 0.2, %v3419_v20 }
 0x570   :  { %v3428_v55 = vmul.f32 0.2, %v3420_v11  ;;  %v3429_v57 = vmul.f32 0.2, %v3421_v13  ;;  %v3430_v29 = vmul.f32 0.2, %v3422_v21 }
 0x571   :  { %v3431_v31 = vmul.f32 0.2, %v3423_v22  ;;  %v3432_v4 = vmul.f32 0.2, %v3424_v25  ;;  %v3433_v23 = vmax.f32 %v3417_v19, %v3425_v27  ;;  %v3434_v7 = vmax.f32 %v3418_v50, %v3426_v28 }
 0x572   :  { %v3435_v51 = vmax.f32 %v3419_v20, %v3427_v54  ;;  %v3436_v38 = vmax.f32 %v3420_v11, %v3428_v55  ;;  %v3437_v24 = vmax.f32 %v3421_v13, %v3429_v57  ;;  %v3438_v39 = vmax.f32 %v3422_v21, %v3430_v29 }
 0x573   :  { %v3439_v40 = vmax.f32 %v3423_v22, %v3431_v31  ;;  %v3440_v43 = vmax.f32 %v3424_v25, %v3432_v4  ;;  %v9169_v45 = vpack.c.bf16 %v3433_v23, %v3433_v23  ;;  %v9171_v46 = vpack.c.bf16 %v3434_v7, %v3434_v7 }
 0x574   :  { %v9173_v47 = vpack.c.bf16 %v3435_v51, %v3435_v51  ;;  %v9175_v48 = vpack.c.bf16 %v3436_v38, %v3436_v38  ;;  %v9177_v49 = vpack.c.bf16 %v3437_v24, %v3437_v24  ;;  %v9179_v59 = vpack.c.bf16 %v3438_v39, %v3438_v39 }
 0x575   :  { %v9181_v63 = vpack.c.bf16 %v3439_v40, %v3439_v40  ;;  %v9183_v33 = vpack.c.bf16 %v3440_v43, %v3440_v43 }
 0x576   :  { %8859 = dma.done.wait [#allocation4 + $0x1], 57344 }
 0x577   :  { %8860 = vsyncadd [#allocation4 + $0x1], 4294909952  ;;  %6338 = vmatprep.mubr.bf16.mxu0 %v9171_v46  ;;  %6379 = vmatprep.mubr.bf16.mxu1 %v9175_v48  ;;  %v8077_v41 = vld [vmem:[#allocation3 + $0x18c] ss:$28 sps:$4 sm:$0xff]   ;;  %v8083_v42 = vld [vmem:[#allocation3 + $0x154] ss:$28 sps:$4 sm:$0xff]  }
 0x578   :  { %v8079_v30 = vld [vmem:[#allocation3 + $0x50c] ss:$28 sps:$4 sm:$0xff]   ;;  %6306 = vmatprep.subr.bf16.mxu0 %v8077_v41  ;;  %v8085_v44 = vld [vmem:[#allocation3 + $0x4d4] ss:$28 sps:$4 sm:$0xff]   ;;  %v8089_v14 = vld [vmem:[#allocation3 + $0x11c] ss:$28 sps:$4 sm:$0xff]  }
 0x579   :  { %v8081_v34 = vld [vmem:[#allocation3 + $0x188] ss:$28 sps:$4 sm:$0xff]   ;;  %6347 = vmatprep.subr.bf16.mxu1 %v8079_v30  ;;  %v8087_v52 = vld [vmem:[#allocation3 + $0x150] ss:$28 sps:$4 sm:$0xff]   ;;  %v8091_v1 = vld [vmem:[#allocation3 + $0x49c] ss:$28 sps:$4 sm:$0xff]  }
 0x57a   :  { %v8082_v32 = vld [vmem:[#allocation3 + $0x508] ss:$28 sps:$4 sm:$0xff]   ;;  %6307 = vmatpush1.bf16.msra.mxu0 %v8081_v34  ;;  %v8088_v6 = vld [vmem:[#allocation3 + $0x4d0] ss:$28 sps:$4 sm:$0xff]   ;;  %v8093_v5 = vld [vmem:[#allocation3 + $0x118] ss:$28 sps:$4 sm:$0xff]  }
 0x57b   :  { %6348 = vmatpush1.bf16.msra.mxu1 %v8082_v32  ;;  %6308 = vmatprep.subr.bf16.mxu0 %v8083_v42  ;;  %v8094_v62 = vld [vmem:[#allocation3 + $0x498] ss:$28 sps:$4 sm:$0xff]   ;;  %v8095_v3 = vld [vmem:[#allocation3 + $0xe4] ss:$28 sps:$4 sm:$0xff]   ;;  %v8101_v15 = vld [vmem:[#allocation3 + $0xac] ss:$28 sps:$4 sm:$0xff]  }
 0x57c   :  { %6349 = vmatprep.subr.bf16.mxu1 %v8085_v44  ;;  %v8097_v8 = vld [vmem:[#allocation3 + $0x464] ss:$28 sps:$4 sm:$0xff]   ;;  %v8103_v0 = vld [vmem:[#allocation3 + $0x42c] ss:$28 sps:$4 sm:$0xff]   ;;  %v8107_v18 = vld [vmem:[#allocation3 + $0x74] ss:$28 sps:$4 sm:$0xff]  }
 0x57d   :  { %v8099_v10 = vld [vmem:[#allocation3 + $0xe0] ss:$28 sps:$4 sm:$0xff]   ;;  %v8105_v9 = vld [vmem:[#allocation3 + $0xa8] ss:$28 sps:$4 sm:$0xff]   ;;  %v8109_v56 = vld [vmem:[#allocation3 + $0x3f4] ss:$28 sps:$4 sm:$0xff]  }
 0x57e   :  { %6309 = vmatpush1.bf16.msra.mxu0 %v8087_v52  ;;  %v8100_v12 = vld [vmem:[#allocation3 + $0x460] ss:$28 sps:$4 sm:$0xff]   ;;  %v8106_v16 = vld [vmem:[#allocation3 + $0x428] ss:$28 sps:$4 sm:$0xff]   ;;  %v8111_v17 = vld [vmem:[#allocation3 + $0x70] ss:$28 sps:$4 sm:$0xff]  }
 0x57f   :  { %6350 = vmatpush1.bf16.msra.mxu1 %v8088_v6  ;;  %6310 = vmatprep.subr.bf16.mxu0 %v8089_v14  ;;  %v8112_v35 = vld [vmem:[#allocation3 + $0x3f0] ss:$28 sps:$4 sm:$0xff]   ;;  %v8113_v37 = vld [vmem:[#allocation3 + $0x3c] ss:$28 sps:$4 sm:$0xff]   ;;  %v8119_v11 = vld [vmem:[#allocation3 + $0x4] ss:$28 sps:$4 sm:$0xff]  }
 0x580   :  { %6351 = vmatprep.subr.bf16.mxu1 %v8091_v1  ;;  %v8115_v19 = vld [vmem:[#allocation3 + $0x3bc] ss:$28 sps:$4 sm:$0xff]   ;;  %v8121_v13 = vld [vmem:[#allocation3 + $0x384] ss:$28 sps:$4 sm:$0xff]   ;;  %v8125_v25 = vld [vmem:[#allocation3 + $0x34c] ss:$28 sps:$4 sm:$0xff]  }
 0x581   :  { %v8117_v50 = vld [vmem:[#allocation3 + $0x38] ss:$28 sps:$4 sm:$0xff]   ;;  %v8123_v21 = vld [vmem:[#allocation3] ss:$28 sps:$4 sm:$0xff]   ;;  %v8127_v27 = vld [vmem:[#allocation3 + $0x6cc] ss:$28 sps:$4 sm:$0xff]  }
 0x582   :  { %6311 = vmatpush1.bf16.msra.mxu0 %v8093_v5  ;;  %v8118_v20 = vld [vmem:[#allocation3 + $0x3b8] ss:$28 sps:$4 sm:$0xff]   ;;  %v8124_v22 = vld [vmem:[#allocation3 + $0x380] ss:$28 sps:$4 sm:$0xff]   ;;  %v8129_v28 = vld [vmem:[#allocation3 + $0x348] ss:$28 sps:$4 sm:$0xff]  }
 0x583   :  { %6352 = vmatpush1.bf16.msra.mxu1 %v8094_v62  ;;  %6312 = vmatprep.subr.bf16.mxu0 %v8095_v3  ;;  %v8130_v54 = vld [vmem:[#allocation3 + $0x6c8] ss:$28 sps:$4 sm:$0xff]   ;;  %v8131_v55 = vld [vmem:[#allocation3 + $0x314] ss:$28 sps:$4 sm:$0xff]   ;;  %v8137_v4 = vld [vmem:[#allocation3 + $0x2dc] ss:$28 sps:$4 sm:$0xff]  }
 0x584   :  { %6353 = vmatprep.subr.bf16.mxu1 %v8097_v8  ;;  %v8133_v57 = vld [vmem:[#allocation3 + $0x694] ss:$28 sps:$4 sm:$0xff]   ;;  %v8139_v23 = vld [vmem:[#allocation3 + $0x65c] ss:$28 sps:$4 sm:$0xff]   ;;  %v8143_v38 = vld [vmem:[#allocation3 + $0x2a4] ss:$28 sps:$4 sm:$0xff]  }
 0x585   :  { %v8135_v29 = vld [vmem:[#allocation3 + $0x310] ss:$28 sps:$4 sm:$0xff]   ;;  %v8141_v7 = vld [vmem:[#allocation3 + $0x2d8] ss:$28 sps:$4 sm:$0xff]   ;;  %v8145_v24 = vld [vmem:[#allocation3 + $0x624] ss:$28 sps:$4 sm:$0xff]  }
 0x586   :  { %6313 = vmatpush1.bf16.msra.mxu0 %v8099_v10  ;;  %v8136_v31 = vld [vmem:[#allocation3 + $0x690] ss:$28 sps:$4 sm:$0xff]   ;;  %v8142_v51 = vld [vmem:[#allocation3 + $0x658] ss:$28 sps:$4 sm:$0xff]   ;;  %v8147_v39 = vld [vmem:[#allocation3 + $0x2a0] ss:$28 sps:$4 sm:$0xff]  }
 0x587   :  { %6354 = vmatpush1.bf16.msra.mxu1 %v8100_v12  ;;  %6314 = vmatprep.subr.bf16.mxu0 %v8101_v15  ;;  %v8148_v40 = vld [vmem:[#allocation3 + $0x620] ss:$28 sps:$4 sm:$0xff]   ;;  %v8149_v43 = vld [vmem:[#allocation3 + $0x26c] ss:$28 sps:$4 sm:$0xff]   ;;  %v8155_v32 = vld [vmem:[#allocation3 + $0x234] ss:$28 sps:$4 sm:$0xff]  }
 0x588   :  { %6355 = vmatprep.subr.bf16.mxu1 %v8103_v0  ;;  %v8151_v41 = vld [vmem:[#allocation3 + $0x5ec] ss:$28 sps:$4 sm:$0xff]   ;;  %v8157_v42 = vld [vmem:[#allocation3 + $0x5b4] ss:$28 sps:$4 sm:$0xff]   ;;  %v8161_v6 = vld [vmem:[#allocation3 + $0x1fc] ss:$28 sps:$4 sm:$0xff]  }
 0x589   :  { %v8153_v30 = vld [vmem:[#allocation3 + $0x268] ss:$28 sps:$4 sm:$0xff]   ;;  %v8159_v44 = vld [vmem:[#allocation3 + $0x230] ss:$28 sps:$4 sm:$0xff]   ;;  %v8163_v14 = vld [vmem:[#allocation3 + $0x57c] ss:$28 sps:$4 sm:$0xff]  }
 0x58a   :  { %6315 = vmatpush1.bf16.msra.mxu0 %v8105_v9  ;;  %v8154_v34 = vld [vmem:[#allocation3 + $0x5e8] ss:$28 sps:$4 sm:$0xff]   ;;  %v8160_v52 = vld [vmem:[#allocation3 + $0x5b0] ss:$28 sps:$4 sm:$0xff]   ;;  %v8165_v1 = vld [vmem:[#allocation3 + $0x1f8] ss:$28 sps:$4 sm:$0xff]  }
 0x58b   :  { %6356 = vmatpush1.bf16.msra.mxu1 %v8106_v16  ;;  %6316 = vmatprep.subr.bf16.mxu0 %v8107_v18  ;;  %v8166_v5 = vld [vmem:[#allocation3 + $0x578] ss:$28 sps:$4 sm:$0xff]   ;;  %v8167_v62 = vld [vmem:[#allocation3 + $0x1c4] ss:$28 sps:$4 sm:$0xff]   ;;  %v8175_v12 = vld [vmem:[#allocation3 + $0x88c] ss:$28 sps:$4 sm:$0xff]  }
 0x58c   :  { %6357 = vmatprep.subr.bf16.mxu1 %v8109_v56  ;;  %v8169_v3 = vld [vmem:[#allocation3 + $0x544] ss:$28 sps:$4 sm:$0xff]   ;;  %v8178_v15 = vld [vmem:[#allocation3 + $0xc0c] ss:$28 sps:$4 sm:$0xff]   ;;  %v8181_v16 = vld [vmem:[#allocation3 + $0x854] ss:$28 sps:$4 sm:$0xff]  }
 0x58d   :  { %v8171_v8 = vld [vmem:[#allocation3 + $0x1c0] ss:$28 sps:$4 sm:$0xff]   ;;  %v8173_v0 = vld [vmem:[#allocation3 + $0x888] ss:$28 sps:$4 sm:$0xff]   ;;  %v8184_v18 = vld [vmem:[#allocation3 + $0xbd4] ss:$28 sps:$4 sm:$0xff]  }
 0x58e   :  { %6317 = vmatpush1.bf16.msra.mxu0 %v8111_v17  ;;  %v8172_v10 = vld [vmem:[#allocation3 + $0x540] ss:$28 sps:$4 sm:$0xff]   ;;  %v8176_v9 = vld [vmem:[#allocation3 + $0xc08] ss:$28 sps:$4 sm:$0xff]   ;;  %v8179_v56 = vld [vmem:[#allocation3 + $0x850] ss:$28 sps:$4 sm:$0xff]  }
 0x58f   :  { %6358 = vmatpush1.bf16.msra.mxu1 %v8112_v35  ;;  %6318 = vmatprep.subr.bf16.mxu0 %v8113_v37  ;;  %v8182_v17 = vld [vmem:[#allocation3 + $0xbd0] ss:$28 sps:$4 sm:$0xff]   ;;  %v8187_v35 = vld [vmem:[#allocation3 + $0x81c] ss:$28 sps:$4 sm:$0xff]  }
 0x590   :  { %6359 = vmatprep.subr.bf16.mxu1 %v8115_v19  ;;  %v8190_v37 = vld [vmem:[#allocation3 + $0xb9c] ss:$28 sps:$4 sm:$0xff]  }
 0x591   :  { %v8185_v19 = vld [vmem:[#allocation3 + $0x818] ss:$28 sps:$4 sm:$0xff]  }
 0x592   :  { %6319 = vmatpush1.bf16.msra.mxu0 %v8117_v50  ;;  %v8188_v50 = vld [vmem:[#allocation3 + $0xb98] ss:$28 sps:$4 sm:$0xff]  }
 0x593   :  { %6360 = vmatpush1.bf16.msra.mxu1 %v8118_v20  ;;  %6320 = vmatprep.subr.bf16.mxu0 %v8119_v11  ;;  %v8193_v20 = vld [vmem:[#allocation3 + $0x7e4] ss:$28 sps:$4 sm:$0xff]  }
 0x594   :  { %6361 = vmatprep.subr.bf16.mxu1 %v8121_v13  ;;  %v8196_v11 = vld [vmem:[#allocation3 + $0xb64] ss:$28 sps:$4 sm:$0xff]  }
 0x595   :  { %v8191_v13 = vld [vmem:[#allocation3 + $0x7e0] ss:$28 sps:$4 sm:$0xff]  }
 0x596   :  { %6321 = vmatpush1.bf16.msra.mxu0 %v8123_v21  ;;  %v8194_v21 = vld [vmem:[#allocation3 + $0xb60] ss:$28 sps:$4 sm:$0xff]  }
 0x597   :  { %6362 = vmatpush1.bf16.msra.mxu1 %v8124_v22  ;;  %6322 = vmatprep.subr.bf16.mxu0 %v8125_v25  ;;  %v8199_v22 = vld [vmem:[#allocation3 + $0x7ac] ss:$28 sps:$4 sm:$0xff]  }
 0x598   :  { %6363 = vmatprep.subr.bf16.mxu1 %v8127_v27  ;;  %v8202_v25 = vld [vmem:[#allocation3 + $0xb2c] ss:$28 sps:$4 sm:$0xff]  }
 0x599   :  { %v8197_v27 = vld [vmem:[#allocation3 + $0x7a8] ss:$28 sps:$4 sm:$0xff]  }
 0x59a   :  { %6323 = vmatpush2.bf16.msra.mxu0 %v8129_v28  ;;  %v8200_v28 = vld [vmem:[#allocation3 + $0xb28] ss:$28 sps:$4 sm:$0xff]  }
 0x59b   :  { %6364 = vmatpush2.bf16.msra.mxu1 %v8130_v54  ;;  %6324 = vmatprep.subr.bf16.mxu0 %v8131_v55  ;;  %v8205_v54 = vld [vmem:[#allocation3 + $0x774] ss:$28 sps:$4 sm:$0xff]  }
 0x59c   :  { %6365 = vmatprep.subr.bf16.mxu1 %v8133_v57  ;;  %v8208_v55 = vld [vmem:[#allocation3 + $0xaf4] ss:$28 sps:$4 sm:$0xff]  }
 0x59d   :  { %v8203_v57 = vld [vmem:[#allocation3 + $0x770] ss:$28 sps:$4 sm:$0xff]  }
 0x59e   :  { %6325 = vmatpush2.bf16.msra.mxu0 %v8135_v29  ;;  %v8206_v29 = vld [vmem:[#allocation3 + $0xaf0] ss:$28 sps:$4 sm:$0xff]  }
 0x59f   :  { %6366 = vmatpush2.bf16.msra.mxu1 %v8136_v31  ;;  %6326 = vmatprep.subr.bf16.mxu0 %v8137_v4  ;;  %v8211_v31 = vld [vmem:[#allocation3 + $0x73c] ss:$28 sps:$4 sm:$0xff]  }
 0x5a0   :  { %6367 = vmatprep.subr.bf16.mxu1 %v8139_v23  ;;  %v8214_v4 = vld [vmem:[#allocation3 + $0xabc] ss:$28 sps:$4 sm:$0xff]  }
 0x5a1   :  { %v8209_v23 = vld [vmem:[#allocation3 + $0x738] ss:$28 sps:$4 sm:$0xff]  }
 0x5a2   :  { %6327 = vmatpush2.bf16.msra.mxu0 %v8141_v7  ;;  %v8212_v7 = vld [vmem:[#allocation3 + $0xab8] ss:$28 sps:$4 sm:$0xff]  }
 0x5a3   :  { %6368 = vmatpush2.bf16.msra.mxu1 %v8142_v51  ;;  %6328 = vmatprep.subr.bf16.mxu0 %v8143_v38  ;;  %v8217_v51 = vld [vmem:[#allocation3 + $0x704] ss:$28 sps:$4 sm:$0xff]  }
 0x5a4   :  { %6369 = vmatprep.subr.bf16.mxu1 %v8145_v24  ;;  %v8220_v38 = vld [vmem:[#allocation3 + $0xa84] ss:$28 sps:$4 sm:$0xff]  }
 0x5a5   :  { %v8215_v24 = vld [vmem:[#allocation3 + $0x700] ss:$28 sps:$4 sm:$0xff]  }
 0x5a6   :  { %6329 = vmatpush2.bf16.msra.mxu0 %v8147_v39  ;;  %v8218_v39 = vld [vmem:[#allocation3 + $0xa80] ss:$28 sps:$4 sm:$0xff]  }
 0x5a7   :  { %6370 = vmatpush2.bf16.msra.mxu1 %v8148_v40  ;;  %6330 = vmatprep.subr.bf16.mxu0 %v8149_v43  ;;  %v8223_v40 = vld [vmem:[#allocation3 + $0xa4c] ss:$28 sps:$4 sm:$0xff]  }
 0x5a8   :  { %6371 = vmatprep.subr.bf16.mxu1 %v8151_v41  ;;  %v8226_v43 = vld [vmem:[#allocation3 + $0xdcc] ss:$28 sps:$4 sm:$0xff]  }
 0x5a9   :  { %v8221_v41 = vld [vmem:[#allocation3 + $0xa48] ss:$28 sps:$4 sm:$0xff]  }
 0x5aa   :  { %6331 = vmatpush2.bf16.msra.mxu0 %v8153_v30  ;;  %v8224_v30 = vld [vmem:[#allocation3 + $0xdc8] ss:$28 sps:$4 sm:$0xff]  }
 0x5ab   :  { %6372 = vmatpush2.bf16.msra.mxu1 %v8154_v34  ;;  %6332 = vmatprep.subr.bf16.mxu0 %v8155_v32  ;;  %v8229_v34 = vld [vmem:[#allocation3 + $0xa14] ss:$28 sps:$4 sm:$0xff]  }
 0x5ac   :  { %6373 = vmatprep.subr.bf16.mxu1 %v8157_v42  ;;  %v8232_v32 = vld [vmem:[#allocation3 + $0xd94] ss:$28 sps:$4 sm:$0xff]  }
 0x5ad   :  { %v8227_v42 = vld [vmem:[#allocation3 + $0xa10] ss:$28 sps:$4 sm:$0xff]  }
 0x5ae   :  { %6333 = vmatpush2.bf16.msra.mxu0 %v8159_v44  ;;  %v8230_v44 = vld [vmem:[#allocation3 + $0xd90] ss:$28 sps:$4 sm:$0xff]  }
 0x5af   :  { %6374 = vmatpush2.bf16.msra.mxu1 %v8160_v52  ;;  %6334 = vmatprep.subr.bf16.mxu0 %v8161_v6  ;;  %v8235_v52 = vld [vmem:[#allocation3 + $0x9dc] ss:$28 sps:$4 sm:$0xff]  }
 0x5b0   :  { %6375 = vmatprep.subr.bf16.mxu1 %v8163_v14  ;;  %v8238_v6 = vld [vmem:[#allocation3 + $0xd5c] ss:$28 sps:$4 sm:$0xff]  }
 0x5b1   :  { %v8233_v14 = vld [vmem:[#allocation3 + $0x9d8] ss:$28 sps:$4 sm:$0xff]  }
 0x5b2   :  { %6335 = vmatpush2.bf16.msra.mxu0 %v8165_v1  ;;  %v8236_v1 = vld [vmem:[#allocation3 + $0xd58] ss:$28 sps:$4 sm:$0xff]  }
 0x5b3   :  { %6376 = vmatpush2.bf16.msra.mxu1 %v8166_v5  ;;  %6336 = vmatprep.subr.bf16.mxu0 %v8167_v62  ;;  %v8241_v5 = vld [vmem:[#allocation3 + $0x9a4] ss:$28 sps:$4 sm:$0xff]  }
 0x5b4   :  { %6377 = vmatprep.subr.bf16.mxu1 %v8169_v3  ;;  %v8244_v62 = vld [vmem:[#allocation3 + $0xd24] ss:$28 sps:$4 sm:$0xff]  }
 0x5b5   :  { %v8239_v3 = vld [vmem:[#allocation3 + $0x9a0] ss:$28 sps:$4 sm:$0xff]  }
 0x5b6   :  { %6337 = vmatpush2.bf16.msra.mxu0 %v8171_v8  ;;  %v8242_v8 = vld [vmem:[#allocation3 + $0xd20] ss:$28 sps:$4 sm:$0xff]  }
 0x5b7   :  { %6378 = vmatpush2.bf16.msra.mxu1 %v8172_v10  ;;  %6388 = vmatprep.subr.bf16.mxu0 %v8175_v12  ;;  %v8247_v10 = vld [vmem:[#allocation3 + $0x96c] ss:$28 sps:$4 sm:$0xff]  }
 0x5b8   :  { %6429 = vmatprep.subr.bf16.mxu1 %v8178_v15  ;;  %v8250_v12 = vld [vmem:[#allocation3 + $0xcec] ss:$28 sps:$4 sm:$0xff]  }
 0x5b9   :  { %6339 = vmatmul.mubr.bf16.vlgmr.msra.gmra.mxu0 %v9169_v45  ;;  %v8245_v15 = vld [vmem:[#allocation3 + $0x968] ss:$28 sps:$4 sm:$0xff]  }
 0x5ba   :  { %6380 = vmatmul.mubr.bf16.vlgmr.msra.gmra.mxu1 %v9173_v47  ;;  %6389 = vmatpush1.bf16.msra.mxu0 %v8173_v0  ;;  %v8248_v0 = vld [vmem:[#allocation3 + $0xce8] ss:$28 sps:$4 sm:$0xff]  }
 0x5bb   :  { %6430 = vmatpush1.bf16.msra.mxu1 %v8176_v9  ;;  %6390 = vmatprep.subr.bf16.mxu0 %v8181_v16  ;;  %v8253_v9 = vld [vmem:[#allocation3 + $0x934] ss:$28 sps:$4 sm:$0xff]  }
 0x5bc   :  { %6431 = vmatprep.subr.bf16.mxu1 %v8184_v18  ;;  %6420 = vmatprep.mubr.bf16.mxu0 %v9179_v59  ;;  %v8256_v16 = vld [vmem:[#allocation3 + $0xcb4] ss:$28 sps:$4 sm:$0xff]  }
 0x5bd   :  { %6461 = vmatprep.mubr.bf16.mxu1 %v9183_v33  ;;  %v8251_v18 = vld [vmem:[#allocation3 + $0x930] ss:$28 sps:$4 sm:$0xff]  }
 0x5be   :  { %6391 = vmatpush1.bf16.msra.mxu0 %v8179_v56  ;;  %v8254_v56 = vld [vmem:[#allocation3 + $0xcb0] ss:$28 sps:$4 sm:$0xff]  }
 0x5bf   :  { %6432 = vmatpush1.bf16.msra.mxu1 %v8182_v17  ;;  %6392 = vmatprep.subr.bf16.mxu0 %v8187_v35  ;;  %v8259_v17 = vld [vmem:[#allocation3 + $0x8fc] ss:$28 sps:$4 sm:$0xff]  }
 0x5c0   :  { %6433 = vmatprep.subr.bf16.mxu1 %v8190_v37  ;;  %v8262_v35 = vld [vmem:[#allocation3 + $0xc7c] ss:$28 sps:$4 sm:$0xff]  }
 0x5c1   :  { %v8257_v37 = vld [vmem:[#allocation3 + $0x8f8] ss:$28 sps:$4 sm:$0xff]  }
 0x5c2   :  { %6393 = vmatpush1.bf16.msra.mxu0 %v8185_v19  ;;  %v8260_v19 = vld [vmem:[#allocation3 + $0xc78] ss:$28 sps:$4 sm:$0xff]  }
 0x5c3   :  { %6434 = vmatpush1.bf16.msra.mxu1 %v8188_v50  ;;  %6394 = vmatprep.subr.bf16.mxu0 %v8193_v20  ;;  %v8265_v50 = vld [vmem:[#allocation3 + $0x8c4] ss:$28 sps:$4 sm:$0xff]  }
 0x5c4   :  { %6435 = vmatprep.subr.bf16.mxu1 %v8196_v11  ;;  %v8268_v20 = vld [vmem:[#allocation3 + $0xc44] ss:$28 sps:$4 sm:$0xff]  }
 0x5c5   :  { %v8263_v11 = vld [vmem:[#allocation3 + $0x8c0] ss:$28 sps:$4 sm:$0xff]  }
 0x5c6   :  { %6395 = vmatpush1.bf16.msra.mxu0 %v8191_v13  ;;  %v8266_v13 = vld [vmem:[#allocation3 + $0xc40] ss:$28 sps:$4 sm:$0xff]  }
 0x5c7   :  { %6436 = vmatpush1.bf16.msra.mxu1 %v8194_v21  ;;  %6396 = vmatprep.subr.bf16.mxu0 %v8199_v22  ;;  %v8271_v21 = vld [vmem:[#allocation3 + $0x194] ss:$28 sps:$4 sm:$0xff]  }
 0x5c8   :  { %6437 = vmatprep.subr.bf16.mxu1 %v8202_v25  ;;  %v8274_v22 = vld [vmem:[#allocation3 + $0x514] ss:$28 sps:$4 sm:$0xff]  }
 0x5c9   :  { %v8269_v25 = vld [vmem:[#allocation3 + $0x190] ss:$28 sps:$4 sm:$0xff]  }
 0x5ca   :  { %6397 = vmatpush1.bf16.msra.mxu0 %v8197_v27  ;;  %v8272_v27 = vld [vmem:[#allocation3 + $0x510] ss:$28 sps:$4 sm:$0xff]  }
 0x5cb   :  { %6438 = vmatpush1.bf16.msra.mxu1 %v8200_v28  ;;  %6398 = vmatprep.subr.bf16.mxu0 %v8205_v54  ;;  %v8277_v28 = vld [vmem:[#allocation3 + $0x15c] ss:$28 sps:$4 sm:$0xff]  }
 0x5cc   :  { %6439 = vmatprep.subr.bf16.mxu1 %v8208_v55  ;;  %v8280_v54 = vld [vmem:[#allocation3 + $0x4dc] ss:$28 sps:$4 sm:$0xff]  }
 0x5cd   :  { %v8275_v55 = vld [vmem:[#allocation3 + $0x158] ss:$28 sps:$4 sm:$0xff]  }
 0x5ce   :  { %6399 = vmatpush1.bf16.msra.mxu0 %v8203_v57  ;;  %v8278_v57 = vld [vmem:[#allocation3 + $0x4d8] ss:$28 sps:$4 sm:$0xff]  }
 0x5cf   :  { %6440 = vmatpush1.bf16.msra.mxu1 %v8206_v29  ;;  %6400 = vmatprep.subr.bf16.mxu0 %v8211_v31  ;;  %v8283_v29 = vld [vmem:[#allocation3 + $0x124] ss:$28 sps:$4 sm:$0xff]  }
 0x5d0   :  { %6441 = vmatprep.subr.bf16.mxu1 %v8214_v4  ;;  %v8286_v31 = vld [vmem:[#allocation3 + $0x4a4] ss:$28 sps:$4 sm:$0xff]  }
 0x5d1   :  { %v8281_v4 = vld [vmem:[#allocation3 + $0x120] ss:$28 sps:$4 sm:$0xff]  }
 0x5d2   :  { %6401 = vmatpush1.bf16.msra.mxu0 %v8209_v23  ;;  %v8284_v23 = vld [vmem:[#allocation3 + $0x4a0] ss:$28 sps:$4 sm:$0xff]  }
 0x5d3   :  { %6442 = vmatpush1.bf16.msra.mxu1 %v8212_v7  ;;  %6402 = vmatprep.subr.bf16.mxu0 %v8217_v51  ;;  %v8289_v7 = vld [vmem:[#allocation3 + $0xec] ss:$28 sps:$4 sm:$0xff]  }
 0x5d4   :  { %6443 = vmatprep.subr.bf16.mxu1 %v8220_v38  ;;  %v8292_v51 = vld [vmem:[#allocation3 + $0x46c] ss:$28 sps:$4 sm:$0xff]  }
 0x5d5   :  { %v8287_v38 = vld [vmem:[#allocation3 + $0xe8] ss:$28 sps:$4 sm:$0xff]  }
 0x5d6   :  { %6403 = vmatpush1.bf16.msra.mxu0 %v8215_v24  ;;  %v8290_v24 = vld [vmem:[#allocation3 + $0x468] ss:$28 sps:$4 sm:$0xff]  }
 0x5d7   :  { %6444 = vmatpush1.bf16.msra.mxu1 %v8218_v39  ;;  %6404 = vmatprep.subr.bf16.mxu0 %v8223_v40  ;;  %v8295_v39 = vld [vmem:[#allocation3 + $0xb4] ss:$28 sps:$4 sm:$0xff]  }
 0x5d8   :  { %6445 = vmatprep.subr.bf16.mxu1 %v8226_v43  ;;  %v8298_v40 = vld [vmem:[#allocation3 + $0x434] ss:$28 sps:$4 sm:$0xff]  }
 0x5d9   :  { %v8293_v43 = vld [vmem:[#allocation3 + $0xb0] ss:$28 sps:$4 sm:$0xff]  }
 0x5da   :  { %6405 = vmatpush2.bf16.msra.mxu0 %v8221_v41  ;;  %v8296_v41 = vld [vmem:[#allocation3 + $0x430] ss:$28 sps:$4 sm:$0xff]  }
 0x5db   :  { %6446 = vmatpush2.bf16.msra.mxu1 %v8224_v30  ;;  %6406 = vmatprep.subr.bf16.mxu0 %v8229_v34  ;;  %v8301_v30 = vld [vmem:[#allocation3 + $0x7c] ss:$28 sps:$4 sm:$0xff]  }
 0x5dc   :  { %6447 = vmatprep.subr.bf16.mxu1 %v8232_v32  ;;  %v8304_v34 = vld [vmem:[#allocation3 + $0x3fc] ss:$28 sps:$4 sm:$0xff]  }
 0x5dd   :  { %v8299_v32 = vld [vmem:[#allocation3 + $0x78] ss:$28 sps:$4 sm:$0xff]  }
 0x5de   :  { %6407 = vmatpush2.bf16.msra.mxu0 %v8227_v42  ;;  %v8302_v42 = vld [vmem:[#allocation3 + $0x3f8] ss:$28 sps:$4 sm:$0xff]  }
 0x5df   :  { %6448 = vmatpush2.bf16.msra.mxu1 %v8230_v44  ;;  %6408 = vmatprep.subr.bf16.mxu0 %v8235_v52  ;;  %v8307_v44 = vld [vmem:[#allocation3 + $0x44] ss:$28 sps:$4 sm:$0xff]  }
 0x5e0   :  { %6449 = vmatprep.subr.bf16.mxu1 %v8238_v6  ;;  %v8310_v52 = vld [vmem:[#allocation3 + $0x3c4] ss:$28 sps:$4 sm:$0xff]  }
 0x5e1   :  { %v8305_v6 = vld [vmem:[#allocation3 + $0x40] ss:$28 sps:$4 sm:$0xff]  }
 0x5e2   :  { %6409 = vmatpush2.bf16.msra.mxu0 %v8233_v14  ;;  %v8308_v14 = vld [vmem:[#allocation3 + $0x3c0] ss:$28 sps:$4 sm:$0xff]  }
 0x5e3   :  { %6450 = vmatpush2.bf16.msra.mxu1 %v8236_v1  ;;  %6410 = vmatprep.subr.bf16.mxu0 %v8241_v5  ;;  %v8313_v1 = vld [vmem:[#allocation3 + $0xc] ss:$28 sps:$4 sm:$0xff]  }
 0x5e4   :  { %6451 = vmatprep.subr.bf16.mxu1 %v8244_v62  ;;  %v8316_v5 = vld [vmem:[#allocation3 + $0x38c] ss:$28 sps:$4 sm:$0xff]  }
 0x5e5   :  { %v8311_v62 = vld [vmem:[#allocation3 + $0x8] ss:$28 sps:$4 sm:$0xff]  }
 0x5e6   :  { %6411 = vmatpush2.bf16.msra.mxu0 %v8239_v3  ;;  %v8314_v3 = vld [vmem:[#allocation3 + $0x388] ss:$28 sps:$4 sm:$0xff]  }
 0x5e7   :  { %6452 = vmatpush2.bf16.msra.mxu1 %v8242_v8  ;;  %6412 = vmatprep.subr.bf16.mxu0 %v8247_v10  ;;  %v8319_v8 = vld [vmem:[#allocation3 + $0x354] ss:$28 sps:$4 sm:$0xff]  }
 0x5e8   :  { %6453 = vmatprep.subr.bf16.mxu1 %v8250_v12  ;;  %v8322_v10 = vld [vmem:[#allocation3 + $0x6d4] ss:$28 sps:$4 sm:$0xff]  }
 0x5e9   :  { %v8317_v12 = vld [vmem:[#allocation3 + $0x350] ss:$28 sps:$4 sm:$0xff]  }
 0x5ea   :  { %6413 = vmatpush2.bf16.msra.mxu0 %v8245_v15  ;;  %v8320_v15 = vld [vmem:[#allocation3 + $0x6d0] ss:$28 sps:$4 sm:$0xff]  }
 0x5eb   :  { %6454 = vmatpush2.bf16.msra.mxu1 %v8248_v0  ;;  %6414 = vmatprep.subr.bf16.mxu0 %v8253_v9  ;;  %v8325_v0 = vld [vmem:[#allocation3 + $0x31c] ss:$28 sps:$4 sm:$0xff]  }
 0x5ec   :  { %6455 = vmatprep.subr.bf16.mxu1 %v8256_v16  ;;  %v8328_v9 = vld [vmem:[#allocation3 + $0x69c] ss:$28 sps:$4 sm:$0xff]  }
 0x5ed   :  { %v8323_v16 = vld [vmem:[#allocation3 + $0x318] ss:$28 sps:$4 sm:$0xff]  }
 0x5ee   :  { %6415 = vmatpush2.bf16.msra.mxu0 %v8251_v18  ;;  %v8326_v18 = vld [vmem:[#allocation3 + $0x698] ss:$28 sps:$4 sm:$0xff]  }
 0x5ef   :  { %6456 = vmatpush2.bf16.msra.mxu1 %v8254_v56  ;;  %6416 = vmatprep.subr.bf16.mxu0 %v8259_v17  ;;  %v8331_v56 = vld [vmem:[#allocation3 + $0x2e4] ss:$28 sps:$4 sm:$0xff]  }
 0x5f0   :  { %6457 = vmatprep.subr.bf16.mxu1 %v8262_v35  ;;  %v8334_v17 = vld [vmem:[#allocation3 + $0x664] ss:$28 sps:$4 sm:$0xff]  }
 0x5f1   :  { %v8329_v35 = vld [vmem:[#allocation3 + $0x2e0] ss:$28 sps:$4 sm:$0xff]  }
 0x5f2   :  { %6417 = vmatpush2.bf16.msra.mxu0 %v8257_v37  ;;  %v8332_v37 = vld [vmem:[#allocation3 + $0x660] ss:$28 sps:$4 sm:$0xff]  }
 0x5f3   :  { %6458 = vmatpush2.bf16.msra.mxu1 %v8260_v19  ;;  %6418 = vmatprep.subr.bf16.mxu0 %v8265_v50  ;;  %v8337_v19 = vld [vmem:[#allocation3 + $0x2ac] ss:$28 sps:$4 sm:$0xff]  }
 0x5f4   :  { %6459 = vmatprep.subr.bf16.mxu1 %v8268_v20  ;;  %v8340_v50 = vld [vmem:[#allocation3 + $0x62c] ss:$28 sps:$4 sm:$0xff]  }
 0x5f5   :  { %v8335_v20 = vld [vmem:[#allocation3 + $0x2a8] ss:$28 sps:$4 sm:$0xff]  }
 0x5f6   :  { %6419 = vmatpush2.bf16.msra.mxu0 %v8263_v11  ;;  %v8338_v11 = vld [vmem:[#allocation3 + $0x628] ss:$28 sps:$4 sm:$0xff]  }
 0x5f7   :  { %6460 = vmatpush2.bf16.msra.mxu1 %v8266_v13  ;;  %6470 = vmatprep.subr.bf16.mxu0 %v8271_v21  ;;  %v8343_v13 = vld [vmem:[#allocation3 + $0x274] ss:$28 sps:$4 sm:$0xff]  }
 0x5f8   :  { %6511 = vmatprep.subr.bf16.mxu1 %v8274_v22  ;;  %v8346_v21 = vld [vmem:[#allocation3 + $0x5f4] ss:$28 sps:$4 sm:$0xff]  }
 0x5f9   :  { %6421 = vmatmul.mubr.bf16.vlgmr.msra.gmra.mxu0 %v9177_v49  ;;  %v8341_v22 = vld [vmem:[#allocation3 + $0x270] ss:$28 sps:$4 sm:$0xff]  }
 0x5fa   :  { %6462 = vmatmul.mubr.bf16.vlgmr.msra.gmra.mxu1 %v9181_v63  ;;  %6471 = vmatpush1.bf16.msra.mxu0 %v8269_v25  ;;  %v8344_v25 = vld [vmem:[#allocation3 + $0x5f0] ss:$28 sps:$4 sm:$0xff]  }
 0x5fb   :  { %6512 = vmatpush1.bf16.msra.mxu1 %v8272_v27  ;;  %6472 = vmatprep.subr.bf16.mxu0 %v8277_v28  ;;  %v8349_v27 = vld [vmem:[#allocation3 + $0x23c] ss:$28 sps:$4 sm:$0xff]  }
 0x5fc   :  { %6513 = vmatprep.subr.bf16.mxu1 %v8280_v54  ;;  %6502 = vmatprep.mubr.bf16.mxu0 %v9171_v46  ;;  %v8352_v28 = vld [vmem:[#allocation3 + $0x5bc] ss:$28 sps:$4 sm:$0xff]  }
 0x5fd   :  { %6543 = vmatprep.mubr.bf16.mxu1 %v9175_v48  ;;  %v8347_v54 = vld [vmem:[#allocation3 + $0x238] ss:$28 sps:$4 sm:$0xff]  }
 0x5fe   :  { %6473 = vmatpush1.bf16.msra.mxu0 %v8275_v55  ;;  %v8350_v55 = vld [vmem:[#allocation3 + $0x5b8] ss:$28 sps:$4 sm:$0xff]  }
 0x5ff   :  { %6514 = vmatpush1.bf16.msra.mxu1 %v8278_v57  ;;  %6474 = vmatprep.subr.bf16.mxu0 %v8283_v29  ;;  %v8355_v57 = vld [vmem:[#allocation3 + $0x204] ss:$28 sps:$4 sm:$0xff]  }
 0x600   :  { %6515 = vmatprep.subr.bf16.mxu1 %v8286_v31  ;;  %v8358_v29 = vld [vmem:[#allocation3 + $0x584] ss:$28 sps:$4 sm:$0xff]  }
 0x601   :  { %v8353_v31 = vld [vmem:[#allocation3 + $0x200] ss:$28 sps:$4 sm:$0xff]  }
 0x602   :  { %6475 = vmatpush1.bf16.msra.mxu0 %v8281_v4  ;;  %v8356_v4 = vld [vmem:[#allocation3 + $0x580] ss:$28 sps:$4 sm:$0xff]  }
 0x603   :  { %6516 = vmatpush1.bf16.msra.mxu1 %v8284_v23  ;;  %6476 = vmatprep.subr.bf16.mxu0 %v8289_v7  ;;  %v8361_v23 = vld [vmem:[#allocation3 + $0x1cc] ss:$28 sps:$4 sm:$0xff]  }
 0x604   :  { %6517 = vmatprep.subr.bf16.mxu1 %v8292_v51  ;;  %v8364_v7 = vld [vmem:[#allocation3 + $0x54c] ss:$28 sps:$4 sm:$0xff]  }
 0x605   :  { %v8359_v51 = vld [vmem:[#allocation3 + $0x1c8] ss:$28 sps:$4 sm:$0xff]  }
 0x606   :  { %6477 = vmatpush1.bf16.msra.mxu0 %v8287_v38  ;;  %v8362_v38 = vld [vmem:[#allocation3 + $0x548] ss:$28 sps:$4 sm:$0xff]  }
 0x607   :  { %6518 = vmatpush1.bf16.msra.mxu1 %v8290_v24  ;;  %6478 = vmatprep.subr.bf16.mxu0 %v8295_v39  ;;  %v8367_v24 = vld [vmem:[#allocation3 + $0x894] ss:$28 sps:$4 sm:$0xff]  }
 0x608   :  { %6519 = vmatprep.subr.bf16.mxu1 %v8298_v40  ;;  %v8370_v39 = vld [vmem:[#allocation3 + $0xc14] ss:$28 sps:$4 sm:$0xff]  }
 0x609   :  { %v8365_v40 = vld [vmem:[#allocation3 + $0x890] ss:$28 sps:$4 sm:$0xff]  }
 0x60a   :  { %6479 = vmatpush1.bf16.msra.mxu0 %v8293_v43  ;;  %v8368_v43 = vld [vmem:[#allocation3 + $0xc10] ss:$28 sps:$4 sm:$0xff]  }
 0x60b   :  { %6520 = vmatpush1.bf16.msra.mxu1 %v8296_v41  ;;  %6480 = vmatprep.subr.bf16.mxu0 %v8301_v30  ;;  %v8373_v41 = vld [vmem:[#allocation3 + $0x85c] ss:$28 sps:$4 sm:$0xff]  }
 0x60c   :  { %6521 = vmatprep.subr.bf16.mxu1 %v8304_v34  ;;  %v8376_v30 = vld [vmem:[#allocation3 + $0xbdc] ss:$28 sps:$4 sm:$0xff]  }
 0x60d   :  { %v8371_v34 = vld [vmem:[#allocation3 + $0x858] ss:$28 sps:$4 sm:$0xff]  }
 0x60e   :  { %6481 = vmatpush1.bf16.msra.mxu0 %v8299_v32  ;;  %v8374_v32 = vld [vmem:[#allocation3 + $0xbd8] ss:$28 sps:$4 sm:$0xff]  }
 0x60f   :  { %6522 = vmatpush1.bf16.msra.mxu1 %v8302_v42  ;;  %6482 = vmatprep.subr.bf16.mxu0 %v8307_v44  ;;  %v8379_v42 = vld [vmem:[#allocation3 + $0x824] ss:$28 sps:$4 sm:$0xff]  }
 0x610   :  { %6523 = vmatprep.subr.bf16.mxu1 %v8310_v52  ;;  %v8382_v44 = vld [vmem:[#allocation3 + $0xba4] ss:$28 sps:$4 sm:$0xff]  }
 0x611   :  { %v8377_v52 = vld [vmem:[#allocation3 + $0x820] ss:$28 sps:$4 sm:$0xff]  }
 0x612   :  { %6483 = vmatpush1.bf16.msra.mxu0 %v8305_v6  ;;  %v8380_v6 = vld [vmem:[#allocation3 + $0xba0] ss:$28 sps:$4 sm:$0xff]  }
 0x613   :  { %6524 = vmatpush1.bf16.msra.mxu1 %v8308_v14  ;;  %6484 = vmatprep.subr.bf16.mxu0 %v8313_v1  ;;  %v8385_v14 = vld [vmem:[#allocation3 + $0x7ec] ss:$28 sps:$4 sm:$0xff]  }
 0x614   :  { %6525 = vmatprep.subr.bf16.mxu1 %v8316_v5  ;;  %v8388_v1 = vld [vmem:[#allocation3 + $0xb6c] ss:$28 sps:$4 sm:$0xff]  }
 0x615   :  { %v8383_v5 = vld [vmem:[#allocation3 + $0x7e8] ss:$28 sps:$4 sm:$0xff]  }
 0x616   :  { %6485 = vmatpush1.bf16.msra.mxu0 %v8311_v62  ;;  %v8386_v62 = vld [vmem:[#allocation3 + $0xb68] ss:$28 sps:$4 sm:$0xff]  }
 0x617   :  { %6526 = vmatpush1.bf16.msra.mxu1 %v8314_v3  ;;  %6486 = vmatprep.subr.bf16.mxu0 %v8319_v8  ;;  %v8391_v3 = vld [vmem:[#allocation3 + $0x7b4] ss:$28 sps:$4 sm:$0xff]  }
 0x618   :  { %6527 = vmatprep.subr.bf16.mxu1 %v8322_v10  ;;  %v8394_v8 = vld [vmem:[#allocation3 + $0xb34] ss:$28 sps:$4 sm:$0xff]  }
 0x619   :  { %v8389_v10 = vld [vmem:[#allocation3 + $0x7b0] ss:$28 sps:$4 sm:$0xff]  }
 0x61a   :  { %6487 = vmatpush2.bf16.msra.mxu0 %v8317_v12  ;;  %v8392_v12 = vld [vmem:[#allocation3 + $0xb30] ss:$28 sps:$4 sm:$0xff]  }
 0x61b   :  { %6528 = vmatpush2.bf16.msra.mxu1 %v8320_v15  ;;  %6488 = vmatprep.subr.bf16.mxu0 %v8325_v0  ;;  %v8397_v15 = vld [vmem:[#allocation3 + $0x77c] ss:$28 sps:$4 sm:$0xff]  }
 0x61c   :  { %6529 = vmatprep.subr.bf16.mxu1 %v8328_v9  ;;  %v8400_v0 = vld [vmem:[#allocation3 + $0xafc] ss:$28 sps:$4 sm:$0xff]  }
 0x61d   :  { %v8395_v9 = vld [vmem:[#allocation3 + $0x778] ss:$28 sps:$4 sm:$0xff]  }
 0x61e   :  { %6489 = vmatpush2.bf16.msra.mxu0 %v8323_v16  ;;  %v8398_v16 = vld [vmem:[#allocation3 + $0xaf8] ss:$28 sps:$4 sm:$0xff]  }
 0x61f   :  { %6530 = vmatpush2.bf16.msra.mxu1 %v8326_v18  ;;  %6490 = vmatprep.subr.bf16.mxu0 %v8331_v56  ;;  %v8403_v18 = vld [vmem:[#allocation3 + $0x744] ss:$28 sps:$4 sm:$0xff]  }
 0x620   :  { %6531 = vmatprep.subr.bf16.mxu1 %v8334_v17  ;;  %v8406_v56 = vld [vmem:[#allocation3 + $0xac4] ss:$28 sps:$4 sm:$0xff]  }
 0x621   :  { %v8401_v17 = vld [vmem:[#allocation3 + $0x740] ss:$28 sps:$4 sm:$0xff]  }
 0x622   :  { %6491 = vmatpush2.bf16.msra.mxu0 %v8329_v35  ;;  %v8404_v35 = vld [vmem:[#allocation3 + $0xac0] ss:$28 sps:$4 sm:$0xff]  }
 0x623   :  { %6532 = vmatpush2.bf16.msra.mxu1 %v8332_v37  ;;  %6492 = vmatprep.subr.bf16.mxu0 %v8337_v19  ;;  %v8409_v37 = vld [vmem:[#allocation3 + $0x70c] ss:$28 sps:$4 sm:$0xff]  }
 0x624   :  { %6533 = vmatprep.subr.bf16.mxu1 %v8340_v50  ;;  %v8412_v19 = vld [vmem:[#allocation3 + $0xa8c] ss:$28 sps:$4 sm:$0xff]  }
 0x625   :  { %v8407_v50 = vld [vmem:[#allocation3 + $0x708] ss:$28 sps:$4 sm:$0xff]  }
 0x626   :  { %6493 = vmatpush2.bf16.msra.mxu0 %v8335_v20  ;;  %v8410_v20 = vld [vmem:[#allocation3 + $0xa88] ss:$28 sps:$4 sm:$0xff]  }
 0x627   :  { %6534 = vmatpush2.bf16.msra.mxu1 %v8338_v11  ;;  %6494 = vmatprep.subr.bf16.mxu0 %v8343_v13  ;;  %v8415_v11 = vld [vmem:[#allocation3 + $0xa54] ss:$28 sps:$4 sm:$0xff]  }
 0x628   :  { %6535 = vmatprep.subr.bf16.mxu1 %v8346_v21  ;;  %v8418_v13 = vld [vmem:[#allocation3 + $0xdd4] ss:$28 sps:$4 sm:$0xff]  }
 0x629   :  { %v8413_v21 = vld [vmem:[#allocation3 + $0xa50] ss:$28 sps:$4 sm:$0xff]  }
 0x62a   :  { %6495 = vmatpush2.bf16.msra.mxu0 %v8341_v22  ;;  %v8416_v22 = vld [vmem:[#allocation3 + $0xdd0] ss:$28 sps:$4 sm:$0xff]  }
 0x62b   :  { %6536 = vmatpush2.bf16.msra.mxu1 %v8344_v25  ;;  %6496 = vmatprep.subr.bf16.mxu0 %v8349_v27  ;;  %v8421_v25 = vld [vmem:[#allocation3 + $0xa1c] ss:$28 sps:$4 sm:$0xff]  }
 0x62c   :  { %6537 = vmatprep.subr.bf16.mxu1 %v8352_v28  ;;  %v8424_v27 = vld [vmem:[#allocation3 + $0xd9c] ss:$28 sps:$4 sm:$0xff]  }
 0x62d   :  { %v8419_v28 = vld [vmem:[#allocation3 + $0xa18] ss:$28 sps:$4 sm:$0xff]  }
 0x62e   :  { %6497 = vmatpush2.bf16.msra.mxu0 %v8347_v54  ;;  %v8422_v54 = vld [vmem:[#allocation3 + $0xd98] ss:$28 sps:$4 sm:$0xff]  }
 0x62f   :  { %6538 = vmatpush2.bf16.msra.mxu1 %v8350_v55  ;;  %6498 = vmatprep.subr.bf16.mxu0 %v8355_v57  ;;  %v8427_v55 = vld [vmem:[#allocation3 + $0x9e4] ss:$28 sps:$4 sm:$0xff]  }
 0x630   :  { %6539 = vmatprep.subr.bf16.mxu1 %v8358_v29  ;;  %v8430_v57 = vld [vmem:[#allocation3 + $0xd64] ss:$28 sps:$4 sm:$0xff]  }
 0x631   :  { %v8425_v29 = vld [vmem:[#allocation3 + $0x9e0] ss:$28 sps:$4 sm:$0xff]  }
 0x632   :  { %6499 = vmatpush2.bf16.msra.mxu0 %v8353_v31  ;;  %v8428_v31 = vld [vmem:[#allocation3 + $0xd60] ss:$28 sps:$4 sm:$0xff]  }
 0x633   :  { %6540 = vmatpush2.bf16.msra.mxu1 %v8356_v4  ;;  %6500 = vmatprep.subr.bf16.mxu0 %v8361_v23  ;;  %v8433_v4 = vld [vmem:[#allocation3 + $0x9ac] ss:$28 sps:$4 sm:$0xff]  }
 0x634   :  { %6541 = vmatprep.subr.bf16.mxu1 %v8364_v7  ;;  %v8436_v23 = vld [vmem:[#allocation3 + $0xd2c] ss:$28 sps:$4 sm:$0xff]  }
 0x635   :  { %v8431_v7 = vld [vmem:[#allocation3 + $0x9a8] ss:$28 sps:$4 sm:$0xff]  }
 0x636   :  { %6501 = vmatpush2.bf16.msra.mxu0 %v8359_v51  ;;  %v8434_v51 = vld [vmem:[#allocation3 + $0xd28] ss:$28 sps:$4 sm:$0xff]  }
 0x637   :  { %6542 = vmatpush2.bf16.msra.mxu1 %v8362_v38  ;;  %6552 = vmatprep.subr.bf16.mxu0 %v8367_v24  ;;  %v8439_v38 = vld [vmem:[#allocation3 + $0x974] ss:$28 sps:$4 sm:$0xff]  }
 0x638   :  { %6593 = vmatprep.subr.bf16.mxu1 %v8370_v39  ;;  %v8442_v24 = vld [vmem:[#allocation3 + $0xcf4] ss:$28 sps:$4 sm:$0xff]  }
 0x639   :  { %6503 = vmatmul.mubr.bf16.vlgmr.msra.gmra.mxu0 %v9169_v45  ;;  %v8437_v39 = vld [vmem:[#allocation3 + $0x970] ss:$28 sps:$4 sm:$0xff]  }
 0x63a   :  { %6544 = vmatmul.mubr.bf16.vlgmr.msra.gmra.mxu1 %v9173_v47  ;;  %6553 = vmatpush1.bf16.msra.mxu0 %v8365_v40  ;;  %v8440_v40 = vld [vmem:[#allocation3 + $0xcf0] ss:$28 sps:$4 sm:$0xff]  }
 0x63b   :  { %6594 = vmatpush1.bf16.msra.mxu1 %v8368_v43  ;;  %6554 = vmatprep.subr.bf16.mxu0 %v8373_v41  ;;  %v8445_v43 = vld [vmem:[#allocation3 + $0x93c] ss:$28 sps:$4 sm:$0xff]  }
 0x63c   :  { %6595 = vmatprep.subr.bf16.mxu1 %v8376_v30  ;;  %6584 = vmatprep.mubr.bf16.mxu0 %v9179_v59  ;;  %v8448_v41 = vld [vmem:[#allocation3 + $0xcbc] ss:$28 sps:$4 sm:$0xff]  }
 0x63d   :  { %6625 = vmatprep.mubr.bf16.mxu1 %v9183_v33  ;;  %v8443_v30 = vld [vmem:[#allocation3 + $0x938] ss:$28 sps:$4 sm:$0xff]  }
 0x63e   :  { %6555 = vmatpush1.bf16.msra.mxu0 %v8371_v34  ;;  %v8446_v34 = vld [vmem:[#allocation3 + $0xcb8] ss:$28 sps:$4 sm:$0xff]  }
 0x63f   :  { %6596 = vmatpush1.bf16.msra.mxu1 %v8374_v32  ;;  %6556 = vmatprep.subr.bf16.mxu0 %v8379_v42  ;;  %v8451_v32 = vld [vmem:[#allocation3 + $0x904] ss:$28 sps:$4 sm:$0xff]  }
 0x640   :  { %6597 = vmatprep.subr.bf16.mxu1 %v8382_v44  ;;  %v8454_v42 = vld [vmem:[#allocation3 + $0xc84] ss:$28 sps:$4 sm:$0xff]  }
 0x641   :  { %v8449_v44 = vld [vmem:[#allocation3 + $0x900] ss:$28 sps:$4 sm:$0xff]  }
 0x642   :  { %6557 = vmatpush1.bf16.msra.mxu0 %v8377_v52  ;;  %v8452_v52 = vld [vmem:[#allocation3 + $0xc80] ss:$28 sps:$4 sm:$0xff]  }
 0x643   :  { %6598 = vmatpush1.bf16.msra.mxu1 %v8380_v6  ;;  %6558 = vmatprep.subr.bf16.mxu0 %v8385_v14  ;;  %v8457_v6 = vld [vmem:[#allocation3 + $0x8cc] ss:$28 sps:$4 sm:$0xff]  }
 0x644   :  { %6599 = vmatprep.subr.bf16.mxu1 %v8388_v1  ;;  %v8460_v14 = vld [vmem:[#allocation3 + $0xc4c] ss:$28 sps:$4 sm:$0xff]  }
 0x645   :  { %v8455_v1 = vld [vmem:[#allocation3 + $0x8c8] ss:$28 sps:$4 sm:$0xff]  }
 0x646   :  { %6559 = vmatpush1.bf16.msra.mxu0 %v8383_v5  ;;  %v8458_v5 = vld [vmem:[#allocation3 + $0xc48] ss:$28 sps:$4 sm:$0xff]  }
 0x647   :  { %6600 = vmatpush1.bf16.msra.mxu1 %v8386_v62  ;;  %6560 = vmatprep.subr.bf16.mxu0 %v8391_v3  ;;  %v8463_v62 = vld [vmem:[#allocation3 + $0x19c] ss:$28 sps:$4 sm:$0xff]  }
 0x648   :  { %6601 = vmatprep.subr.bf16.mxu1 %v8394_v8  ;;  %v8466_v3 = vld [vmem:[#allocation3 + $0x51c] ss:$28 sps:$4 sm:$0xff]  }
 0x649   :  { %v8461_v8 = vld [vmem:[#allocation3 + $0x198] ss:$28 sps:$4 sm:$0xff]  }
 0x64a   :  { %6561 = vmatpush1.bf16.msra.mxu0 %v8389_v10  ;;  %v8464_v10 = vld [vmem:[#allocation3 + $0x518] ss:$28 sps:$4 sm:$0xff]  }
 0x64b   :  { %6602 = vmatpush1.bf16.msra.mxu1 %v8392_v12  ;;  %6562 = vmatprep.subr.bf16.mxu0 %v8397_v15  ;;  %v8469_v12 = vld [vmem:[#allocation3 + $0x164] ss:$28 sps:$4 sm:$0xff]  }
 0x64c   :  { %6603 = vmatprep.subr.bf16.mxu1 %v8400_v0  ;;  %v8472_v15 = vld [vmem:[#allocation3 + $0x4e4] ss:$28 sps:$4 sm:$0xff]  }
 0x64d   :  { %v8467_v0 = vld [vmem:[#allocation3 + $0x160] ss:$28 sps:$4 sm:$0xff]  }
 0x64e   :  { %6563 = vmatpush1.bf16.msra.mxu0 %v8395_v9 }
 0x64f   :  { %6604 = vmatpush1.bf16.msra.mxu1 %v8398_v16  ;;  %6564 = vmatprep.subr.bf16.mxu0 %v8403_v18  ;;  %v8470_v18 = vld [vmem:[#allocation3 + $0x4e0] ss:$28 sps:$4 sm:$0xff]  }
 0x650   :  { %6605 = vmatprep.subr.bf16.mxu1 %v8406_v56  ;;  %v8475_v56 = vld [vmem:[#allocation3 + $0x12c] ss:$28 sps:$4 sm:$0xff]  }
 0x652   :  { %6565 = vmatpush1.bf16.msra.mxu0 %v8401_v17 }
 0x653   :  { %6606 = vmatpush1.bf16.msra.mxu1 %v8404_v35  ;;  %6566 = vmatprep.subr.bf16.mxu0 %v8409_v37  ;;  %v8478_v37 = vld [vmem:[#allocation3 + $0x4ac] ss:$28 sps:$4 sm:$0xff]  }
 0x654   :  { %6607 = vmatprep.subr.bf16.mxu1 %v8412_v19  ;;  %v8473_v19 = vld [vmem:[#allocation3 + $0x128] ss:$28 sps:$4 sm:$0xff]  }
 0x656   :  { %6567 = vmatpush1.bf16.msra.mxu0 %v8407_v50 }
 0x657   :  { %6608 = vmatpush1.bf16.msra.mxu1 %v8410_v20  ;;  %6568 = vmatprep.subr.bf16.mxu0 %v8415_v11  ;;  %v8476_v11 = vld [vmem:[#allocation3 + $0x4a8] ss:$28 sps:$4 sm:$0xff]  }
 0x658   :  { %6609 = vmatprep.subr.bf16.mxu1 %v8418_v13  ;;  %v8481_v13 = vld [vmem:[#allocation3 + $0xf4] ss:$28 sps:$4 sm:$0xff]  }
 0x65a   :  { %6569 = vmatpush2.bf16.msra.mxu0 %v8413_v21 }
 0x65b   :  { %6610 = vmatpush2.bf16.msra.mxu1 %v8416_v22  ;;  %6570 = vmatprep.subr.bf16.mxu0 %v8421_v25  ;;  %v8484_v25 = vld [vmem:[#allocation3 + $0x474] ss:$28 sps:$4 sm:$0xff]  }
 0x65c   :  { %6611 = vmatprep.subr.bf16.mxu1 %v8424_v27  ;;  %v8479_v27 = vld [vmem:[#allocation3 + $0xf0] ss:$28 sps:$4 sm:$0xff]  }
 0x65e   :  { %6571 = vmatpush2.bf16.msra.mxu0 %v8419_v28  ;;  %v8482_v28 = vld [vmem:[#allocation3 + $0x470] ss:$28 sps:$4 sm:$0xff]  }
 0x65f   :  { %6612 = vmatpush2.bf16.msra.mxu1 %v8422_v54  ;;  %6572 = vmatprep.subr.bf16.mxu0 %v8427_v55  ;;  %v8487_v54 = vld [vmem:[#allocation3 + $0xbc] ss:$28 sps:$4 sm:$0xff]  }
 0x660   :  { %6613 = vmatprep.subr.bf16.mxu1 %v8430_v57  ;;  %v8490_v55 = vld [vmem:[#allocation3 + $0x43c] ss:$28 sps:$4 sm:$0xff]  }
 0x661   :  { %v8485_v57 = vld [vmem:[#allocation3 + $0xb8] ss:$28 sps:$4 sm:$0xff]  }
 0x662   :  { %6573 = vmatpush2.bf16.msra.mxu0 %v8425_v29  ;;  %v8488_v29 = vld [vmem:[#allocation3 + $0x438] ss:$28 sps:$4 sm:$0xff]  }
 0x663   :  { %6614 = vmatpush2.bf16.msra.mxu1 %v8428_v31  ;;  %6574 = vmatprep.subr.bf16.mxu0 %v8433_v4  ;;  %v8493_v31 = vld [vmem:[#allocation3 + $0x84] ss:$28 sps:$4 sm:$0xff]  }
 0x664   :  { %6615 = vmatprep.subr.bf16.mxu1 %v8436_v23  ;;  %v8496_v4 = vld [vmem:[#allocation3 + $0x404] ss:$28 sps:$4 sm:$0xff]  }
 0x665   :  { %v8491_v23 = vld [vmem:[#allocation3 + $0x80] ss:$28 sps:$4 sm:$0xff]  }
 0x666   :  { %6575 = vmatpush2.bf16.msra.mxu0 %v8431_v7  ;;  %v8494_v7 = vld [vmem:[#allocation3 + $0x400] ss:$28 sps:$4 sm:$0xff]  }
 0x667   :  { %6616 = vmatpush2.bf16.msra.mxu1 %v8434_v51  ;;  %6576 = vmatprep.subr.bf16.mxu0 %v8439_v38  ;;  %v8499_v51 = vld [vmem:[#allocation3 + $0x4c] ss:$28 sps:$4 sm:$0xff]  }
 0x668   :  { %6617 = vmatprep.subr.bf16.mxu1 %v8442_v24  ;;  %v8502_v38 = vld [vmem:[#allocation3 + $0x3cc] ss:$28 sps:$4 sm:$0xff]  }
 0x669   :  { %v8497_v24 = vld [vmem:[#allocation3 + $0x48] ss:$28 sps:$4 sm:$0xff]  }
 0x66a   :  { %6577 = vmatpush2.bf16.msra.mxu0 %v8437_v39  ;;  %v8500_v39 = vld [vmem:[#allocation3 + $0x3c8] ss:$28 sps:$4 sm:$0xff]  }
 0x66b   :  { %6618 = vmatpush2.bf16.msra.mxu1 %v8440_v40  ;;  %6578 = vmatprep.subr.bf16.mxu0 %v8445_v43  ;;  %v8505_v40 = vld [vmem:[#allocation3 + $0x14] ss:$28 sps:$4 sm:$0xff]  }
 0x66c   :  { %6619 = vmatprep.subr.bf16.mxu1 %v8448_v41  ;;  %v8508_v43 = vld [vmem:[#allocation3 + $0x394] ss:$28 sps:$4 sm:$0xff]  }
 0x66d   :  { %v8503_v41 = vld [vmem:[#allocation3 + $0x10] ss:$28 sps:$4 sm:$0xff]  }
 0x66e   :  { %6579 = vmatpush2.bf16.msra.mxu0 %v8443_v30  ;;  %v8506_v30 = vld [vmem:[#allocation3 + $0x390] ss:$28 sps:$4 sm:$0xff]  }
 0x66f   :  { %6620 = vmatpush2.bf16.msra.mxu1 %v8446_v34  ;;  %6580 = vmatprep.subr.bf16.mxu0 %v8451_v32  ;;  %v8511_v34 = vld [vmem:[#allocation3 + $0x35c] ss:$28 sps:$4 sm:$0xff]  }
 0x670   :  { %6621 = vmatprep.subr.bf16.mxu1 %v8454_v42  ;;  %v8514_v32 = vld [vmem:[#allocation3 + $0x6dc] ss:$28 sps:$4 sm:$0xff]  }
 0x671   :  { %v8509_v42 = vld [vmem:[#allocation3 + $0x358] ss:$28 sps:$4 sm:$0xff]  }
 0x672   :  { %6581 = vmatpush2.bf16.msra.mxu0 %v8449_v44  ;;  %v8512_v44 = vld [vmem:[#allocation3 + $0x6d8] ss:$28 sps:$4 sm:$0xff]  }
 0x673   :  { %6622 = vmatpush2.bf16.msra.mxu1 %v8452_v52  ;;  %6582 = vmatprep.subr.bf16.mxu0 %v8457_v6  ;;  %v8517_v52 = vld [vmem:[#allocation3 + $0x324] ss:$28 sps:$4 sm:$0xff]  }
 0x674   :  { %6623 = vmatprep.subr.bf16.mxu1 %v8460_v14  ;;  %v8520_v6 = vld [vmem:[#allocation3 + $0x6a4] ss:$28 sps:$4 sm:$0xff]  }
 0x675   :  { %v8515_v14 = vld [vmem:[#allocation3 + $0x320] ss:$28 sps:$4 sm:$0xff]  }
 0x676   :  { %6583 = vmatpush2.bf16.msra.mxu0 %v8455_v1  ;;  %v8518_v1 = vld [vmem:[#allocation3 + $0x6a0] ss:$28 sps:$4 sm:$0xff]  }
 0x677   :  { %6624 = vmatpush2.bf16.msra.mxu1 %v8458_v5  ;;  %6634 = vmatprep.subr.bf16.mxu0 %v8463_v62  ;;  %v8523_v5 = vld [vmem:[#allocation3 + $0x2ec] ss:$28 sps:$4 sm:$0xff]  }
 0x678   :  { %6675 = vmatprep.subr.bf16.mxu1 %v8466_v3  ;;  %v8526_v62 = vld [vmem:[#allocation3 + $0x66c] ss:$28 sps:$4 sm:$0xff]  }
 0x679   :  { %v9199_v9 = vpop.f32.mrf.mxu0  ;;  %6585 = vmatmul.mubr.bf16.vlgmr.msra.gmra.mxu0 %v9177_v49  ;;  %v8521_v3 = vld [vmem:[#allocation3 + $0x2e8] ss:$28 sps:$4 sm:$0xff]  }
 0x67a   :  { %v9201_v16 = vpop.f32.mrf.mxu1  ;;  %6626 = vmatmul.mubr.bf16.vlgmr.msra.gmra.mxu1 %v9181_v63  ;;  %6635 = vmatpush1.bf16.msra.mxu0 %v8461_v8  ;;  %v8524_v8 = vld [vmem:[#allocation3 + $0x668] ss:$28 sps:$4 sm:$0xff]  }
 0x67b   :  { %6676 = vmatpush1.bf16.msra.mxu1 %v8464_v10  ;;  %v9205_v17 = vpop.f32.mrf.mxu0  ;;  %6636 = vmatprep.subr.bf16.mxu0 %v8469_v12  ;;  %v8529_v10 = vld [vmem:[#allocation3 + $0x2b4] ss:$28 sps:$4 sm:$0xff]  }
 0x67c   :  { %v9207_v35 = vpop.f32.mrf.mxu1  ;;  %6677 = vmatprep.subr.bf16.mxu1 %v8472_v15  ;;  %6666 = vmatprep.mubr.bf16.mxu0 %v9171_v46  ;;  %v8532_v12 = vld [vmem:[#allocation3 + $0x634] ss:$28 sps:$4 sm:$0xff]  }
 0x67d   :  { %6707 = vmatprep.mubr.bf16.mxu1 %v9175_v48  ;;  %v6344_v50 = vpop.f32.mrf.mxu0  ;;  %v8527_v15 = vld [vmem:[#allocation3 + $0x2b0] ss:$28 sps:$4 sm:$0xff]  }
 0x67e   :  { %v6385_v20 = vpop.f32.mrf.mxu1  ;;  %6637 = vmatpush1.bf16.msra.mxu0 %v8467_v0  ;;  %v8530_v0 = vld [vmem:[#allocation3 + $0x630] ss:$28 sps:$4 sm:$0xff]   ;;  %v8541_v50 = vld [vmem:[#allocation3 + $0x244] ss:$28 sps:$4 sm:$0xff]  }
 0x67f   :  { %6678 = vmatpush1.bf16.msra.mxu1 %v8470_v18  ;;  %v6345_v21 = vpop.f32.mrf.mxu0  ;;  %6638 = vmatprep.subr.bf16.mxu0 %v8475_v56  ;;  %v8535_v18 = vld [vmem:[#allocation3 + $0x27c] ss:$28 sps:$4 sm:$0xff]   ;;  %v8544_v20 = vld [vmem:[#allocation3 + $0x5c4] ss:$28 sps:$4 sm:$0xff]  }
 0x680   :  { %v6386_v22 = vpop.f32.mrf.mxu1  ;;  %6679 = vmatprep.subr.bf16.mxu1 %v8478_v37  ;;  %v8538_v56 = vld [vmem:[#allocation3 + $0x5fc] ss:$28 sps:$4 sm:$0xff]   ;;  %v8547_v21 = vld [vmem:[#allocation3 + $0x20c] ss:$28 sps:$4 sm:$0xff]  }
 0x681   :  { %v8533_v37 = vld [vmem:[#allocation3 + $0x278] ss:$28 sps:$4 sm:$0xff]   ;;  %v9211_v22 = vld [vmem:[#allocation10 + $0x1e] sm:$0xff] }
 0x682   :  { %6639 = vmatpush1.bf16.msra.mxu0 %v8473_v19  ;;  %v8536_v19 = vld [vmem:[#allocation3 + $0x5f8] ss:$28 sps:$4 sm:$0xff]  }
 0x683   :  { %6680 = vmatpush1.bf16.msra.mxu1 %v8476_v11  ;;  %6640 = vmatprep.subr.bf16.mxu0 %v8481_v13  ;;  %v8539_v11 = vld [vmem:[#allocation3 + $0x240] ss:$28 sps:$4 sm:$0xff]  }
 0x684   :  { %6681 = vmatprep.subr.bf16.mxu1 %v8484_v25  ;;  %v8542_v13 = vld [vmem:[#allocation3 + $0x5c0] ss:$28 sps:$4 sm:$0xff]   ;;  %v8550_v25 = vld [vmem:[#allocation3 + $0x58c] ss:$28 sps:$4 sm:$0xff]  }
 0x686   :  { %6641 = vmatpush1.bf16.msra.mxu0 %v8479_v27  ;;  %v8545_v27 = vld [vmem:[#allocation3 + $0x208] ss:$28 sps:$4 sm:$0xff]  }
 0x687   :  { %6682 = vmatpush1.bf16.msra.mxu1 %v8482_v28  ;;  %6642 = vmatprep.subr.bf16.mxu0 %v8487_v54  ;;  %v8548_v28 = vld [vmem:[#allocation3 + $0x588] ss:$28 sps:$4 sm:$0xff]   ;;  %v8553_v54 = vld [vmem:[#allocation3 + $0x1d4] ss:$28 sps:$4 sm:$0xff]  }
 0x688   :  { %6683 = vmatprep.subr.bf16.mxu1 %v8490_v55  ;;  %v8556_v55 = vld [vmem:[#allocation3 + $0x554] ss:$28 sps:$4 sm:$0xff]  }
 0x68a   :  { %6643 = vmatpush1.bf16.msra.mxu0 %v8485_v57  ;;  %v3970_v57 = vrot.slane %v9211_v22, %v8935_v53  ;;  %v8565_v53 = vld [vmem:[#allocation3 + $0x864] ss:$28 sps:$4 sm:$0xff]  }
 0x68b   :  { %6684 = vmatpush1.bf16.msra.mxu1 %v8488_v29  ;;  %6644 = vmatprep.subr.bf16.mxu0 %v8493_v31  ;;  %v8551_v29 = vld [vmem:[#allocation3 + $0x1d0] ss:$28 sps:$4 sm:$0xff]  }
 0x68c   :  { %6685 = vmatprep.subr.bf16.mxu1 %v8496_v4  ;;  %v8554_v31 = vld [vmem:[#allocation3 + $0x550] ss:$28 sps:$4 sm:$0xff]   ;;  %v3974_v4 = vrot.slane %v9211_v22, %v8951_v58 }
 0x68e   :  { %6645 = vmatpush1.bf16.msra.mxu0 %v8491_v23  ;;  %v8559_v23 = vld [vmem:[#allocation3 + $0x89c] ss:$28 sps:$4 sm:$0xff]  }
 0x68f   :  { %6686 = vmatpush1.bf16.msra.mxu1 %v8494_v7  ;;  %6646 = vmatprep.subr.bf16.mxu0 %v8499_v51  ;;  %v8562_v7 = vld [vmem:[#allocation3 + $0xc1c] ss:$28 sps:$4 sm:$0xff]   ;;  %v6341_v51 = vadd.f32 %v9199_v9, %v3970_v57  ;;  %v8601_v57 = vld [vmem:[#allocation3 + $0x714] ss:$28 sps:$4 sm:$0xff]  }
 0x690   :  { %6687 = vmatprep.subr.bf16.mxu1 %v8502_v38  ;;  %v6343_v38 = vadd.f32 %v9205_v17, %v3974_v4  ;;  %v8563_v17 = vld [vmem:[#allocation3 + $0x860] ss:$28 sps:$4 sm:$0xff]   ;;  %v8602_v4 = vld [vmem:[#allocation3 + $0xa90] ss:$28 sps:$4 sm:$0xff]  }
 0x691   :  { %v6382_v58 = vadd.f32 %v9201_v16, %v6341_v51  ;;  %v8605_v51 = vld [vmem:[#allocation3 + $0xa58] ss:$28 sps:$4 sm:$0xff]  }
 0x692   :  { %6647 = vmatpush1.bf16.msra.mxu0 %v8497_v24  ;;  %v8557_v24 = vld [vmem:[#allocation3 + $0x898] ss:$28 sps:$4 sm:$0xff]   ;;  %v6384_v9 = vadd.f32 %v9207_v35, %v6343_v38 }
 0x693   :  { %6688 = vmatpush1.bf16.msra.mxu1 %v8500_v39  ;;  %6648 = vmatprep.subr.bf16.mxu0 %v8505_v40  ;;  %v8560_v39 = vld [vmem:[#allocation3 + $0xc18] ss:$28 sps:$4 sm:$0xff]   ;;  %v8568_v40 = vld [vmem:[#allocation3 + $0xbe4] ss:$28 sps:$4 sm:$0xff]  }
 0x694   :  { %6689 = vmatprep.subr.bf16.mxu1 %v8508_v43  ;;  %v8608_v38 = vld [vmem:[#allocation3 + $0xdd8] ss:$28 sps:$4 sm:$0xff]  }
 0x696   :  { %6649 = vmatpush1.bf16.msra.mxu0 %v8503_v41 }
 0x697   :  { %6690 = vmatpush1.bf16.msra.mxu1 %v8506_v30  ;;  %6650 = vmatprep.subr.bf16.mxu0 %v8511_v34  ;;  %v8566_v34 = vld [vmem:[#allocation3 + $0xbe0] ss:$28 sps:$4 sm:$0xff]  }
 0x698   :  { %6691 = vmatprep.subr.bf16.mxu1 %v8514_v32 }
 0x69a   :  { %6651 = vmatpush2.bf16.msra.mxu0 %v8509_v42 }
 0x69b   :  { %6692 = vmatpush2.bf16.msra.mxu1 %v8512_v44  ;;  %6652 = vmatprep.subr.bf16.mxu0 %v8517_v52  ;;  %v8571_v44 = vld [vmem:[#allocation3 + $0x82c] ss:$28 sps:$4 sm:$0xff]  }
 0x69c   :  { %6693 = vmatprep.subr.bf16.mxu1 %v8520_v6  ;;  %v8574_v52 = vld [vmem:[#allocation3 + $0xbac] ss:$28 sps:$4 sm:$0xff]  }
 0x69e   :  { %6653 = vmatpush2.bf16.msra.mxu0 %v8515_v14 }
 0x69f   :  { %6694 = vmatpush2.bf16.msra.mxu1 %v8518_v1  ;;  %6654 = vmatprep.subr.bf16.mxu0 %v8523_v5  ;;  %v8569_v5 = vld [vmem:[#allocation3 + $0x828] ss:$28 sps:$4 sm:$0xff]  }
 0x6a0   :  { %6695 = vmatprep.subr.bf16.mxu1 %v8526_v62  ;;  %v8572_v62 = vld [vmem:[#allocation3 + $0xba8] ss:$28 sps:$4 sm:$0xff]  }
 0x6a2   :  { %6655 = vmatpush2.bf16.msra.mxu0 %v8521_v3 }
 0x6a3   :  { %6696 = vmatpush2.bf16.msra.mxu1 %v8524_v8  ;;  %6656 = vmatprep.subr.bf16.mxu0 %v8529_v10  ;;  %v8577_v10 = vld [vmem:[#allocation3 + $0x7f4] ss:$28 sps:$4 sm:$0xff]  }
 0x6a4   :  { %6697 = vmatprep.subr.bf16.mxu1 %v8532_v12  ;;  %v8580_v12 = vld [vmem:[#allocation3 + $0xb74] ss:$28 sps:$4 sm:$0xff]  }
 0x6a6   :  { %6657 = vmatpush2.bf16.msra.mxu0 %v8527_v15  ;;  %v8575_v15 = vld [vmem:[#allocation3 + $0x7f0] ss:$28 sps:$4 sm:$0xff]  }
 0x6a7   :  { %6698 = vmatpush2.bf16.msra.mxu1 %v8530_v0  ;;  %6658 = vmatprep.subr.bf16.mxu0 %v8535_v18  ;;  %v8578_v0 = vld [vmem:[#allocation3 + $0xb70] ss:$28 sps:$4 sm:$0xff]   ;;  %v8583_v18 = vld [vmem:[#allocation3 + $0x7bc] ss:$28 sps:$4 sm:$0xff]  }
 0x6a8   :  { %6699 = vmatprep.subr.bf16.mxu1 %v8538_v56  ;;  %v8586_v56 = vld [vmem:[#allocation3 + $0xb3c] ss:$28 sps:$4 sm:$0xff]  }
 0x6aa   :  { %6659 = vmatpush2.bf16.msra.mxu0 %v8533_v37  ;;  %v8581_v37 = vld [vmem:[#allocation3 + $0x7b8] ss:$28 sps:$4 sm:$0xff]  }
 0x6ab   :  { %6700 = vmatpush2.bf16.msra.mxu1 %v8536_v19  ;;  %6660 = vmatprep.subr.bf16.mxu0 %v8541_v50  ;;  %v8584_v19 = vld [vmem:[#allocation3 + $0xb38] ss:$28 sps:$4 sm:$0xff]   ;;  %v8589_v50 = vld [vmem:[#allocation3 + $0x784] ss:$28 sps:$4 sm:$0xff]  }
 0x6ac   :  { %6701 = vmatprep.subr.bf16.mxu1 %v8544_v20  ;;  %v8592_v20 = vld [vmem:[#allocation3 + $0xb04] ss:$28 sps:$4 sm:$0xff]  }
 0x6ae   :  { %6661 = vmatpush2.bf16.msra.mxu0 %v8539_v11  ;;  %v8587_v11 = vld [vmem:[#allocation3 + $0x780] ss:$28 sps:$4 sm:$0xff]  }
 0x6af   :  { %6702 = vmatpush2.bf16.msra.mxu1 %v8542_v13  ;;  %6662 = vmatprep.subr.bf16.mxu0 %v8547_v21  ;;  %v8590_v13 = vld [vmem:[#allocation3 + $0xb00] ss:$28 sps:$4 sm:$0xff]  }
 0x6b0   :  { %6703 = vmatprep.subr.bf16.mxu1 %v8550_v25  ;;  %v8595_v25 = vld [vmem:[#allocation3 + $0x74c] ss:$28 sps:$4 sm:$0xff]  }
 0x6b2   :  { %6663 = vmatpush2.bf16.msra.mxu0 %v8545_v27  ;;  %v8598_v27 = vld [vmem:[#allocation3 + $0xacc] ss:$28 sps:$4 sm:$0xff]  }
 0x6b3   :  { %6704 = vmatpush2.bf16.msra.mxu1 %v8548_v28  ;;  %6664 = vmatprep.subr.bf16.mxu0 %v8553_v54  ;;  %v8593_v54 = vld [vmem:[#allocation3 + $0x748] ss:$28 sps:$4 sm:$0xff]  }
 0x6b4   :  { %6705 = vmatprep.subr.bf16.mxu1 %v8556_v55  ;;  %v8596_v55 = vld [vmem:[#allocation3 + $0xac8] ss:$28 sps:$4 sm:$0xff]  }
 0x6b6   :  { %6665 = vmatpush2.bf16.msra.mxu0 %v8551_v29  ;;  %v8604_v29 = vld [vmem:[#allocation3 + $0xa94] ss:$28 sps:$4 sm:$0xff]  }
 0x6b7   :  { %6706 = vmatpush2.bf16.msra.mxu1 %v8554_v31  ;;  %6716 = vmatprep.subr.bf16.mxu0 %v8559_v23  ;;  %v8599_v31 = vld [vmem:[#allocation3 + $0x710] ss:$28 sps:$4 sm:$0xff]   ;;  %v8607_v23 = vld [vmem:[#allocation3 + $0xa5c] ss:$28 sps:$4 sm:$0xff]  }
 0x6b8   :  { %6757 = vmatprep.subr.bf16.mxu1 %v8562_v7  ;;  %v8610_v7 = vld [vmem:[#allocation3 + $0xddc] ss:$28 sps:$4 sm:$0xff]  }
 0x6b9   :  { %v6422_v43 = vpop.f32.mrf.mxu0  ;;  %6667 = vmatmul.mubr.bf16.vlgmr.msra.gmra.mxu0 %v9169_v45 }
 0x6ba   :  { %v6463_v41 = vpop.f32.mrf.mxu1  ;;  %6708 = vmatmul.mubr.bf16.vlgmr.msra.gmra.mxu1 %v9173_v47  ;;  %v6423_v30 = vadd.f32 %v6422_v43, %v6382_v58  ;;  %6717 = vmatpush1.bf16.msra.mxu0 %v8557_v24  ;;  %v8613_v24 = vld [vmem:[#allocation3 + $0xa24] ss:$28 sps:$4 sm:$0xff]   ;;  %v8619_v58 = vld [vmem:[#allocation3 + $0x9ec] ss:$28 sps:$4 sm:$0xff]  }
 0x6bb   :  { %6758 = vmatpush1.bf16.msra.mxu1 %v8560_v39  ;;  %v6424_v32 = vpop.f32.mrf.mxu0  ;;  %6718 = vmatprep.subr.bf16.mxu0 %v8565_v53  ;;  %v8616_v39 = vld [vmem:[#allocation3 + $0xda4] ss:$28 sps:$4 sm:$0xff]   ;;  %v8622_v43 = vld [vmem:[#allocation3 + $0xd6c] ss:$28 sps:$4 sm:$0xff]  }
 0x6bc   :  { %v6465_v42 = vpop.f32.mrf.mxu1  ;;  %6759 = vmatprep.subr.bf16.mxu1 %v8568_v40  ;;  %v6464_v16 = vadd.f32 %v6463_v41, %v6423_v30  ;;  %v6425_v6 = vadd.f32 %v6424_v32, %v6384_v9  ;;  %6748 = vmatprep.mubr.bf16.mxu0 %v9179_v59  ;;  %v8611_v53 = vld [vmem:[#allocation3 + $0xa20] ss:$28 sps:$4 sm:$0xff]   ;;  %v8617_v41 = vld [vmem:[#allocation3 + $0x9e8] ss:$28 sps:$4 sm:$0xff]   ;;  %v8625_v30 = vld [vmem:[#allocation3 + $0x9b4] ss:$28 sps:$4 sm:$0xff]  }
 0x6bd   :  { %6789 = vmatprep.mubr.bf16.mxu1 %v9183_v33  ;;  %v6426_v14 = vpop.f32.mrf.mxu0  ;;  %v8614_v40 = vld [vmem:[#allocation3 + $0xda0] ss:$28 sps:$4 sm:$0xff]   ;;  %v8620_v9 = vld [vmem:[#allocation3 + $0xd68] ss:$28 sps:$4 sm:$0xff]   ;;  %v8626_v32 = vld [vmem:[#allocation3 + $0xd30] ss:$28 sps:$4 sm:$0xff]  }
 0x6be   :  { %v6467_v1 = vpop.f32.mrf.mxu1  ;;  %8717 = vtanh.f32 %v6464_v16  ;;  %v6466_v35 = vadd.f32 %v6465_v42, %v6425_v6  ;;  %6719 = vmatpush1.bf16.msra.mxu0 %v8563_v17  ;;  %v8628_v17 = vld [vmem:[#allocation3 + $0xd34] ss:$28 sps:$4 sm:$0xff]   ;;  %v8631_v42 = vld [vmem:[#allocation3 + $0x97c] ss:$28 sps:$4 sm:$0xff]   ;;  %v8637_v6 = vld [vmem:[#allocation3 + $0x944] ss:$28 sps:$4 sm:$0xff]  }
 0x6bf   :  { %6760 = vmatpush1.bf16.msra.mxu1 %v8566_v34  ;;  %v6427_v3 = vpop.f32.mrf.mxu0  ;;  %6720 = vmatprep.subr.bf16.mxu0 %v8571_v44  ;;  %v8623_v34 = vld [vmem:[#allocation3 + $0x9b0] ss:$28 sps:$4 sm:$0xff]   ;;  %v8634_v44 = vld [vmem:[#allocation3 + $0xcfc] ss:$28 sps:$4 sm:$0xff]   ;;  %v8640_v14 = vld [vmem:[#allocation3 + $0xcc4] ss:$28 sps:$4 sm:$0xff]  }
 0x6c0   :  { %v6468_v8 = vpop.f32.mrf.mxu1  ;;  %6761 = vmatprep.subr.bf16.mxu1 %v8574_v52  ;;  %8719 = vtanh.f32 %v6466_v35  ;;  %v8629_v52 = vld [vmem:[#allocation3 + $0x978] ss:$28 sps:$4 sm:$0xff]   ;;  %v8635_v1 = vld [vmem:[#allocation3 + $0x940] ss:$28 sps:$4 sm:$0xff]   ;;  %v8641_v3 = vld [vmem:[#allocation3 + $0x908] ss:$28 sps:$4 sm:$0xff]  }
 0x6c1   :  { %v8632_v16 = vld [vmem:[#allocation3 + $0xcf8] ss:$28 sps:$4 sm:$0xff]   ;;  %v8638_v35 = vld [vmem:[#allocation3 + $0xcc0] ss:$28 sps:$4 sm:$0xff]   ;;  %v8644_v8 = vld [vmem:[#allocation3 + $0xc88] ss:$28 sps:$4 sm:$0xff]  }
 0x6c2   :  { %6721 = vmatpush1.bf16.msra.mxu0 %v8569_v5  ;;  %v8643_v5 = vld [vmem:[#allocation3 + $0x90c] ss:$28 sps:$4 sm:$0xff]  }
 0x6c3   :  { %6762 = vmatpush1.bf16.msra.mxu1 %v8572_v62  ;;  %6722 = vmatprep.subr.bf16.mxu0 %v8577_v10  ;;  %v8646_v62 = vld [vmem:[#allocation3 + $0xc8c] ss:$28 sps:$4 sm:$0xff]   ;;  %v8649_v10 = vld [vmem:[#allocation3 + $0x8d4] ss:$28 sps:$4 sm:$0xff]  }
 0x6c4   :  { %6763 = vmatprep.subr.bf16.mxu1 %v8580_v12  ;;  %v8652_v12 = vld [vmem:[#allocation3 + $0xc54] ss:$28 sps:$4 sm:$0xff]  }
 0x6c6   :  { %6723 = vmatpush1.bf16.msra.mxu0 %v8575_v15  ;;  %v8647_v15 = vld [vmem:[#allocation3 + $0x8d0] ss:$28 sps:$4 sm:$0xff]  }
 0x6c7   :  { %6764 = vmatpush1.bf16.msra.mxu1 %v8578_v0  ;;  %6724 = vmatprep.subr.bf16.mxu0 %v8583_v18  ;;  %v8650_v0 = vld [vmem:[#allocation3 + $0xc50] ss:$28 sps:$4 sm:$0xff]   ;;  %v8653_v18 = vld [vmem:[#allocation3 + $0x360] ss:$28 sps:$4 sm:$0xff]  }
 0x6c8   :  { %6765 = vmatprep.subr.bf16.mxu1 %v8586_v56  ;;  %v8654_v56 = vld [vmem:[#allocation3 + $0x6e0] ss:$28 sps:$4 sm:$0xff]  }
 0x6ca   :  { %6725 = vmatpush1.bf16.msra.mxu0 %v8581_v37  ;;  %v8655_v37 = vld [vmem:[#allocation3 + $0x1a0] ss:$28 sps:$4 sm:$0xff]  }
 0x6cb   :  { %6766 = vmatpush1.bf16.msra.mxu1 %v8584_v19  ;;  %v8718_v21 = vpop.eup %8717  ;;  %6726 = vmatprep.subr.bf16.mxu0 %v8589_v50  ;;  %v8656_v19 = vld [vmem:[#allocation3 + $0x520] ss:$28 sps:$4 sm:$0xff]   ;;  %v8657_v50 = vld [vmem:[#allocation3 + $0x328] ss:$28 sps:$4 sm:$0xff]  }
 0x6cc   :  { %6767 = vmatprep.subr.bf16.mxu1 %v8592_v20  ;;  %6965 = vst [vmem:[%s9285_s7] sm:$0xff] %v8718_v21  ;;  %v8658_v20 = vld [vmem:[#allocation3 + $0x6a8] ss:$28 sps:$4 sm:$0xff]  }
 0x6cd   :  { %v8720_v28 = vpop.eup %8719  ;;  %v8659_v21 = vld [vmem:[#allocation3 + $0x168] ss:$28 sps:$4 sm:$0xff]  }
 0x6ce   :  { %6966 = vst [vmem:[%s9285_s7 + $0x8] sm:$0xff] %v8720_v28  ;;  %6727 = vmatpush1.bf16.msra.mxu0 %v8587_v11 }
 0x6cf   :  { %6768 = vmatpush1.bf16.msra.mxu1 %v8590_v13  ;;  %6728 = vmatprep.subr.bf16.mxu0 %v8595_v25  ;;  %v8660_v25 = vld [vmem:[#allocation3 + $0x4e8] ss:$28 sps:$4 sm:$0xff]  }
 0x6d0   :  { %6769 = vmatprep.subr.bf16.mxu1 %v8598_v27 }
 0x6d2   :  { %6729 = vmatpush1.bf16.msra.mxu0 %v8593_v54  ;;  %v8661_v54 = vld [vmem:[#allocation3 + $0x2f0] ss:$28 sps:$4 sm:$0xff]  }
 0x6d3   :  { %6770 = vmatpush1.bf16.msra.mxu1 %v8596_v55  ;;  %6730 = vmatprep.subr.bf16.mxu0 %v8601_v57  ;;  %v8662_v55 = vld [vmem:[#allocation3 + $0x670] ss:$28 sps:$4 sm:$0xff]  }
 0x6d4   :  { %6771 = vmatprep.subr.bf16.mxu1 %v8604_v29 }
 0x6d6   :  { %6731 = vmatpush1.bf16.msra.mxu0 %v8599_v31  ;;  %v8663_v31 = vld [vmem:[#allocation3 + $0x130] ss:$28 sps:$4 sm:$0xff]  }
 0x6d7   :  { %6772 = vmatpush1.bf16.msra.mxu1 %v8602_v4  ;;  %6732 = vmatprep.subr.bf16.mxu0 %v8607_v23  ;;  %v8664_v4 = vld [vmem:[#allocation3 + $0x4b0] ss:$28 sps:$4 sm:$0xff]  }
 0x6d8   :  { %6773 = vmatprep.subr.bf16.mxu1 %v8610_v7 }
 0x6da   :  { %6733 = vmatpush2.bf16.msra.mxu0 %v8605_v51  ;;  %v8665_v51 = vld [vmem:[#allocation3 + $0x2b8] ss:$28 sps:$4 sm:$0xff]  }
 0x6db   :  { %6774 = vmatpush2.bf16.msra.mxu1 %v8608_v38  ;;  %6734 = vmatprep.subr.bf16.mxu0 %v8613_v24  ;;  %v8666_v38 = vld [vmem:[#allocation3 + $0x638] ss:$28 sps:$4 sm:$0xff]  }
 0x6dc   :  { %6775 = vmatprep.subr.bf16.mxu1 %v8616_v39  ;;  %v8667_v24 = vld [vmem:[#allocation3 + $0xf8] ss:$28 sps:$4 sm:$0xff]  }
 0x6dd   :  { %v8668_v39 = vld [vmem:[#allocation3 + $0x478] ss:$28 sps:$4 sm:$0xff]  }
 0x6de   :  { %6735 = vmatpush2.bf16.msra.mxu0 %v8611_v53  ;;  %v8671_v53 = vld [vmem:[#allocation3 + $0xc0] ss:$28 sps:$4 sm:$0xff]  }
 0x6df   :  { %6776 = vmatpush2.bf16.msra.mxu1 %v8614_v40  ;;  %6736 = vmatprep.subr.bf16.mxu0 %v8619_v58  ;;  %v8672_v40 = vld [vmem:[#allocation3 + $0x440] ss:$28 sps:$4 sm:$0xff]   ;;  %v8673_v58 = vld [vmem:[#allocation3 + $0x248] ss:$28 sps:$4 sm:$0xff]  }
 0x6e0   :  { %6777 = vmatprep.subr.bf16.mxu1 %v8622_v43  ;;  %v8674_v43 = vld [vmem:[#allocation3 + $0x5c8] ss:$28 sps:$4 sm:$0xff]  }
 0x6e2   :  { %6737 = vmatpush2.bf16.msra.mxu0 %v8617_v41  ;;  %v8675_v41 = vld [vmem:[#allocation3 + $0x88] ss:$28 sps:$4 sm:$0xff]  }
 0x6e3   :  { %6778 = vmatpush2.bf16.msra.mxu1 %v8620_v9  ;;  %6738 = vmatprep.subr.bf16.mxu0 %v8625_v30  ;;  %v8676_v9 = vld [vmem:[#allocation3 + $0x408] ss:$28 sps:$4 sm:$0xff]   ;;  %v8677_v30 = vld [vmem:[#allocation3 + $0x210] ss:$28 sps:$4 sm:$0xff]  }
 0x6e4   :  { %6779 = vmatprep.subr.bf16.mxu1 %v8628_v17  ;;  %v8678_v17 = vld [vmem:[#allocation3 + $0x590] ss:$28 sps:$4 sm:$0xff]  }
 0x6e6   :  { %6739 = vmatpush2.bf16.msra.mxu0 %v8623_v34  ;;  %v8679_v34 = vld [vmem:[#allocation3 + $0x50] ss:$28 sps:$4 sm:$0xff]  }
 0x6e7   :  { %6780 = vmatpush2.bf16.msra.mxu1 %v8626_v32  ;;  %6740 = vmatprep.subr.bf16.mxu0 %v8631_v42  ;;  %v8680_v32 = vld [vmem:[#allocation3 + $0x3d0] ss:$28 sps:$4 sm:$0xff]   ;;  %v8681_v42 = vld [vmem:[#allocation3 + $0x1d8] ss:$28 sps:$4 sm:$0xff]  }
 0x6e8   :  { %6781 = vmatprep.subr.bf16.mxu1 %v8634_v44  ;;  %v8682_v44 = vld [vmem:[#allocation3 + $0x558] ss:$28 sps:$4 sm:$0xff]  }
 0x6ea   :  { %6741 = vmatpush2.bf16.msra.mxu0 %v8629_v52  ;;  %v8683_v52 = vld [vmem:[#allocation3 + $0x18] ss:$28 sps:$4 sm:$0xff]  }
 0x6eb   :  { %6782 = vmatpush2.bf16.msra.mxu1 %v8632_v16  ;;  %6742 = vmatprep.subr.bf16.mxu0 %v8637_v6  ;;  %v8684_v16 = vld [vmem:[#allocation3 + $0x398] ss:$28 sps:$4 sm:$0xff]   ;;  %v8685_v6 = vld [vmem:[#allocation3 + $0xa60] ss:$28 sps:$4 sm:$0xff]  }
 0x6ec   :  { %6783 = vmatprep.subr.bf16.mxu1 %v8640_v14  ;;  %v8686_v14 = vld [vmem:[#allocation3 + $0xde0] ss:$28 sps:$4 sm:$0xff]  }
 0x6ee   :  { %6743 = vmatpush2.bf16.msra.mxu0 %v8635_v1  ;;  %v8687_v1 = vld [vmem:[#allocation3 + $0x8a0] ss:$28 sps:$4 sm:$0xff]  }
 0x6ef   :  { %6784 = vmatpush2.bf16.msra.mxu1 %v8638_v35  ;;  %6744 = vmatprep.subr.bf16.mxu0 %v8643_v5  ;;  %v8688_v35 = vld [vmem:[#allocation3 + $0xc20] ss:$28 sps:$4 sm:$0xff]   ;;  %v8689_v5 = vld [vmem:[#allocation3 + $0xa28] ss:$28 sps:$4 sm:$0xff]  }
 0x6f0   :  { %6785 = vmatprep.subr.bf16.mxu1 %v8646_v62  ;;  %v8690_v62 = vld [vmem:[#allocation3 + $0xda8] ss:$28 sps:$4 sm:$0xff]  }
 0x6f2   :  { %6745 = vmatpush2.bf16.msra.mxu0 %v8641_v3  ;;  %v8691_v3 = vld [vmem:[#allocation3 + $0x868] ss:$28 sps:$4 sm:$0xff]  }
 0x6f3   :  { %6786 = vmatpush2.bf16.msra.mxu1 %v8644_v8  ;;  %6746 = vmatprep.subr.bf16.mxu0 %v8649_v10  ;;  %v8692_v8 = vld [vmem:[#allocation3 + $0xbe8] ss:$28 sps:$4 sm:$0xff]   ;;  %v8693_v10 = vld [vmem:[#allocation3 + $0x9f0] ss:$28 sps:$4 sm:$0xff]  }
 0x6f4   :  { %6787 = vmatprep.subr.bf16.mxu1 %v8652_v12  ;;  %v8694_v12 = vld [vmem:[#allocation3 + $0xd70] ss:$28 sps:$4 sm:$0xff]  }
 0x6f6   :  { %6747 = vmatpush2.bf16.msra.mxu0 %v8647_v15  ;;  %v8695_v15 = vld [vmem:[#allocation3 + $0x830] ss:$28 sps:$4 sm:$0xff]  }
 0x6f7   :  { %6788 = vmatpush2.bf16.msra.mxu1 %v8650_v0  ;;  %7795 = vmatprep.subr.bf16.mxu0 %v8653_v18  ;;  %v8696_v0 = vld [vmem:[#allocation3 + $0xbb0] ss:$28 sps:$4 sm:$0xff]   ;;  %v8699_v18 = vld [vmem:[#allocation3 + $0x7f8] ss:$28 sps:$4 sm:$0xff]  }
 0x6f8   :  { %7817 = vmatprep.subr.bf16.mxu1 %v8654_v56  ;;  %v8700_v56 = vld [vmem:[#allocation3 + $0xb78] ss:$28 sps:$4 sm:$0xff]  }
 0x6f9   :  { %v9231_v11 = vpop.f32.mrf.mxu0  ;;  %6749 = vmatmul.mubr.bf16.vlgmr.msra.gmra.mxu0 %v9177_v49 }
 0x6fa   :  { %v9233_v13 = vpop.f32.mrf.mxu1  ;;  %6790 = vmatmul.mubr.bf16.vlgmr.msra.gmra.mxu1 %v9181_v63  ;;  %7796 = vmatpush3.bf16.msra.mxu0 %v8655_v37  ;;  %v8701_v37 = vld [vmem:[#allocation3 + $0x980] ss:$28 sps:$4 sm:$0xff]  }
 0x6fb   :  { %7818 = vmatpush3.bf16.msra.mxu1 %v8656_v19  ;;  %v9237_v27 = vpop.f32.mrf.mxu0  ;;  %7797 = vmatprep.subr.bf16.mxu0 %v8657_v50  ;;  %v8702_v19 = vld [vmem:[#allocation3 + $0xd00] ss:$28 sps:$4 sm:$0xff]   ;;  %v8705_v50 = vld [vmem:[#allocation3 + $0x948] ss:$28 sps:$4 sm:$0xff]  }
 0x6fc   :  { %v9239_v28 = vpop.f32.mrf.mxu1  ;;  %7819 = vmatprep.subr.bf16.mxu1 %v8658_v20  ;;  %6830 = vmatprep.mubr.bf16.mxu0 %v9171_v46  ;;  %v8669_v46 = vld [vmem:[#allocation3 + $0x280] ss:$28 sps:$4 sm:$0xff]   ;;  %v8706_v20 = vld [vmem:[#allocation3 + $0xcc8] ss:$28 sps:$4 sm:$0xff]  }
 0x6fd   :  { %6870 = vmatprep.mubr.bf16.mxu1 %v9175_v48  ;;  %v6508_v57 = vpop.f32.mrf.mxu0  ;;  %v8670_v48 = vld [vmem:[#allocation3 + $0x600] ss:$28 sps:$4 sm:$0xff]  }
 0x6fe   :  { %v6549_v29 = vpop.f32.mrf.mxu1  ;;  %7798 = vmatpush3.bf16.msra.mxu0 %v8659_v21  ;;  %v8707_v21 = vld [vmem:[#allocation3 + $0x788] ss:$28 sps:$4 sm:$0xff]   ;;  %v8711_v57 = vld [vmem:[#allocation3 + $0x750] ss:$28 sps:$4 sm:$0xff]  }
 0x6ff   :  { %7820 = vmatpush3.bf16.msra.mxu1 %v8660_v25  ;;  %v6509_v23 = vpop.f32.mrf.mxu0  ;;  %7799 = vmatprep.subr.bf16.mxu0 %v8661_v54  ;;  %v8708_v25 = vld [vmem:[#allocation3 + $0xb08] ss:$28 sps:$4 sm:$0xff]   ;;  %v8709_v54 = vld [vmem:[#allocation3 + $0x910] ss:$28 sps:$4 sm:$0xff]  }
 0x700   :  { %v6550_v7 = vpop.f32.mrf.mxu1  ;;  %7821 = vmatprep.subr.bf16.mxu1 %v8662_v55  ;;  %v8710_v55 = vld [vmem:[#allocation3 + $0xc90] ss:$28 sps:$4 sm:$0xff]   ;;  %v3978_v23 = vrot.slane %v9211_v22, %v8994_v60 }
 0x701   :  { %v8712_v29 = vld [vmem:[#allocation3 + $0xad0] ss:$28 sps:$4 sm:$0xff]   ;;  %v3982_v7 = vrot.slane %v9211_v22, %v8997_v61 }
 0x702   :  { %7800 = vmatpush3.bf16.msra.mxu0 %v8663_v31  ;;  %v8713_v31 = vld [vmem:[#allocation3 + $0x8d8] ss:$28 sps:$4 sm:$0xff]  }
 0x703   :  { %7822 = vmatpush3.bf16.msra.mxu1 %v8664_v4  ;;  %7801 = vmatprep.subr.bf16.mxu0 %v8665_v51  ;;  %v8714_v4 = vld [vmem:[#allocation3 + $0xc58] ss:$28 sps:$4 sm:$0xff]  }
 0x704   :  { %7823 = vmatprep.subr.bf16.mxu1 %v8666_v38  ;;  %v8715_v51 = vld [vmem:[#allocation3 + $0x718] ss:$28 sps:$4 sm:$0xff]  }
 0x705   :  { %v8716_v38 = vld [vmem:[#allocation3 + $0xa98] ss:$28 sps:$4 sm:$0xff]  }
 0x706   :  { %7802 = vmatpush3.bf16.msra.mxu0 %v8667_v24  ;;  %v6505_v24 = vadd.f32 %v9231_v11, %v3978_v23 }
 0x707   :  { %7824 = vmatpush3.bf16.msra.mxu1 %v8668_v39  ;;  %7803 = vmatprep.subr.bf16.mxu0 %v8669_v46  ;;  %v6507_v39 = vadd.f32 %v9237_v27, %v3982_v7 }
 0x708   :  { %7825 = vmatprep.subr.bf16.mxu1 %v8670_v48  ;;  %v6546_v46 = vadd.f32 %v9233_v13, %v6505_v24 }
 0x709   :  { %v6548_v60 = vadd.f32 %v9239_v28, %v6507_v39 }
 0x70a   :  { %7804 = vmatpush3.bf16.msra.mxu0 %v8671_v53 }
 0x70b   :  { %7826 = vmatpush3.bf16.msra.mxu1 %v8672_v40  ;;  %7805 = vmatprep.subr.bf16.mxu0 %v8673_v58 }
 0x70c   :  { %7827 = vmatprep.subr.bf16.mxu1 %v8674_v43 }
 0x70e   :  { %7806 = vmatpush3.bf16.msra.mxu0 %v8675_v41 }
 0x70f   :  { %7828 = vmatpush3.bf16.msra.mxu1 %v8676_v9  ;;  %7807 = vmatprep.subr.bf16.mxu0 %v8677_v30 }
 0x710   :  { %7829 = vmatprep.subr.bf16.mxu1 %v8678_v17 }
 0x712   :  { %7808 = vmatpush3.bf16.msra.mxu0 %v8679_v34 }
 0x713   :  { %7830 = vmatpush3.bf16.msra.mxu1 %v8680_v32  ;;  %7809 = vmatprep.subr.bf16.mxu0 %v8681_v42 }
 0x714   :  { %7831 = vmatprep.subr.bf16.mxu1 %v8682_v44 }
 0x716   :  { %7810 = vmatpush3.bf16.msra.mxu0 %v8683_v52 }
 0x717   :  { %7832 = vmatpush3.bf16.msra.mxu1 %v8684_v16  ;;  %7839 = vmatprep.subr.bf16.mxu0 %v8685_v6  ;;  %v3986_v6 = vrot.slane %v9211_v22, %v9126_v36 }
 0x718   :  { %7861 = vmatprep.subr.bf16.mxu1 %v8686_v14  ;;  %v3990_v14 = vrot.slane %v9211_v22, %v9129_v26 }
 0x719   :  { %6831 = vmatmul.mubr.bf16.vlgmr.msra.gmra.mxu0 %v9169_v45  ;;  %v8697_v45 = vld [vmem:[#allocation3 + $0x9b8] ss:$28 sps:$4 sm:$0xff]  }
 0x71a   :  { %6871 = vmatmul.mubr.bf16.vlgmr.msra.gmra.mxu1 %v9173_v47  ;;  %7840 = vmatpush3.bf16.msra.mxu0 %v8687_v1  ;;  %v8698_v47 = vld [vmem:[#allocation3 + $0xd38] ss:$28 sps:$4 sm:$0xff]  }
 0x71b   :  { %7862 = vmatpush3.bf16.msra.mxu1 %v8688_v35  ;;  %7841 = vmatprep.subr.bf16.mxu0 %v8689_v5 }
 0x71c   :  { %7863 = vmatprep.subr.bf16.mxu1 %v8690_v62  ;;  %6910 = vmatprep.mubr.bf16.mxu0 %v9179_v59  ;;  %v8703_v59 = vld [vmem:[#allocation3 + $0x7c0] ss:$28 sps:$4 sm:$0xff]  }
 0x71d   :  { %6950 = vmatprep.mubr.bf16.mxu1 %v9183_v33  ;;  %v8704_v33 = vld [vmem:[#allocation3 + $0xb40] ss:$28 sps:$4 sm:$0xff]  }
 0x71e   :  { %7842 = vmatpush3.bf16.msra.mxu0 %v8691_v3 }
 0x71f   :  { %7864 = vmatpush3.bf16.msra.mxu1 %v8692_v8  ;;  %7843 = vmatprep.subr.bf16.mxu0 %v8693_v10 }
 0x720   :  { %7865 = vmatprep.subr.bf16.mxu1 %v8694_v12 }
 0x722   :  { %7844 = vmatpush3.bf16.msra.mxu0 %v8695_v15 }
 0x723   :  { %7866 = vmatpush3.bf16.msra.mxu1 %v8696_v0  ;;  %7845 = vmatprep.subr.bf16.mxu0 %v8697_v45 }
 0x724   :  { %7867 = vmatprep.subr.bf16.mxu1 %v8698_v47 }
 0x726   :  { %7846 = vmatpush3.bf16.msra.mxu0 %v8699_v18 }
 0x727   :  { %7868 = vmatpush3.bf16.msra.mxu1 %v8700_v56  ;;  %7847 = vmatprep.subr.bf16.mxu0 %v8701_v37 }
 0x728   :  { %7869 = vmatprep.subr.bf16.mxu1 %v8702_v19 }
 0x72a   :  { %7848 = vmatpush3.bf16.msra.mxu0 %v8703_v59 }
 0x72b   :  { %7870 = vmatpush3.bf16.msra.mxu1 %v8704_v33  ;;  %7849 = vmatprep.subr.bf16.mxu0 %v8705_v50 }
 0x72c   :  { %7871 = vmatprep.subr.bf16.mxu1 %v8706_v20 }
 0x72e   :  { %7850 = vmatpush3.bf16.msra.mxu0 %v8707_v21 }
 0x72f   :  { %7872 = vmatpush3.bf16.msra.mxu1 %v8708_v25  ;;  %7851 = vmatprep.subr.bf16.mxu0 %v8709_v54 }
 0x730   :  { %7873 = vmatprep.subr.bf16.mxu1 %v8710_v55 }
 0x732   :  { %7852 = vmatpush3.bf16.msra.mxu0 %v8711_v57  ;;  %v3994_v57 = vrot.slane %v9211_v22, %v9132_v2 }
 0x733   :  { %7874 = vmatpush3.bf16.msra.mxu1 %v8712_v29  ;;  %7853 = vmatprep.subr.bf16.mxu0 %v8713_v31 }
 0x734   :  { %7875 = vmatprep.subr.bf16.mxu1 %v8714_v4 }
 0x736   :  { %7854 = vmatpush3.bf16.msra.mxu0 %v8715_v51 }
 0x737   :  { %7876 = vmatpush3.bf16.msra.mxu1 %v8716_v38 }
 0x739   :  { %v6586_v48 = vpop.f32.mrf.mxu0  ;;  %6911 = vmatmul.mubr.bf16.vlgmr.msra.gmra.mxu0 %v9177_v49 }
 0x73a   :  { %v6627_v53 = vpop.f32.mrf.mxu1  ;;  %6951 = vmatmul.mubr.bf16.vlgmr.msra.gmra.mxu1 %v9181_v63  ;;  %v6587_v61 = vadd.f32 %v6586_v48, %v6546_v46 }
 0x73b   :  { %v6588_v40 = vpop.f32.mrf.mxu0 }
 0x73c   :  { %v6629_v58 = vpop.f32.mrf.mxu1  ;;  %v6628_v43 = vadd.f32 %v6627_v53, %v6587_v61  ;;  %v6589_v41 = vadd.f32 %v6588_v40, %v6548_v60 }
 0x73d   :  { %v6590_v11 = vpop.f32.mrf.mxu0 }
 0x73e   :  { %v6631_v9 = vpop.f32.mrf.mxu1  ;;  %8721 = vtanh.f32 %v6628_v43  ;;  %v6630_v27 = vadd.f32 %v6629_v58, %v6589_v41 }
 0x73f   :  { %v6591_v30 = vpop.f32.mrf.mxu0 }
 0x740   :  { %v6632_v17 = vpop.f32.mrf.mxu1  ;;  %8723 = vtanh.f32 %v6630_v27 }
 0x74b   :  { %v8722_v13 = vpop.eup %8721 }
 0x74c   :  { %6967 = vst [vmem:[%s9285_s7 + $0x10] sm:$0xff] %v8722_v13 }
 0x74d   :  { %v8724_v49 = vpop.eup %8723 }
 0x74e   :  { %6968 = vst [vmem:[%s9285_s7 + $0x18] sm:$0xff] %v8724_v49 }
 0x779   :  { %v6668_v63 = vpop.f32.mrf.mxu0 }
 0x77a   :  { %v6709_v28 = vpop.f32.mrf.mxu1  ;;  %v6669_v1 = vadd.f32 %v6668_v63, %v3986_v6 }
 0x77b   :  { %v6670_v34 = vpop.f32.mrf.mxu0 }
 0x77c   :  { %v6711_v32 = vpop.f32.mrf.mxu1  ;;  %v6671_v35 = vadd.f32 %v6670_v34, %v3990_v14  ;;  %v6710_v5 = vadd.f32 %v6709_v28, %v6669_v1 }
 0x77d   :  { %v6672_v42 = vpop.f32.mrf.mxu0 }
 0x77e   :  { %v6713_v44 = vpop.f32.mrf.mxu1  ;;  %v6712_v8 = vadd.f32 %v6711_v32, %v6671_v35 }
 0x77f   :  { %v6673_v52 = vpop.f32.mrf.mxu0 }
 0x780   :  { %v6714_v16 = vpop.f32.mrf.mxu1 }
 0x7b9   :  { %v6750_v62 = vpop.f32.mrf.mxu0 }
 0x7ba   :  { %v6791_v3 = vpop.f32.mrf.mxu1  ;;  %v6751_v10 = vadd.f32 %v6750_v62, %v6710_v5 }
 0x7bb   :  { %v6752_v12 = vpop.f32.mrf.mxu0 }
 0x7bc   :  { %v6793_v15 = vpop.f32.mrf.mxu1  ;;  %v6792_v0 = vadd.f32 %v6791_v3, %v6751_v10  ;;  %v6753_v45 = vadd.f32 %v6752_v12, %v6712_v8 }
 0x7bd   :  { %v6754_v47 = vpop.f32.mrf.mxu0 }
 0x7be   :  { %v6795_v18 = vpop.f32.mrf.mxu1  ;;  %8725 = vtanh.f32 %v6792_v0  ;;  %v6794_v56 = vadd.f32 %v6793_v15, %v6753_v45 }
 0x7bf   :  { %v6755_v37 = vpop.f32.mrf.mxu0 }
 0x7c0   :  { %v6796_v36 = vpop.f32.mrf.mxu1  ;;  %8727 = vtanh.f32 %v6794_v56 }
 0x7cb   :  { %v8726_v19 = vpop.eup %8725 }
 0x7cc   :  { %6969 = vst [vmem:[%s9285_s7 + $0x20] sm:$0xff] %v8726_v19 }
 0x7cd   :  { %v8728_v26 = vpop.eup %8727 }
 0x7ce   :  { %6970 = vst [vmem:[%s9285_s7 + $0x28] sm:$0xff] %v8728_v26 }
 0x7d9   :  { %v7811_v59 = vpop.f32.mrf.mxu0 }
 0x7da   :  { %v7833_v33 = vpop.f32.mrf.mxu1 }
 0x7db   :  { %v7812_v50 = vpop.f32.mrf.mxu0 }
 0x7dc   :  { %v7834_v20 = vpop.f32.mrf.mxu1  ;;  %v7813_v29 = vadd.f32 %v7812_v50, %v7811_v59 }
 0x7dd   :  { %v7814_v21 = vpop.f32.mrf.mxu0  ;;  %v7835_v4 = vadd.f32 %v7834_v20, %v7833_v33 }
 0x7de   :  { %v7836_v25 = vpop.f32.mrf.mxu1  ;;  %v6833_v31 = vadd.f32 %v7813_v29, %v3994_v57 }
 0x7df   :  { %v7815_v54 = vpop.f32.mrf.mxu0 }
 0x7e0   :  { %v7837_v55 = vpop.f32.mrf.mxu1  ;;  %v6873_v24 = vadd.f32 %v7835_v4, %v6833_v31 }
 0x7f9   :  { %v7855_v23 = vpop.f32.mrf.mxu0 }
 0x7fa   :  { %v7877_v7 = vpop.f32.mrf.mxu1 }
 0x7fb   :  { %v7856_v51 = vpop.f32.mrf.mxu0 }
 0x7fc   :  { %v7878_v38 = vpop.f32.mrf.mxu1  ;;  %v7857_v39 = vadd.f32 %v7856_v51, %v7855_v23 }
 0x7fd   :  { %v7858_v46 = vpop.f32.mrf.mxu0  ;;  %v7879_v60 = vadd.f32 %v7878_v38, %v7877_v7 }
 0x7fe   :  { %v7880_v48 = vpop.f32.mrf.mxu1  ;;  %v6913_v53 = vadd.f32 %v7857_v39, %v6873_v24 }
 0x7ff   :  { %v7859_v61 = vpop.f32.mrf.mxu0 }
 0x800   :  { %v7881_v40 = vpop.f32.mrf.mxu1  ;;  %v6953_v58 = vadd.f32 %v7879_v60, %v6913_v53 }
 0x802   :  { %8729 = vtanh.f32 %v6953_v58 }
 0x80f   :  { %v8730_v43 = vpop.eup %8729 }
 0x810   :  { %6971 = vst [vmem:[%s9285_s7 + $0x30] sm:$0xff] %v8730_v43 }
 0x811   :  { %6976 = vsyncpa [#allocation6], 1 }
 0x812   :  { %6977 = vsyncpa [#allocation8], 1 }
 0x813   :  { %6978 = vsyncpa [#allocation11], 1 }
 0x814   :  { %6979 = vsyncmov [#allocation4] }
 0x817   :  { %s6980_s1 = vpop.sfrf %6979 }
 0x818   :  { %p7784_p2 = scmp.ne.s32.totalorder %s6980_s1, 0 }
 0x81a   :  { %6984 = shalt.err (%p7784_p2)  }
 0x81b   :  { %6986 = vsyncmov [#allocation4 + $0x1] }
 0x81e   :  { %s6987_s23 = vpop.sfrf %6986 }
 0x81f   :  { %p7785_p3 = scmp.ne.s32.totalorder %s6987_s23, 0 }
 0x821   :  { %6991 = shalt.err (%p7785_p3)  }

</bundles_post_ra>
